<compile_context>
chip_gen: v7x
topology: tpu7x:2x2x1
jax: 0.10.0
libtpu: 0.0.40
codegen_flags: <defaults>
</compile_context>

<pallas_src>
import jax
import jax.numpy as jnp
from jax.experimental import pallas as pl
from jax.experimental.pallas import tpu as pltpu

_VMEM = pl.BlockSpec(memory_space=pltpu.MemorySpace.VMEM)


# ---------------------------------------------------------------------------
# Kernel 1: all four curvature MLPs (curv_mlp + 3 fn_mlp, each out-dim 1)
# fused into one wide MLP.  First layers are concatenated column-wise
# (nfeat, 4*nhid) -> lane-full 128-wide hidden; the second layer is a
# block-diagonal (4*nhid, 4) matrix, so column m of the sigmoid output equals
# sigmoid(fc2_m(relu(fc1_m(x)))) of MLP m.  Column 0 = kappa, columns 1.. = fn.
# ---------------------------------------------------------------------------
def _fused_mlp_kernel(x_ref, w1_ref, b1_ref, w2_ref, b2_ref, o_ref):
    h = jnp.maximum(
        jnp.dot(x_ref[...], w1_ref[...], preferred_element_type=jnp.float32)
        + b1_ref[...],
        0.0,
    )
    out = jnp.dot(h, w2_ref[...], preferred_element_type=jnp.float32) + b2_ref[...]
    o_ref[...] = jax.nn.sigmoid(out)


def fused_curvature_mlps(x, w1_all, b1_all, w2_bd, b2_all, *, tile_n=None):
    n, f = x.shape
    h = w1_all.shape[1]
    o = w2_bd.shape[1]
    if tile_n is None:
        tile_n = n if n <= 512 else 512
    assert n % tile_n == 0
    return pl.pallas_call(
        _fused_mlp_kernel,
        out_shape=jax.ShapeDtypeStruct((n, o), jnp.float32),
        grid=(n // tile_n,),
        in_specs=[
            pl.BlockSpec((tile_n, f), lambda i: (i, 0)),
            pl.BlockSpec((f, h), lambda i: (0, 0)),
            pl.BlockSpec((1, h), lambda i: (0, 0)),
            pl.BlockSpec((h, o), lambda i: (0, 0)),
            pl.BlockSpec((1, o), lambda i: (0, 0)),
        ],
        out_specs=pl.BlockSpec((tile_n, o), lambda i: (i, 0)),
        compiler_params=pltpu.CompilerParams(dimension_semantics=("parallel",)),
    )(x, w1_all, b1_all, w2_bd, b2_all)


# ---------------------------------------------------------------------------
# Kernel 2: curvature loss, row-tiled two-phase grid.
#
# With w = adj * sigmoid(edge_weights) (formed per-tile in VMEM, never in HBM),
# F the (N, fn) matrix of fn_mlp outputs and rs[i] = sum_j w[i,j]:
#   delta  = wF  - F*rs
#   gamma  = .5*(wF2 - 2F*wF + F^2*rs)
#   dgamma = wG  - gamma*rs
#   gfd    = .5*(wFD - delta*wF - F*wD + F*delta*rs)
#   gamma2 = .5*dgamma - gfd
# Loss = sum_{i,j,c} relu(kappa[i]*gamma[j,c] - gamma2[j,c]), accumulated per
# row tile as sum_{row,lane} relu(gamma[row,c]*kappa[lane] - gamma2[row,c]).
#
# Phase 0 (needs only rhs1 = [1 | F | F^2]) fills the scratch slab
# [gamma | delta | F*delta | rs | wF] for all rows; phase 1 uses the full slab
# as the dot RHS (gamma[j] of every node is needed) plus its own tile's rows.
# ---------------------------------------------------------------------------
def _curv_loss_kernel(adj_ref, ew_ref, f_ref, rhs1_ref, kappa_ref, loss_ref, gdf_ref):
    ph = pl.program_id(0)          # 0: gamma/delta pass, 1: loss pass
    i = pl.program_id(1)           # row-tile index
    tile = adj_ref.shape[0]
    fn = f_ref.shape[1]
    row0 = pl.multiple_of(i * tile, tile)

    # adj ({0,1} bf16) * sigmoid(edge_weights); single-transcendental sigmoid.
    w = adj_ref[...] * (0.5 * (jnp.tanh(0.5 * ew_ref[...]) + 1.0))     # (tile, N) f32
    f_t = f_ref[...]                                                   # (tile, fn)

    @pl.when(ph == 0)
    def _phase0():
        # One wide dot: w @ [1 | f | f^2] -> [rs | wf | wf2] (row-sum on the MXU).
        out1 = jnp.dot(w, rhs1_ref[...], preferred_element_type=jnp.float32)
        rs = out1[:, 0:1]
        wf = out1[:, 1:1 + fn]
        wf2 = out1[:, 1 + fn:1 + 2 * fn]
        delta = wf - f_t * rs
        gamma = 0.5 * (wf2 - 2.0 * f_t * wf + f_t * f_t * rs)
        gdf_ref[pl.ds(row0, tile), :] = jnp.concatenate(
            [gamma, delta, f_t * delta, rs, wf], axis=1)               # (tile, 4*fn+1)

    @pl.when(ph == 1)
    def _phase1():
        @pl.when(i == 0)
        def _init():
            loss_ref[...] = jnp.zeros_like(loss_ref)

        # Second wide dot against the full-N scratch slab (first 3*fn columns are
        # the real RHS; the trailing rs/wf columns ride along for free on a
        # 128/256-lane MXU).
        out2 = jnp.dot(w, gdf_ref[...], preferred_element_type=jnp.float32)
        wg = out2[:, 0:fn]
        wd = out2[:, fn:2 * fn]
        wfd = out2[:, 2 * fn:3 * fn]

        row = gdf_ref[pl.ds(row0, tile), :]                            # this tile's rows
        gamma = row[:, 0:fn]
        delta = row[:, fn:2 * fn]
        rs = row[:, 3 * fn:3 * fn + 1]
        wf = row[:, 3 * fn + 1:4 * fn + 1]

        delta_gamma = wg - gamma * rs
        gamma_f_delta = 0.5 * (wfd - delta * wf - f_t * wd + f_t * delta * rs)
        gamma2 = 0.5 * delta_gamma - gamma_f_delta                     # (tile, fn)

        kappa = kappa_ref[...]                                         # (1, N)
        acc = jnp.zeros((tile, 1), jnp.float32)
        for c in range(fn):                                            # fn is static & tiny
            diff = gamma[:, c:c + 1] * kappa - gamma2[:, c:c + 1]      # (tile, N)
            acc = acc + jnp.sum(jnp.maximum(diff, 0.0), axis=1, keepdims=True)
        loss_ref[...] += jnp.sum(acc, axis=0, keepdims=True)


def curvature_loss(adj_bin, edge_weights, fmat, kappa_row, *, tile_n=None):
    n = adj_bin.shape[0]
    fn = fmat.shape[1]
    if tile_n is None:
        tile_n = n if n <= 512 else 512
    assert n % tile_n == 0 and tile_n % 8 == 0
    nt = n // tile_n

    rhs1 = jnp.concatenate(
        [jnp.ones((n, 1), jnp.float32), fmat, fmat * fmat], axis=1)    # (N, 1+2*fn)

    vmem_bytes = int(2 * tile_n * n * (2 + 4)     # double-buffered adj(bf16)+ew(f32) tiles
                     + 3 * tile_n * n * 4         # w + relu-diff temporaries
                     + 4 * n * 128 * 4            # scratch slab + small lane-padded blocks
                     + (2 << 20))
    cost = pl.CostEstimate(
        flops=int(2 * n * n * (2 + 6 * fn) + 12 * n * n * fn),
        transcendentals=int(2 * n * n),
        bytes_accessed=int(2 * (n * n * 2 + n * n * 4) + 16 * n * 128 * 4))

    return pl.pallas_call(
        _curv_loss_kernel,
        out_shape=jax.ShapeDtypeStruct((1, 1), jnp.float32),
        grid=(2, nt),
        in_specs=[
            pl.BlockSpec((tile_n, n), lambda ph, i: (i, 0)),       # adj rows ({0,1} bf16)
            pl.BlockSpec((tile_n, n), lambda ph, i: (i, 0)),       # edge_weights rows (f32)
            pl.BlockSpec((tile_n, fn), lambda ph, i: (i, 0)),      # fn-MLP outputs, rows
            pl.BlockSpec((n, 1 + 2 * fn), lambda ph, i: (0, 0)),   # [1 | f | f^2] full
            pl.BlockSpec((1, n), lambda ph, i: (0, 0)),            # kappa as a lane row
        ],
        out_specs=pl.BlockSpec((1, 1), lambda ph, i: (0, 0)),      # resident accumulator
        scratch_shapes=[pltpu.VMEM((n, 4 * fn + 1), jnp.float32)],
        compiler_params=pltpu.CompilerParams(
            # Both axes "arbitrary": phase 1 depends on phase 0 through the
            # scratch slab and on sequential loss accumulation.
            dimension_semantics=("arbitrary", "arbitrary"),
            vmem_limit_bytes=min(vmem_bytes, 64 << 20)),
        cost_estimate=cost,
    )(adj_bin, edge_weights, fmat, rhs1, kappa_row)


# ---------------------------------------------------------------------------
# Kernel 3: ALL MixHop iterations + node masking + outer ReLU + log_softmax.
# TODO(synk): MixHopConv is not defined in the provided source; implemented as
#             sum_{p in {0,1,2}} A^p X W_p with unweighted 0/1 edges (per the
#             nonzero() edge_index semantics), no degree normalization.
# Masking: the sampled adjacency is D_m B D_m (m in {0,1}); it is never built,
# using (D_m B D_m) x = m * (B @ (m * x)) with the single binarized B reused
# for every iteration.
# ---------------------------------------------------------------------------
def _make_mixhop_stack_kernel(iterations):
    def kernel(*refs):
        a_ref, x_ref, m_ref = refs[0], refs[1], refs[2]
        w_refs = refs[3:3 + 3 * iterations]
        o_ref = refs[3 + 3 * iterations]

        a_bin = a_ref[...]                        # {0,1} bf16, binarized on the host
        h = x_ref[...]                            # (N, F) f32
        for t in range(iterations):
            m = m_ref[:, t:t + 1]                 # (N, 1) node mask in {0, 1}
            w0 = w_refs[3 * t + 0][...]
            w1 = w_refs[3 * t + 1][...]
            w2 = w_refs[3 * t + 2][...]
            x0 = h
            # Activations are rounded to bf16 at the A@x sites (f32 accumulation);
            # the {0,1} adjacency itself is exact in bf16.
            x1 = m * jnp.dot(a_bin, (m * x0).astype(jnp.bfloat16),
                             preferred_element_type=jnp.float32)
            x2 = m * jnp.dot(a_bin, (m * x1).astype(jnp.bfloat16),
                             preferred_element_type=jnp.float32)
            # Three accumulated K-small dots instead of a lane-axis concat + wide dot.
            h = jnp.maximum(
                jnp.dot(x0, w0, preferred_element_type=jnp.float32)
                + jnp.dot(x1, w1, preferred_element_type=jnp.float32)
                + jnp.dot(x2, w2, preferred_element_type=jnp.float32),
                0.0)
            # F.dropout between layers: inference-mode identity (skipped).

        # log_softmax fused into the epilogue (saves one HBM round trip).
        mx = jnp.max(h, axis=-1, keepdims=True)
        s = h - mx
        o_ref[...] = s - jnp.log(jnp.sum(jnp.exp(s), axis=-1, keepdims=True))

    return kernel


def mixhop_stack(adj_bin, x, masks, mixhop_weights):
    n = adj_bin.shape[0]
    iterations = len(mixhop_weights)
    nclass = mixhop_weights[-1][0].shape[1]
    w_flat = [w for ws in mixhop_weights for w in ws]
    args = [adj_bin, x, masks] + w_flat
    # TODO(synk): for large N, split this into a (layer*hop, N/tile) grid with the
    #             activations held in persistent VMEM scratch so adj streams as
    #             row tiles instead of residing fully in VMEM (v7x: 64 MiB).
    vmem_bytes = int(2 * n * n * 2 + (8 << 20))
    return pl.pallas_call(
        _make_mixhop_stack_kernel(iterations),
        out_shape=jax.ShapeDtypeStruct((n, nclass), jnp.float32),
        in_specs=[_VMEM] * len(args),
        out_specs=_VMEM,
        compiler_params=pltpu.CompilerParams(
            vmem_limit_bytes=min(vmem_bytes, 64 << 20)),
    )(*args)


# ---------------------------------------------------------------------------
# Full forward (host glue: weight packing, top-k masking, tiny slices).
# ---------------------------------------------------------------------------
def dc_mixhop_forward(params, x, adj, *, p=30, iterations=2):
    n = adj.shape[0]

    # Binarized bf16 adjacency, built once and shared by BOTH N^2 kernels
    # (halves their adj DMA/VMEM bytes).  Exact for the 0/1 graph adjacency
    # this model assumes (MixHop consumes adj via nonzero(); the demo adj is 0/1).
    # TODO(synk): feed f32 adj to the curvature-loss kernel if weighted
    #             adjacencies must be supported bit-exactly.
    adj_bin = (adj != 0.0).astype(jnp.bfloat16)

    # Pack the 4 two-layer MLPs into one wide MLP (block-diagonal 2nd layer).
    mlps = [params["curv_mlp"]] + list(params["fn_mlp"])
    num_mlps = len(mlps)
    nhid = mlps[0][0].shape[1]
    w1_all = jnp.concatenate([m[0] for m in mlps], axis=1)            # (nfeat, 4*nhid)
    b1_all = jnp.concatenate([m[1] for m in mlps], axis=1)            # (1, 4*nhid)
    w2_bd = jnp.zeros((num_mlps * nhid, num_mlps), jnp.float32)
    for i, m in enumerate(mlps):
        w2_bd = w2_bd.at[i * nhid:(i + 1) * nhid, i:i + 1].set(m[2])
    b2_all = jnp.concatenate([m[3] for m in mlps], axis=1)            # (1, 4)

    kf = fused_curvature_mlps(x, w1_all, b1_all, w2_bd, b2_all)       # (N, 4)
    kappa_row = kf[:, 0].reshape(1, n)                                # (1, N)
    fmat = kf[:, 1:]                                                  # (N, fn_count)

    # Curvature loss: row-tiled two-phase pass over adj / edge_weights.
    loss = curvature_loss(adj_bin, params["edge_weights"], fmat, kappa_row)
    curv_loss = loss[0, 0]

    # Per-iteration node masks (torch.topk removes the LARGEST curvatures;
    # removal count int(n*p*t/100) is per-iteration, matching the reference).
    curvs = kf[:, 0]
    mask_cols = []
    for t in range(iterations):
        num_remove = int(n * p * t / 100)
        if num_remove > 0:
            _, top_idx = jax.lax.top_k(curvs, num_remove)
            m = jnp.ones((n,), jnp.float32).at[top_idx].set(0.0)
        else:
            m = jnp.ones((n,), jnp.float32)
        mask_cols.append(m)
    masks = jnp.stack(mask_cols, axis=1)                              # (N, iterations)

    logp = mixhop_stack(adj_bin, x, masks, params["mixhop"])
    return logp, 1.0 * curv_loss


# ---------------------------------------------------------------------------
# Deterministic parameter construction (synthetic init, no checkpoint load).
# ---------------------------------------------------------------------------
def _mlp_init(key, in_dim, hid, out):
    k1, k2, k3, k4 = jax.random.split(key, 4)
    w1 = jax.random.normal(k1, (in_dim, hid), jnp.float32) * 0.1
    b1 = jax.random.normal(k2, (1, hid), jnp.float32) * 0.1
    w2 = jax.random.normal(k3, (hid, out), jnp.float32) * 0.1
    b2 = jax.random.normal(k4, (1, out), jnp.float32) * 0.1
    return (w1, b1, w2, b2)


if __name__ == "__main__":
    N, nfeat, nhid, nclass = 128, 32, 32, 8
    iterations, fn_count, p = 2, 3, 30

    key = jax.random.PRNGKey(0)
    kx, kadj, kw, kcurv, kfn, kmix = jax.random.split(key, 6)

    x = jax.random.normal(kx, (N, nfeat), jnp.float32)
    a = (jax.random.uniform(kadj, (N, N)) < 0.1).astype(jnp.float32)
    adj = jnp.clip(a + a.T, 0.0, 1.0) * (1.0 - jnp.eye(N, dtype=jnp.float32))

    params = {
        "edge_weights": jax.random.normal(kw, (N, N), jnp.float32),   # Parameter(randn_like(adj))
        "curv_mlp": _mlp_init(kcurv, nfeat, nhid, 1),
        "fn_mlp": [_mlp_init(k, nfeat, nhid, 1) for k in jax.random.split(kfn, fn_count)],
        "mixhop": [],
    }
    for t, mk in enumerate(jax.random.split(kmix, iterations)):
        in_dim = nfeat if t == 0 else nhid
        out_dim = nclass if t == iterations - 1 else nhid
        wks = jax.random.split(mk, 3)
        params["mixhop"].append(tuple(
            jax.random.normal(wk, (in_dim, out_dim), jnp.float32) * 0.1 for wk in wks))

    fwd = jax.jit(dc_mixhop_forward, static_argnames=("p", "iterations"))
    logp, curv_loss = fwd(params, x, adj, p=p, iterations=iterations)
    jax.block_until_ready((logp, curv_loss))
    print("KERNEL_OK")
</pallas_src>

<mosaic_0001>
module attributes {stable_mosaic.version = 11 : i64} {
  func.func @_fused_mlp_kernel(%arg0: i32, %arg1: memref<128x32xf32, #tpu.memory_space<vmem>>, %arg2: memref<32x128xf32, #tpu.memory_space<vmem>>, %arg3: memref<1x128xf32, #tpu.memory_space<vmem>>, %arg4: memref<128x4xf32, #tpu.memory_space<vmem>>, %arg5: memref<1x4xf32, #tpu.memory_space<vmem>>, %arg6: memref<128x4xf32, #tpu.memory_space<vmem>>) attributes {dimension_semantics = [#tpu.dimension_semantics<parallel>], iteration_bounds = array<i64: 1>, scalar_prefetch = 0 : i64, scratch_operands = 0 : i64, tpu.core_type = #tpu.core_type<tc>, window_params = [{transform_indices = @transform_0, window_bounds = array<i64: 128, 32>}, {pipeline_mode = #tpu.pipeline_mode<synchronous>, transform_indices = @transform_1, window_bounds = array<i64: 32, 128>}, {pipeline_mode = #tpu.pipeline_mode<synchronous>, transform_indices = @transform_2, window_bounds = array<i64: 1, 128>}, {pipeline_mode = #tpu.pipeline_mode<synchronous>, transform_indices = @transform_3, window_bounds = array<i64: 128, 4>}, {pipeline_mode = #tpu.pipeline_mode<synchronous>, transform_indices = @transform_4, window_bounds = array<i64: 1, 4>}, {transform_indices = @transform_5, window_bounds = array<i64: 128, 4>}]} {
    %c0 = arith.constant 0 : index
    %c0_0 = arith.constant 0 : index
    %0 = vector.load %arg1[%c0, %c0_0] : memref<128x32xf32, #tpu.memory_space<vmem>>, vector<128x32xf32>
    %c0_1 = arith.constant 0 : index
    %c0_2 = arith.constant 0 : index
    %1 = vector.load %arg2[%c0_1, %c0_2] : memref<32x128xf32, #tpu.memory_space<vmem>>, vector<32x128xf32>
    %cst = arith.constant dense<0.000000e+00> : vector<128x128xf32>
    %2 = tpu.matmul %0, %1, %cst {dimension_numbers = #tpu.dot_dimension_numbers<[1], [0], [0], [1], [0, 0, 1, 1], [], []>} : vector<128x32xf32>, vector<32x128xf32>, vector<128x128xf32> -> vector<128x128xf32>
    %c0_3 = arith.constant 0 : index
    %c0_4 = arith.constant 0 : index
    %3 = vector.load %arg3[%c0_3, %c0_4] : memref<1x128xf32, #tpu.memory_space<vmem>>, vector<1x128xf32>
    %4 = vector.broadcast %3 : vector<1x128xf32> to vector<128x128xf32>
    %5 = arith.addf %2, %4 : vector<128x128xf32>
    %cst_5 = arith.constant 0.000000e+00 : f32
    %6 = vector.broadcast %cst_5 : f32 to vector<128x128xf32>
    %7 = arith.maximumf %5, %6 : vector<128x128xf32>
    %c0_6 = arith.constant 0 : index
    %c0_7 = arith.constant 0 : index
    %8 = vector.load %arg4[%c0_6, %c0_7] : memref<128x4xf32, #tpu.memory_space<vmem>>, vector<128x4xf32>
    %cst_8 = arith.constant dense<0.000000e+00> : vector<128x4xf32>
    %9 = tpu.matmul %7, %8, %cst_8 {dimension_numbers = #tpu.dot_dimension_numbers<[1], [0], [0], [1], [0, 0, 1, 1], [], []>} : vector<128x128xf32>, vector<128x4xf32>, vector<128x4xf32> -> vector<128x4xf32>
    %c0_9 = arith.constant 0 : index
    %c0_10 = arith.constant 0 : index
    %10 = vector.load %arg5[%c0_9, %c0_10] : memref<1x4xf32, #tpu.memory_space<vmem>>, vector<1x4xf32>
    %11 = vector.broadcast %10 : vector<1x4xf32> to vector<128x4xf32>
    %12 = arith.addf %9, %11 : vector<128x4xf32>
    %13 = arith.negf %12 : vector<128x4xf32>
    %14 = math.exp %13 : vector<128x4xf32>
    %cst_11 = arith.constant 1.000000e+00 : f32
    %15 = vector.broadcast %cst_11 : f32 to vector<128x4xf32>
    %16 = arith.addf %15, %14 : vector<128x4xf32>
    %17 = arith.divf %15, %16 : vector<128x4xf32>
    %c0_12 = arith.constant 0 : index
    %c0_13 = arith.constant 0 : index
    %18 = vector.load %arg6[%c0_12, %c0_13] : memref<128x4xf32, #tpu.memory_space<vmem>>, vector<128x4xf32>
    tpu.vector_store %arg6[%c0_12, %c0_13], %17 {strides = array<i32>} : memref<128x4xf32, #tpu.memory_space<vmem>>, vector<128x4xf32>,
    return
  }
  func.func @transform_0(%arg0: i32) -> (i32, i32) {
    %c0_i32 = arith.constant 0 : i32
    %c0_i32_0 = arith.constant 0 : i32
    return %arg0, %c0_i32 : i32, i32
  }
  func.func @transform_1(%arg0: i32) -> (i32, i32) {
    %c0_i32 = arith.constant 0 : i32
    %c0_i32_0 = arith.constant 0 : i32
    %c0_i32_1 = arith.constant 0 : i32
    return %c0_i32, %c0_i32_0 : i32, i32
  }
  func.func @transform_2(%arg0: i32) -> (i32, i32) {
    %c0_i32 = arith.constant 0 : i32
    %c0_i32_0 = arith.constant 0 : i32
    %c0_i32_1 = arith.constant 0 : i32
    return %c0_i32, %c0_i32_0 : i32, i32
  }
  func.func @transform_3(%arg0: i32) -> (i32, i32) {
    %c0_i32 = arith.constant 0 : i32
    %c0_i32_0 = arith.constant 0 : i32
    %c0_i32_1 = arith.constant 0 : i32
    return %c0_i32, %c0_i32_0 : i32, i32
  }
  func.func @transform_4(%arg0: i32) -> (i32, i32) {
    %c0_i32 = arith.constant 0 : i32
    %c0_i32_0 = arith.constant 0 : i32
    %c0_i32_1 = arith.constant 0 : i32
    return %c0_i32, %c0_i32_0 : i32, i32
  }
  func.func @transform_5(%arg0: i32) -> (i32, i32) {
    %c0_i32 = arith.constant 0 : i32
    %c0_i32_0 = arith.constant 0 : i32
    return %arg0, %c0_i32 : i32, i32
  }
}

module attributes {stable_mosaic.version = 11 : i64} {
  func.func @_curv_loss_kernel(%arg0: i32, %arg1: i32, %arg2: memref<128x128xbf16, #tpu.memory_space<vmem>>, %arg3: memref<128x128xf32, #tpu.memory_space<vmem>>, %arg4: memref<128x3xf32, #tpu.memory_space<vmem>>, %arg5: memref<128x7xf32, #tpu.memory_space<vmem>>, %arg6: memref<1x128xf32, #tpu.memory_space<vmem>>, %arg7: memref<1x1xf32, #tpu.memory_space<vmem>>, %arg8: memref<128x13xf32, #tpu.memory_space<vmem>>) attributes {dimension_semantics = [#tpu.dimension_semantics<arbitrary>, #tpu.dimension_semantics<arbitrary>], iteration_bounds = array<i64: 2, 1>, scalar_prefetch = 0 : i64, scratch_operands = 1 : i64, tpu.core_type = #tpu.core_type<tc>, window_params = [{transform_indices = @transform_0, window_bounds = array<i64: 128, 128>}, {transform_indices = @transform_1, window_bounds = array<i64: 128, 128>}, {transform_indices = @transform_2, window_bounds = array<i64: 128, 3>}, {pipeline_mode = #tpu.pipeline_mode<synchronous>, transform_indices = @transform_3, window_bounds = array<i64: 128, 7>}, {pipeline_mode = #tpu.pipeline_mode<synchronous>, transform_indices = @transform_4, window_bounds = array<i64: 1, 128>}, {pipeline_mode = #tpu.pipeline_mode<synchronous>, transform_indices = @transform_5, window_bounds = array<i64: 1, 1>}]} {
    %c128_i32 = arith.constant 128 : i32
    %0 = arith.muli %arg1, %c128_i32 : i32
    %1 = tpu.assume_multiple %0, 128 : i32
    %c0 = arith.constant 0 : index
    %c0_0 = arith.constant 0 : index
    %2 = vector.load %arg2[%c0, %c0_0] : memref<128x128xbf16, #tpu.memory_space<vmem>>, vector<128x128xbf16>
    %c0_1 = arith.constant 0 : index
    %c0_2 = arith.constant 0 : index
    %3 = vector.load %arg3[%c0_1, %c0_2] : memref<128x128xf32, #tpu.memory_space<vmem>>, vector<128x128xf32>
    %cst = arith.constant 5.000000e-01 : f32
    %4 = vector.broadcast %cst : f32 to vector<128x128xf32>
    %5 = arith.mulf %4, %3 : vector<128x128xf32>
    %6 = math.tanh %5 : vector<128x128xf32>
    %cst_3 = arith.constant 1.000000e+00 : f32
    %7 = vector.broadcast %cst_3 : f32 to vector<128x128xf32>
    %8 = arith.addf %6, %7 : vector<128x128xf32>
    %cst_4 = arith.constant 5.000000e-01 : f32
    %9 = vector.broadcast %cst_4 : f32 to vector<128x128xf32>
    %10 = arith.mulf %9, %8 : vector<128x128xf32>
    %11 = arith.extf %2 : vector<128x128xbf16> to vector<128x128xf32>
    %12 = arith.mulf %11, %10 : vector<128x128xf32>
    %c0_5 = arith.constant 0 : index
    %c0_6 = arith.constant 0 : index
    %13 = vector.load %arg4[%c0_5, %c0_6] : memref<128x3xf32, #tpu.memory_space<vmem>>, vector<128x3xf32>
    %c0_i32 = arith.constant 0 : i32
    %14 = arith.cmpi eq, %arg0, %c0_i32 : i32
    %15 = arith.extui %14 : i1 to i32
    %c0_i32_7 = arith.constant 0 : i32
    %16 = arith.cmpi ne, %15, %c0_i32_7 : i32
    scf.if %16 {
      %c0_9 = arith.constant 0 : index
      %c0_10 = arith.constant 0 : index
      %20 = vector.load %arg5[%c0_9, %c0_10] : memref<128x7xf32, #tpu.memory_space<vmem>>, vector<128x7xf32>
      %cst_11 = arith.constant dense<0.000000e+00> : vector<128x7xf32>
      %21 = tpu.matmul %12, %20, %cst_11 {dimension_numbers = #tpu.dot_dimension_numbers<[1], [0], [0], [1], [0, 0, 1, 1], [], []>} : vector<128x128xf32>, vector<128x7xf32>, vector<128x7xf32> -> vector<128x7xf32>
      %22 = vector.extract_strided_slice %21 {offsets = [0, 0], sizes = [128, 1], strides = [1, 1]} : vector<128x7xf32> to vector<128x1xf32>
      %23 = vector.extract_strided_slice %21 {offsets = [0, 1], sizes = [128, 3], strides = [1, 1]} : vector<128x7xf32> to vector<128x3xf32>
      %24 = vector.extract_strided_slice %21 {offsets = [0, 4], sizes = [128, 3], strides = [1, 1]} : vector<128x7xf32> to vector<128x3xf32>
      %25 = vector.broadcast %22 : vector<128x1xf32> to vector<128x3xf32>
      %26 = arith.mulf %13, %25 : vector<128x3xf32>
      %27 = arith.subf %23, %26 : vector<128x3xf32>
      %cst_12 = arith.constant 2.000000e+00 : f32
      %28 = vector.broadcast %cst_12 : f32 to vector<128x3xf32>
      %29 = arith.mulf %28, %13 : vector<128x3xf32>
      %30 = arith.mulf %29, %23 : vector<128x3xf32>
      %31 = arith.subf %24, %30 : vector<128x3xf32>
      %32 = arith.mulf %13, %13 : vector<128x3xf32>
      %33 = vector.broadcast %22 : vector<128x1xf32> to vector<128x3xf32>
      %34 = arith.mulf %32, %33 : vector<128x3xf32>
      %35 = arith.addf %31, %34 : vector<128x3xf32>
      %cst_13 = arith.constant 5.000000e-01 : f32
      %36 = vector.broadcast %cst_13 : f32 to vector<128x3xf32>
      %37 = arith.mulf %36, %35 : vector<128x3xf32>
      %38 = arith.mulf %13, %27 : vector<128x3xf32>
      %39 = tpu.concatenate %37, %27, %38, %22, %23 in 1 : vector<128x3xf32>, vector<128x3xf32>, vector<128x3xf32>, vector<128x1xf32>, vector<128x3xf32> -> vector<128x13xf32>
      %40 = arith.index_cast %1 : i32 to index
      %c0_14 = arith.constant 0 : index
      %41 = vector.load %arg8[%40, %c0_14] : memref<128x13xf32, #tpu.memory_space<vmem>>, vector<128x13xf32>
      tpu.vector_store %arg8[%40, %c0_14], %39 {strides = array<i32>} : memref<128x13xf32, #tpu.memory_space<vmem>>, vector<128x13xf32>,
    } else {
    }
    %c1_i32 = arith.constant 1 : i32
    %17 = arith.cmpi eq, %arg0, %c1_i32 : i32
    %18 = arith.extui %17 : i1 to i32
    %c0_i32_8 = arith.constant 0 : i32
    %19 = arith.cmpi ne, %18, %c0_i32_8 : i32
    scf.if %19 {
      %c0_i32_9 = arith.constant 0 : i32
      %20 = arith.cmpi eq, %arg1, %c0_i32_9 : i32
      %21 = arith.extui %20 : i1 to i32
      %c0_i32_10 = arith.constant 0 : i32
      %22 = arith.cmpi ne, %21, %c0_i32_10 : i32
      scf.if %22 {
        %cst_31 = arith.constant 0.000000e+00 : f32
        %93 = vector.broadcast %cst_31 : f32 to vector<1x1xf32>
        %c0_32 = arith.constant 0 : index
        %c0_33 = arith.constant 0 : index
        %94 = vector.load %arg7[%c0_32, %c0_33] : memref<1x1xf32, #tpu.memory_space<vmem>>, vector<1x1xf32>
        tpu.vector_store %arg7[%c0_32, %c0_33], %93 {strides = array<i32>} : memref<1x1xf32, #tpu.memory_space<vmem>>, vector<1x1xf32>,
      } else {
      }
      %c0_11 = arith.constant 0 : index
      %c0_12 = arith.constant 0 : index
      %23 = vector.load %arg8[%c0_11, %c0_12] : memref<128x13xf32, #tpu.memory_space<vmem>>, vector<128x13xf32>
      %cst_13 = arith.constant dense<0.000000e+00> : vector<128x13xf32>
      %24 = tpu.matmul %12, %23, %cst_13 {dimension_numbers = #tpu.dot_dimension_numbers<[1], [0], [0], [1], [0, 0, 1, 1], [], []>} : vector<128x128xf32>, vector<128x13xf32>, vector<128x13xf32> -> vector<128x13xf32>
      %25 = vector.extract_strided_slice %24 {offsets = [0, 0], sizes = [128, 3], strides = [1, 1]} : vector<128x13xf32> to vector<128x3xf32>
      %26 = vector.extract_strided_slice %24 {offsets = [0, 3], sizes = [128, 3], strides = [1, 1]} : vector<128x13xf32> to vector<128x3xf32>
      %27 = vector.extract_strided_slice %24 {offsets = [0, 6], sizes = [128, 3], strides = [1, 1]} : vector<128x13xf32> to vector<128x3xf32>
      %28 = arith.index_cast %1 : i32 to index
      %c0_14 = arith.constant 0 : index
      %29 = vector.load %arg8[%28, %c0_14] : memref<128x13xf32, #tpu.memory_space<vmem>>, vector<128x13xf32>
      %30 = vector.extract_strided_slice %29 {offsets = [0, 0], sizes = [128, 3], strides = [1, 1]} : vector<128x13xf32> to vector<128x3xf32>
      %31 = vector.extract_strided_slice %29 {offsets = [0, 3], sizes = [128, 3], strides = [1, 1]} : vector<128x13xf32> to vector<128x3xf32>
      %32 = vector.extract_strided_slice %29 {offsets = [0, 9], sizes = [128, 1], strides = [1, 1]} : vector<128x13xf32> to vector<128x1xf32>
      %33 = vector.extract_strided_slice %29 {offsets = [0, 10], sizes = [128, 3], strides = [1, 1]} : vector<128x13xf32> to vector<128x3xf32>
      %34 = vector.broadcast %32 : vector<128x1xf32> to vector<128x3xf32>
      %35 = arith.mulf %30, %34 : vector<128x3xf32>
      %36 = arith.subf %25, %35 : vector<128x3xf32>
      %37 = arith.mulf %31, %33 : vector<128x3xf32>
      %38 = arith.subf %27, %37 : vector<128x3xf32>
      %39 = arith.mulf %13, %26 : vector<128x3xf32>
      %40 = arith.subf %38, %39 : vector<128x3xf32>
      %41 = arith.mulf %13, %31 : vector<128x3xf32>
      %42 = vector.broadcast %32 : vector<128x1xf32> to vector<128x3xf32>
      %43 = arith.mulf %41, %42 : vector<128x3xf32>
      %44 = arith.addf %40, %43 : vector<128x3xf32>
      %cst_15 = arith.constant 5.000000e-01 : f32
      %45 = vector.broadcast %cst_15 : f32 to vector<128x3xf32>
      %46 = arith.mulf %45, %44 : vector<128x3xf32>
      %cst_16 = arith.constant 5.000000e-01 : f32
      %47 = vector.broadcast %cst_16 : f32 to vector<128x3xf32>
      %48 = arith.mulf %47, %36 : vector<128x3xf32>
      %49 = arith.subf %48, %46 : vector<128x3xf32>
      %c0_17 = arith.constant 0 : index
      %c0_18 = arith.constant 0 : index
      %50 = vector.load %arg6[%c0_17, %c0_18] : memref<1x128xf32, #tpu.memory_space<vmem>>, vector<1x128xf32>
      %cst_19 = arith.constant 0.000000e+00 : f32
      %51 = vector.broadcast %cst_19 : f32 to vector<128x1xf32>
      %52 = vector.extract_strided_slice %30 {offsets = [0, 0], sizes = [128, 1], strides = [1, 1]} : vector<128x3xf32> to vector<128x1xf32>
      %53 = vector.broadcast %52 : vector<128x1xf32> to vector<128x128xf32>
      %54 = vector.broadcast %50 : vector<1x128xf32> to vector<128x128xf32>
      %55 = arith.mulf %53, %54 : vector<128x128xf32>
      %56 = vector.extract_strided_slice %49 {offsets = [0, 0], sizes = [128, 1], strides = [1, 1]} : vector<128x3xf32> to vector<128x1xf32>
      %57 = vector.broadcast %56 : vector<128x1xf32> to vector<128x128xf32>
      %58 = arith.subf %55, %57 : vector<128x128xf32>
      %cst_20 = arith.constant 0.000000e+00 : f32
      %59 = vector.broadcast %cst_20 : f32 to vector<128x128xf32>
      %60 = arith.maximumf %58, %59 : vector<128x128xf32>
      %cst_21 = arith.constant dense<0.000000e+00> : vector<128xf32>
      %61 = vector.multi_reduction <add>, %60, %cst_21 [1] : vector<128x128xf32> to vector<128xf32>
      %62 = vector.shape_cast %61 : vector<128xf32> to vector<128x1xf32>
      %63 = arith.addf %51, %62 : vector<128x1xf32>
      %64 = vector.extract_strided_slice %30 {offsets = [0, 1], sizes = [128, 1], strides = [1, 1]} : vector<128x3xf32> to vector<128x1xf32>
      %65 = vector.broadcast %64 : vector<128x1xf32> to vector<128x128xf32>
      %66 = vector.broadcast %50 : vector<1x128xf32> to vector<128x128xf32>
      %67 = arith.mulf %65, %66 : vector<128x128xf32>
      %68 = vector.extract_strided_slice %49 {offsets = [0, 1], sizes = [128, 1], strides = [1, 1]} : vector<128x3xf32> to vector<128x1xf32>
      %69 = vector.broadcast %68 : vector<128x1xf32> to vector<128x128xf32>
      %70 = arith.subf %67, %69 : vector<128x128xf32>
      %cst_22 = arith.constant 0.000000e+00 : f32
      %71 = vector.broadcast %cst_22 : f32 to vector<128x128xf32>
      %72 = arith.maximumf %70, %71 : vector<128x128xf32>
      %cst_23 = arith.constant dense<0.000000e+00> : vector<128xf32>
      %73 = vector.multi_reduction <add>, %72, %cst_23 [1] : vector<128x128xf32> to vector<128xf32>
      %74 = vector.shape_cast %73 : vector<128xf32> to vector<128x1xf32>
      %75 = arith.addf %63, %74 : vector<128x1xf32>
      %76 = vector.extract_strided_slice %30 {offsets = [0, 2], sizes = [128, 1], strides = [1, 1]} : vector<128x3xf32> to vector<128x1xf32>
      %77 = vector.broadcast %76 : vector<128x1xf32> to vector<128x128xf32>
      %78 = vector.broadcast %50 : vector<1x128xf32> to vector<128x128xf32>
      %79 = arith.mulf %77, %78 : vector<128x128xf32>
      %80 = vector.extract_strided_slice %49 {offsets = [0, 2], sizes = [128, 1], strides = [1, 1]} : vector<128x3xf32> to vector<128x1xf32>
      %81 = vector.broadcast %80 : vector<128x1xf32> to vector<128x128xf32>
      %82 = arith.subf %79, %81 : vector<128x128xf32>
      %cst_24 = arith.constant 0.000000e+00 : f32
      %83 = vector.broadcast %cst_24 : f32 to vector<128x128xf32>
      %84 = arith.maximumf %82, %83 : vector<128x128xf32>
      %cst_25 = arith.constant dense<0.000000e+00> : vector<128xf32>
      %85 = vector.multi_reduction <add>, %84, %cst_25 [1] : vector<128x128xf32> to vector<128xf32>
      %86 = vector.shape_cast %85 : vector<128xf32> to vector<128x1xf32>
      %87 = arith.addf %75, %86 : vector<128x1xf32>
      %c0_26 = arith.constant 0 : index
      %c0_27 = arith.constant 0 : index
      %88 = vector.load %arg7[%c0_26, %c0_27] : memref<1x1xf32, #tpu.memory_space<vmem>>, vector<1x1xf32>
      %cst_28 = arith.constant dense<0.000000e+00> : vector<1xf32>
      %89 = vector.multi_reduction <add>, %87, %cst_28 [0] : vector<128x1xf32> to vector<1xf32>
      %90 = vector.shape_cast %89 : vector<1xf32> to vector<1x1xf32>
      %91 = arith.addf %88, %90 : vector<1x1xf32>
      %c0_29 = arith.constant 0 : index
      %c0_30 = arith.constant 0 : index
      %92 = vector.load %arg7[%c0_29, %c0_30] : memref<1x1xf32, #tpu.memory_space<vmem>>, vector<1x1xf32>
      tpu.vector_store %arg7[%c0_29, %c0_30], %91 {strides = array<i32>} : memref<1x1xf32, #tpu.memory_space<vmem>>, vector<1x1xf32>,
    } else {
    }
    return
  }
  func.func @transform_0(%arg0: i32, %arg1: i32) -> (i32, i32) {
    %c0_i32 = arith.constant 0 : i32
    %c0_i32_0 = arith.constant 0 : i32
    return %arg1, %c0_i32 : i32, i32
  }
  func.func @transform_1(%arg0: i32, %arg1: i32) -> (i32, i32) {
    %c0_i32 = arith.constant 0 : i32
    %c0_i32_0 = arith.constant 0 : i32
    return %arg1, %c0_i32 : i32, i32
  }
  func.func @transform_2(%arg0: i32, %arg1: i32) -> (i32, i32) {
    %c0_i32 = arith.constant 0 : i32
    %c0_i32_0 = arith.constant 0 : i32
    return %arg1, %c0_i32 : i32, i32
  }
  func.func @transform_3(%arg0: i32, %arg1: i32) -> (i32, i32) {
    %c0_i32 = arith.constant 0 : i32
    %c0_i32_0 = arith.constant 0 : i32
    %c0_i32_1 = arith.constant 0 : i32
    return %c0_i32, %c0_i32_0 : i32, i32
  }
  func.func @transform_4(%arg0: i32, %arg1: i32) -> (i32, i32) {
    %c0_i32 = arith.constant 0 : i32
    %c0_i32_0 = arith.constant 0 : i32
    %c0_i32_1 = arith.constant 0 : i32
    return %c0_i32, %c0_i32_0 : i32, i32
  }
  func.func @transform_5(%arg0: i32, %arg1: i32) -> (i32, i32) {
    %c0_i32 = arith.constant 0 : i32
    %c0_i32_0 = arith.constant 0 : i32
    %c0_i32_1 = arith.constant 0 : i32
    return %c0_i32, %c0_i32_0 : i32, i32
  }
}

module attributes {stable_mosaic.version = 11 : i64} {
  func.func @kernel(%arg0: memref<128x128xbf16, #tpu.memory_space<vmem>>, %arg1: memref<128x32xf32, #tpu.memory_space<vmem>>, %arg2: memref<128x2xf32, #tpu.memory_space<vmem>>, %arg3: memref<32x32xf32, #tpu.memory_space<vmem>>, %arg4: memref<32x32xf32, #tpu.memory_space<vmem>>, %arg5: memref<32x32xf32, #tpu.memory_space<vmem>>, %arg6: memref<32x8xf32, #tpu.memory_space<vmem>>, %arg7: memref<32x8xf32, #tpu.memory_space<vmem>>, %arg8: memref<32x8xf32, #tpu.memory_space<vmem>>, %arg9: memref<128x8xf32, #tpu.memory_space<vmem>>) attributes {dimension_semantics = [], scalar_prefetch = 0 : i64, scratch_operands = 0 : i64, tpu.core_type = #tpu.core_type<tc>} {
    %c0 = arith.constant 0 : index
    %c0_0 = arith.constant 0 : index
    %0 = vector.load %arg0[%c0, %c0_0] : memref<128x128xbf16, #tpu.memory_space<vmem>>, vector<128x128xbf16>
    %c0_1 = arith.constant 0 : index
    %c0_2 = arith.constant 0 : index
    %1 = vector.load %arg1[%c0_1, %c0_2] : memref<128x32xf32, #tpu.memory_space<vmem>>, vector<128x32xf32>
    %c0_3 = arith.constant 0 : index
    %c0_4 = arith.constant 0 : index
    %2 = vector.load %arg2[%c0_3, %c0_4] : memref<128x2xf32, #tpu.memory_space<vmem>>, vector<128x1xf32>
    %c0_5 = arith.constant 0 : index
    %c0_6 = arith.constant 0 : index
    %3 = vector.load %arg3[%c0_5, %c0_6] : memref<32x32xf32, #tpu.memory_space<vmem>>, vector<32x32xf32>
    %c0_7 = arith.constant 0 : index
    %c0_8 = arith.constant 0 : index
    %4 = vector.load %arg4[%c0_7, %c0_8] : memref<32x32xf32, #tpu.memory_space<vmem>>, vector<32x32xf32>
    %c0_9 = arith.constant 0 : index
    %c0_10 = arith.constant 0 : index
    %5 = vector.load %arg5[%c0_9, %c0_10] : memref<32x32xf32, #tpu.memory_space<vmem>>, vector<32x32xf32>
    %6 = vector.broadcast %2 : vector<128x1xf32> to vector<128x32xf32>
    %7 = arith.mulf %6, %1 : vector<128x32xf32>
    %8 = arith.truncf %7 : vector<128x32xf32> to vector<128x32xbf16>
    %cst = arith.constant dense<0.000000e+00> : vector<128x32xf32>
    %9 = tpu.matmul %0, %8, %cst {dimension_numbers = #tpu.dot_dimension_numbers<[1], [0], [0], [1], [0, 0, 1, 1], [], []>} : vector<128x128xbf16>, vector<128x32xbf16>, vector<128x32xf32> -> vector<128x32xf32>
    %10 = vector.broadcast %2 : vector<128x1xf32> to vector<128x32xf32>
    %11 = arith.mulf %10, %9 : vector<128x32xf32>
    %12 = vector.broadcast %2 : vector<128x1xf32> to vector<128x32xf32>
    %13 = arith.mulf %12, %11 : vector<128x32xf32>
    %14 = arith.truncf %13 : vector<128x32xf32> to vector<128x32xbf16>
    %cst_11 = arith.constant dense<0.000000e+00> : vector<128x32xf32>
    %15 = tpu.matmul %0, %14, %cst_11 {dimension_numbers = #tpu.dot_dimension_numbers<[1], [0], [0], [1], [0, 0, 1, 1], [], []>} : vector<128x128xbf16>, vector<128x32xbf16>, vector<128x32xf32> -> vector<128x32xf32>
    %16 = vector.broadcast %2 : vector<128x1xf32> to vector<128x32xf32>
    %17 = arith.mulf %16, %15 : vector<128x32xf32>
    %cst_12 = arith.constant dense<0.000000e+00> : vector<128x32xf32>
    %18 = tpu.matmul %1, %3, %cst_12 {dimension_numbers = #tpu.dot_dimension_numbers<[1], [0], [0], [1], [0, 0, 1, 1], [], []>} : vector<128x32xf32>, vector<32x32xf32>, vector<128x32xf32> -> vector<128x32xf32>
    %cst_13 = arith.constant dense<0.000000e+00> : vector<128x32xf32>
    %19 = tpu.matmul %11, %4, %cst_13 {dimension_numbers = #tpu.dot_dimension_numbers<[1], [0], [0], [1], [0, 0, 1, 1], [], []>} : vector<128x32xf32>, vector<32x32xf32>, vector<128x32xf32> -> vector<128x32xf32>
    %20 = arith.addf %18, %19 : vector<128x32xf32>
    %cst_14 = arith.constant dense<0.000000e+00> : vector<128x32xf32>
    %21 = tpu.matmul %17, %5, %cst_14 {dimension_numbers = #tpu.dot_dimension_numbers<[1], [0], [0], [1], [0, 0, 1, 1], [], []>} : vector<128x32xf32>, vector<32x32xf32>, vector<128x32xf32> -> vector<128x32xf32>
    %22 = arith.addf %20, %21 : vector<128x32xf32>
    %cst_15 = arith.constant 0.000000e+00 : f32
    %23 = vector.broadcast %cst_15 : f32 to vector<128x32xf32>
    %24 = arith.maximumf %22, %23 : vector<128x32xf32>
    %c0_16 = arith.constant 0 : index
    %c1 = arith.constant 1 : index
    %25 = vector.load %arg2[%c0_16, %c1] : memref<128x2xf32, #tpu.memory_space<vmem>>, vector<128x1xf32>
    %c0_17 = arith.constant 0 : index
    %c0_18 = arith.constant 0 : index
    %26 = vector.load %arg6[%c0_17, %c0_18] : memref<32x8xf32, #tpu.memory_space<vmem>>, vector<32x8xf32>
    %c0_19 = arith.constant 0 : index
    %c0_20 = arith.constant 0 : index
    %27 = vector.load %arg7[%c0_19, %c0_20] : memref<32x8xf32, #tpu.memory_space<vmem>>, vector<32x8xf32>
    %c0_21 = arith.constant 0 : index
    %c0_22 = arith.constant 0 : index
    %28 = vector.load %arg8[%c0_21, %c0_22] : memref<32x8xf32, #tpu.memory_space<vmem>>, vector<32x8xf32>
    %29 = vector.broadcast %25 : vector<128x1xf32> to vector<128x32xf32>
    %30 = arith.mulf %29, %24 : vector<128x32xf32>
    %31 = arith.truncf %30 : vector<128x32xf32> to vector<128x32xbf16>
    %cst_23 = arith.constant dense<0.000000e+00> : vector<128x32xf32>
    %32 = tpu.matmul %0, %31, %cst_23 {dimension_numbers = #tpu.dot_dimension_numbers<[1], [0], [0], [1], [0, 0, 1, 1], [], []>} : vector<128x128xbf16>, vector<128x32xbf16>, vector<128x32xf32> -> vector<128x32xf32>
    %33 = vector.broadcast %25 : vector<128x1xf32> to vector<128x32xf32>
    %34 = arith.mulf %33, %32 : vector<128x32xf32>
    %35 = vector.broadcast %25 : vector<128x1xf32> to vector<128x32xf32>
    %36 = arith.mulf %35, %34 : vector<128x32xf32>
    %37 = arith.truncf %36 : vector<128x32xf32> to vector<128x32xbf16>
    %cst_24 = arith.constant dense<0.000000e+00> : vector<128x32xf32>
    %38 = tpu.matmul %0, %37, %cst_24 {dimension_numbers = #tpu.dot_dimension_numbers<[1], [0], [0], [1], [0, 0, 1, 1], [], []>} : vector<128x128xbf16>, vector<128x32xbf16>, vector<128x32xf32> -> vector<128x32xf32>
    %39 = vector.broadcast %25 : vector<128x1xf32> to vector<128x32xf32>
    %40 = arith.mulf %39, %38 : vector<128x32xf32>
    %cst_25 = arith.constant dense<0.000000e+00> : vector<128x8xf32>
    %41 = tpu.matmul %24, %26, %cst_25 {dimension_numbers = #tpu.dot_dimension_numbers<[1], [0], [0], [1], [0, 0, 1, 1], [], []>} : vector<128x32xf32>, vector<32x8xf32>, vector<128x8xf32> -> vector<128x8xf32>
    %cst_26 = arith.constant dense<0.000000e+00> : vector<128x8xf32>
    %42 = tpu.matmul %34, %27, %cst_26 {dimension_numbers = #tpu.dot_dimension_numbers<[1], [0], [0], [1], [0, 0, 1, 1], [], []>} : vector<128x32xf32>, vector<32x8xf32>, vector<128x8xf32> -> vector<128x8xf32>
    %43 = arith.addf %41, %42 : vector<128x8xf32>
    %cst_27 = arith.constant dense<0.000000e+00> : vector<128x8xf32>
    %44 = tpu.matmul %40, %28, %cst_27 {dimension_numbers = #tpu.dot_dimension_numbers<[1], [0], [0], [1], [0, 0, 1, 1], [], []>} : vector<128x32xf32>, vector<32x8xf32>, vector<128x8xf32> -> vector<128x8xf32>
    %45 = arith.addf %43, %44 : vector<128x8xf32>
    %cst_28 = arith.constant 0.000000e+00 : f32
    %46 = vector.broadcast %cst_28 : f32 to vector<128x8xf32>
    %47 = arith.maximumf %45, %46 : vector<128x8xf32>
    %cst_29 = arith.constant dense<0xFF800000> : vector<128xf32>
    %48 = vector.multi_reduction <maximumf>, %47, %cst_29 [1] : vector<128x8xf32> to vector<128xf32>
    %49 = vector.shape_cast %48 : vector<128xf32> to vector<128x1xf32>
    %50 = vector.broadcast %49 : vector<128x1xf32> to vector<128x8xf32>
    %51 = arith.subf %47, %50 : vector<128x8xf32>
    %52 = math.exp %51 : vector<128x8xf32>
    %cst_30 = arith.constant dense<0.000000e+00> : vector<128xf32>
    %53 = vector.multi_reduction <add>, %52, %cst_30 [1] : vector<128x8xf32> to vector<128xf32>
    %54 = vector.shape_cast %53 : vector<128xf32> to vector<128x1xf32>
    %55 = math.log %54 : vector<128x1xf32>
    %56 = vector.broadcast %55 : vector<128x1xf32> to vector<128x8xf32>
    %57 = arith.subf %51, %56 : vector<128x8xf32>
    %c0_31 = arith.constant 0 : index
    %c0_32 = arith.constant 0 : index
    %58 = vector.load %arg9[%c0_31, %c0_32] : memref<128x8xf32, #tpu.memory_space<vmem>>, vector<128x8xf32>
    tpu.vector_store %arg9[%c0_31, %c0_32], %57 {strides = array<i32>} : memref<128x8xf32, #tpu.memory_space<vmem>>, vector<128x8xf32>,
    return
  }
}

</mosaic_0001>

<bundles_post_ra>
// kernel: dc_mixhop_forward.3
= control target key start
LH: loop header
LB: loop body
LE: loop exit
PB: predicated region body
PF: predicated region fallthrough
CT: control target
= control target key end

     0   :  { %vm47_vm0 = vcmask 261120   ;;  %vm521_vm1 = vcmask 31744   ;;  %s1078_s1 = inlined_call_operand.vmem [shape: f32[32,128], index: 1, kind: input, shape index: {}]   ;;  %s1079_s0 = inlined_call_operand.vmem [shape: f32[128,32], index: 0, kind: input, shape index: {}]   ;;  %s1080_s3 = inlined_call_operand.vmem [shape: f32[128,4], index: 3, kind: input, shape index: {}]   ;;  %s1081_s2 = inlined_call_operand.vmem [shape: f32[1,128], index: 2, kind: input, shape index: {}]   ;;  %s1082_s4 = inlined_call_operand.vmem [shape: f32[1,4], index: 4, kind: input, shape index: {}]   ;;  %s1083_s5 = inlined_call_operand.vmem [shape: f32[128,4], index: 5, kind: output, shape index: {}]  }
   0x1   :  { %v36_v0 = vld [vmem:[%s1078_s1] sm:$0xff]  ;;  %v37_v1 = vld [vmem:[%s1078_s1 + $0x8] sm:$0xff]  ;;  %v38_v2 = vld [vmem:[%s1078_s1 + $0x10] sm:$0xff] }
   0x2   :  { %v716_v3 = vpack.c.bf16 %v37_v1, %v36_v0  ;;  %v39_v4 = vld [vmem:[%s1078_s1 + $0x18] sm:$0xff]  ;;  %v20_v5 = vld [vmem:[%s1079_s0] sm:$0xff]  ;;  %v258_v8 = vld [vmem:[%s1080_s3 + $0x8] sm:$0xff] }
   0x3   :  { %v720_v6 = vpack.c.bf16 %v39_v4, %v38_v2  ;;  %636 = vmatprep.mubr.msk.f32.mxu0 %vm47_vm0, %v20_v5  ;;  %v257_v7 = vld [vmem:[%s1080_s3] sm:$0xff]  ;;  %v259_v9 = vld [vmem:[%s1080_s3 + $0x10] sm:$0xff]  ;;  %v260_v10 = vld [vmem:[%s1080_s3 + $0x18] sm:$0xff] }
   0x4   :  { %717 = vmatprep.subr.bf16.mxu0 %v716_v3  ;;  %v21_v11 = vld [vmem:[%s1079_s0 + $0x8] sm:$0xff]  ;;  %v724_v12 = vpack.c.bf16 %v258_v8, %v257_v7  ;;  %v22_v13 = vld [vmem:[%s1079_s0 + $0x10] sm:$0xff]  ;;  %v728_v14 = vpack.c.bf16 %v260_v10, %v259_v9  ;;  %v261_v15 = vld [vmem:[%s1080_s3 + $0x20] sm:$0xff] }
   0x5   :  { %719 = vmatpush3.bf16.msra.mxu0 %v716_v3  ;;  %v262_v16 = vld [vmem:[%s1080_s3 + $0x28] sm:$0xff]  ;;  %v23_v17 = vld [vmem:[%s1079_s0 + $0x18] sm:$0xff]  ;;  %v24_v18 = vld [vmem:[%s1079_s0 + $0x20] sm:$0xff] }
   0x6   :  { %721 = vmatprep.subr.bf16.mxu0 %v720_v6  ;;  %756 = vmatprep.subr.bf16.mxu1 %v724_v12  ;;  %v732_v19 = vpack.c.bf16 %v262_v16, %v261_v15  ;;  %v263_v20 = vld [vmem:[%s1080_s3 + $0x30] sm:$0xff]  ;;  %v264_v21 = vld [vmem:[%s1080_s3 + $0x38] sm:$0xff]  ;;  %v25_v22 = vld [vmem:[%s1079_s0 + $0x28] sm:$0xff] }
   0x7   :  { %764 = vmatpush3.bf16.msra.mxu1 %v724_v12  ;;  %v26_v23 = vld [vmem:[%s1079_s0 + $0x30] sm:$0xff]  ;;  %v736_v24 = vpack.c.bf16 %v264_v21, %v263_v20  ;;  %v265_v25 = vld [vmem:[%s1080_s3 + $0x40] sm:$0xff]  ;;  %v266_v26 = vld [vmem:[%s1080_s3 + $0x48] sm:$0xff] }
   0x8   :  { %757 = vmatprep.subr.bf16.mxu1 %v728_v14  ;;  %v27_v27 = vld [vmem:[%s1079_s0 + $0x38] sm:$0xff]  ;;  %v28_v28 = vld [vmem:[%s1079_s0 + $0x40] sm:$0xff]  ;;  %v740_v29 = vpack.c.bf16 %v266_v26, %v265_v25  ;;  %v267_v30 = vld [vmem:[%s1080_s3 + $0x50] sm:$0xff] }
   0x9   :  { %723 = vmatpush3.bf16.msra.mxu0 %v720_v6  ;;  %v268_v31 = vld [vmem:[%s1080_s3 + $0x58] sm:$0xff]  ;;  %v29_v32 = vld [vmem:[%s1079_s0 + $0x48] sm:$0xff]  ;;  %v30_v33 = vld [vmem:[%s1079_s0 + $0x50] sm:$0xff] }
   0xa   :  { %725 = vmatprep.subr.bf16.mxu0 %v724_v12  ;;  %v744_v34 = vpack.c.bf16 %v268_v31, %v267_v30  ;;  %v269_v35 = vld [vmem:[%s1080_s3 + $0x60] sm:$0xff]  ;;  %v270_v36 = vld [vmem:[%s1080_s3 + $0x68] sm:$0xff]  ;;  %v31_v37 = vld [vmem:[%s1079_s0 + $0x58] sm:$0xff] }
   0xb   :  { %765 = vmatpush3.bf16.msra.mxu1 %v728_v14  ;;  %v32_v38 = vld [vmem:[%s1079_s0 + $0x60] sm:$0xff]  ;;  %v748_v39 = vpack.c.bf16 %v270_v36, %v269_v35  ;;  %v33_v40 = vld [vmem:[%s1079_s0 + $0x68] sm:$0xff]  ;;  %v34_v41 = vld [vmem:[%s1079_s0 + $0x70] sm:$0xff] }
   0xc   :  { %637 = vmatmul.mubr.msk.f32.vlgmr.msra.gmra.mrb[0].mxu0 %vm47_vm0, %v21_v11  ;;  %758 = vmatprep.subr.bf16.mxu1 %v732_v19  ;;  %v35_v42 = vld [vmem:[%s1079_s0 + $0x78] sm:$0xff]  ;;  %v271_v43 = vld [vmem:[%s1080_s3 + $0x70] sm:$0xff]  ;;  %v542_v46 = vld [vmem:[%s1081_s2] ss:$0 sm:$0xff] }
   0xd   :  { %639 = vmatprep.mubr.msk.f32.mxu0 %vm47_vm0, %v22_v13  ;;  %727 = vmatpush3.bf16.msra.mxu0 %v724_v12  ;;  %v272_v44 = vld [vmem:[%s1080_s3 + $0x78] sm:$0xff]  ;;  %v996_v31 = vld [vmem:[%s1082_s4] ss:$0 sm:$0xff] }
   0xe   :  { %729 = vmatprep.subr.bf16.mxu0 %v728_v14  ;;  %v752_v45 = vpack.c.bf16 %v272_v44, %v271_v43 }
   0xf   :  { %766 = vmatpush3.bf16.msra.mxu1 %v732_v19 }
  0x10   :  { %640 = vmatmul.mubr.msk.f32.gmra.mrb[2].mxu0 %vm47_vm0, %v23_v17  ;;  %759 = vmatprep.subr.bf16.mxu1 %v736_v24 }
  0x11   :  { %642 = vmatprep.mubr.msk.f32.mxu0 %vm47_vm0, %v24_v18  ;;  %731 = vmatpush3.bf16.msra.mxu0 %v728_v14 }
  0x12   :  { %733 = vmatprep.subr.bf16.mxu0 %v732_v19 }
  0x13   :  { %767 = vmatpush3.bf16.msra.mxu1 %v736_v24 }
  0x14   :  { %643 = vmatmul.mubr.msk.f32.gmra.mrb[4].mxu0 %vm47_vm0, %v25_v22  ;;  %760 = vmatprep.subr.bf16.mxu1 %v740_v29 }
  0x15   :  { %645 = vmatprep.mubr.msk.f32.mxu0 %vm47_vm0, %v26_v23  ;;  %735 = vmatpush3.bf16.msra.mxu0 %v732_v19 }
  0x16   :  { %737 = vmatprep.subr.bf16.mxu0 %v736_v24 }
  0x17   :  { %768 = vmatpush3.bf16.msra.mxu1 %v740_v29 }
  0x18   :  { %646 = vmatmul.mubr.msk.f32.gmra.mrb[6].mxu0 %vm47_vm0, %v27_v27  ;;  %761 = vmatprep.subr.bf16.mxu1 %v744_v34 }
  0x19   :  { %648 = vmatprep.mubr.msk.f32.mxu0 %vm47_vm0, %v28_v28  ;;  %739 = vmatpush3.bf16.msra.mxu0 %v736_v24 }
  0x1a   :  { %741 = vmatprep.subr.bf16.mxu0 %v740_v29 }
  0x1b   :  { %769 = vmatpush3.bf16.msra.mxu1 %v744_v34 }
  0x1c   :  { %649 = vmatmul.mubr.msk.f32.gmra.mrb[8].mxu0 %vm47_vm0, %v29_v32  ;;  %762 = vmatprep.subr.bf16.mxu1 %v748_v39 }
  0x1d   :  { %651 = vmatprep.mubr.msk.f32.mxu0 %vm47_vm0, %v30_v33  ;;  %743 = vmatpush3.bf16.msra.mxu0 %v740_v29 }
  0x1e   :  { %745 = vmatprep.subr.bf16.mxu0 %v744_v34 }
  0x1f   :  { %770 = vmatpush3.bf16.msra.mxu1 %v748_v39 }
  0x20   :  { %652 = vmatmul.mubr.msk.f32.gmra.mrb[10].mxu0 %vm47_vm0, %v31_v37  ;;  %763 = vmatprep.subr.bf16.mxu1 %v752_v45 }
  0x21   :  { %654 = vmatprep.mubr.msk.f32.mxu0 %vm47_vm0, %v32_v38  ;;  %747 = vmatpush3.bf16.msra.mxu0 %v744_v34 }
  0x22   :  { %749 = vmatprep.subr.bf16.mxu0 %v748_v39 }
  0x23   :  { %771 = vmatpush3.bf16.msra.mxu1 %v752_v45 }
  0x24   :  { %655 = vmatmul.mubr.msk.f32.gmra.mrb[12].mxu0 %vm47_vm0, %v33_v40 }
  0x25   :  { %657 = vmatprep.mubr.msk.f32.mxu0 %vm47_vm0, %v34_v41  ;;  %751 = vmatpush3.bf16.msra.mxu0 %v748_v39 }
  0x26   :  { %753 = vmatprep.subr.bf16.mxu0 %v752_v45 }
  0x28   :  { %658 = vmatmul.mubr.msk.f32.gmra.mrb[14].mxu0 %vm47_vm0, %v35_v42 }
  0x29   :  { %755 = vmatpush3.bf16.msra.mxu0 %v752_v45 }
  0xdf   :  { %v638_v47 = vpop.f32.mrb[0].mxu0 }
  0xe0   :  { %v168_v48 = vadd.f32 %v638_v47, %v542_v46  ;;  %v162_v49 = vpop.f32.mrb[1].mxu0 }
  0xe1   :  { %v163_v50 = vadd.f32 %v542_v46, %v162_v49 }
  0xe2   :  { %v242_v53 = vmax.f32 %v168_v48, 0.0 }
  0xe3   :  { %v241_v51 = vmax.f32 %v163_v50, 0.0  ;;  %v641_v52 = vpop.f32.mrb[2].mxu0 }
  0xe4   :  { %v178_v54 = vadd.f32 %v641_v52, %v542_v46  ;;  %v172_v55 = vpop.f32.mrb[3].mxu0 }
  0xe5   :  { %v173_v56 = vadd.f32 %v542_v46, %v172_v55  ;;  %692 = vmatprep.mubr.f32.mxu0 %v241_v51 }
  0xe6   :  { %693 = vmatmul.mubr.f32.vlgmr.msra.gmra.mrb[16].mxu0 %v242_v53  ;;  %v244_v59 = vmax.f32 %v178_v54, 0.0 }
  0xe7   :  { %v243_v57 = vmax.f32 %v173_v56, 0.0  ;;  %v644_v58 = vpop.f32.mrb[4].mxu0 }
  0xe8   :  { %v188_v60 = vadd.f32 %v644_v58, %v542_v46  ;;  %v182_v61 = vpop.f32.mrb[5].mxu0 }
  0xe9   :  { %v183_v62 = vadd.f32 %v542_v46, %v182_v61  ;;  %695 = vmatprep.mubr.f32.mxu0 %v243_v57 }
  0xea   :  { %696 = vmatmul.mubr.f32.gmra.mrb[18].mxu0 %v244_v59  ;;  %v246_v1 = vmax.f32 %v188_v60, 0.0 }
  0xeb   :  { %v245_v63 = vmax.f32 %v183_v62, 0.0  ;;  %v647_v0 = vpop.f32.mrb[6].mxu0 }
  0xec   :  { %v198_v2 = vadd.f32 %v647_v0, %v542_v46  ;;  %v192_v3 = vpop.f32.mrb[7].mxu0 }
  0xed   :  { %698 = vmatprep.mubr.f32.mxu0 %v245_v63  ;;  %v193_v4 = vadd.f32 %v542_v46, %v192_v3 }
  0xee   :  { %699 = vmatmul.mubr.f32.gmra.mrb[20].mxu0 %v246_v1  ;;  %v248_v7 = vmax.f32 %v198_v2, 0.0 }
  0xef   :  { %v650_v5 = vpop.f32.mrb[8].mxu0  ;;  %v247_v6 = vmax.f32 %v193_v4, 0.0 }
  0xf0   :  { %v208_v8 = vadd.f32 %v650_v5, %v542_v46  ;;  %v202_v9 = vpop.f32.mrb[9].mxu0 }
  0xf1   :  { %v203_v10 = vadd.f32 %v542_v46, %v202_v9  ;;  %701 = vmatprep.mubr.f32.mxu1 %v247_v6 }
  0xf2   :  { %702 = vmatmul.mubr.f32.vlgmr.msra.gmra.mrb[0].mxu1 %v248_v7  ;;  %v250_v13 = vmax.f32 %v208_v8, 0.0 }
  0xf3   :  { %v249_v11 = vmax.f32 %v203_v10, 0.0  ;;  %v653_v12 = vpop.f32.mrb[10].mxu0 }
  0xf4   :  { %v218_v14 = vadd.f32 %v653_v12, %v542_v46  ;;  %v212_v15 = vpop.f32.mrb[11].mxu0 }
  0xf5   :  { %v213_v16 = vadd.f32 %v542_v46, %v212_v15  ;;  %704 = vmatprep.mubr.f32.mxu1 %v249_v11 }
  0xf6   :  { %705 = vmatmul.mubr.f32.gmra.mrb[2].mxu1 %v250_v13  ;;  %v252_v19 = vmax.f32 %v218_v14, 0.0 }
  0xf7   :  { %v251_v17 = vmax.f32 %v213_v16, 0.0  ;;  %v656_v18 = vpop.f32.mrb[12].mxu0 }
  0xf8   :  { %v228_v20 = vadd.f32 %v656_v18, %v542_v46  ;;  %v222_v21 = vpop.f32.mrb[13].mxu0 }
  0xf9   :  { %v223_v22 = vadd.f32 %v542_v46, %v222_v21  ;;  %707 = vmatprep.mubr.f32.mxu1 %v251_v17 }
  0xfa   :  { %708 = vmatmul.mubr.f32.gmra.mrb[4].mxu1 %v252_v19  ;;  %v254_v25 = vmax.f32 %v228_v20, 0.0 }
  0xfb   :  { %v253_v23 = vmax.f32 %v223_v22, 0.0  ;;  %v659_v24 = vpop.f32.mrb[14].mxu0 }
  0xfc   :  { %v238_v26 = vadd.f32 %v659_v24, %v542_v46  ;;  %v232_v27 = vpop.f32.mrb[15].mxu0 }
  0xfd   :  { %v233_v28 = vadd.f32 %v542_v46, %v232_v27  ;;  %710 = vmatprep.mubr.f32.mxu1 %v253_v23 }
  0xfe   :  { %711 = vmatmul.mubr.f32.gmra.mrb[6].mxu1 %v254_v25  ;;  %v256_v30 = vmax.f32 %v238_v26, 0.0 }
  0xff   :  { %v255_v29 = vmax.f32 %v233_v28, 0.0 }
 0x101   :  { %713 = vmatprep.mubr.f32.mxu1 %v255_v29 }
 0x102   :  { %714 = vmatmul.mubr.f32.gmra.mrb[8].mxu1 %v256_v30 }
 0x1b9   :  { %v694_v32 = vpop.f32.mrb[16].mxu0 }
 0x1ba   :  { %v352_v33 = vadd.f32 %v694_v32, %v996_v31  ;;  %v346_v34 = vpop.f32.mrb[17].mxu0 }
 0x1bb   :  { %v347_v35 = vadd.f32 %v996_v31, %v346_v34 }
 0x1bc   :  { %v561_v36 = vmul.f32 -1.442695, %v352_v33 }
 0x1bd   :  { %v560_v37 = vmul.f32 -1.442695, %v347_v35  ;;  %v697_v38 = vpop.f32.mrb[18].mxu0 }
 0x1be   :  { %772 = vpow2.f32 %v561_v36  ;;  %v362_v39 = vadd.f32 %v697_v38, %v996_v31  ;;  %v356_v40 = vpop.f32.mrb[19].mxu0 }
 0x1bf   :  { %774 = vpow2.f32 %v560_v37  ;;  %v357_v41 = vadd.f32 %v996_v31, %v356_v40 }
 0x1c0   :  { %v563_v42 = vmul.f32 -1.442695, %v362_v39 }
 0x1c1   :  { %v562_v43 = vmul.f32 -1.442695, %v357_v41  ;;  %v700_v44 = vpop.f32.mrb[20].mxu0 }
 0x1c2   :  { %776 = vpow2.f32 %v563_v42  ;;  %v372_v45 = vadd.f32 %v700_v44, %v996_v31  ;;  %v366_v46 = vpop.f32.mrb[21].mxu0 }
 0x1c3   :  { %778 = vpow2.f32 %v562_v43  ;;  %v367_v47 = vadd.f32 %v996_v31, %v366_v46 }
 0x1c4   :  { %v565_v48 = vmul.f32 -1.442695, %v372_v45 }
 0x1c5   :  { %v564_v49 = vmul.f32 -1.442695, %v367_v47  ;;  %v703_v50 = vpop.f32.mrb[0].mxu1 }
 0x1c6   :  { %780 = vpow2.f32 %v565_v48  ;;  %v382_v51 = vadd.f32 %v703_v50, %v996_v31  ;;  %v376_v52 = vpop.f32.mrb[1].mxu1 }
 0x1c7   :  { %782 = vpow2.f32 %v564_v49  ;;  %v377_v53 = vadd.f32 %v996_v31, %v376_v52 }
 0x1c8   :  { %v773_v54 = vpop.eup %772  ;;  %v567_v55 = vmul.f32 -1.442695, %v382_v51 }
 0x1c9   :  { %v775_v56 = vpop.eup %774  ;;  %v474_v57 = vadd.f32 1.0, %v773_v54  ;;  %v566_v58 = vmul.f32 -1.442695, %v377_v53  ;;  %v706_v59 = vpop.f32.mrb[2].mxu1 }
 0x1ca   :  { %v473_v60 = vadd.f32 1.0, %v775_v56  ;;  %784 = vpow2.f32 %v567_v55  ;;  %v392_v61 = vadd.f32 %v706_v59, %v996_v31  ;;  %v386_v62 = vpop.f32.mrb[3].mxu1 }
 0x1cb   :  { %786 = vrcp.f32 %v474_v57  ;;  %v387_v63 = vadd.f32 %v996_v31, %v386_v62 }
 0x1cc   :  { %v777_v0 = vpop.eup %776  ;;  %788 = vrcp.f32 %v473_v60  ;;  %v569_v1 = vmul.f32 -1.442695, %v392_v61 }
 0x1cd   :  { %v779_v2 = vpop.eup %778  ;;  %v476_v3 = vadd.f32 1.0, %v777_v0  ;;  %790 = vpow2.f32 %v566_v58  ;;  %v568_v4 = vmul.f32 -1.442695, %v387_v63  ;;  %v709_v5 = vpop.f32.mrb[4].mxu1 }
 0x1ce   :  { %v475_v6 = vadd.f32 1.0, %v779_v2  ;;  %792 = vpow2.f32 %v569_v1  ;;  %v402_v7 = vadd.f32 %v709_v5, %v996_v31  ;;  %v396_v8 = vpop.f32.mrb[5].mxu1 }
 0x1cf   :  { %794 = vrcp.f32 %v476_v3  ;;  %v397_v9 = vadd.f32 %v996_v31, %v396_v8 }
 0x1d0   :  { %v781_v10 = vpop.eup %780  ;;  %796 = vrcp.f32 %v475_v6  ;;  %v571_v11 = vmul.f32 -1.442695, %v402_v7 }
 0x1d1   :  { %v783_v12 = vpop.eup %782  ;;  %v478_v13 = vadd.f32 1.0, %v781_v10  ;;  %798 = vpow2.f32 %v568_v4  ;;  %v570_v14 = vmul.f32 -1.442695, %v397_v9  ;;  %v712_v15 = vpop.f32.mrb[6].mxu1 }
 0x1d2   :  { %v477_v16 = vadd.f32 1.0, %v783_v12  ;;  %800 = vpow2.f32 %v571_v11  ;;  %v412_v17 = vadd.f32 %v712_v15, %v996_v31  ;;  %v406_v18 = vpop.f32.mrb[7].mxu1 }
 0x1d3   :  { %802 = vrcp.f32 %v478_v13  ;;  %v407_v19 = vadd.f32 %v996_v31, %v406_v18 }
 0x1d4   :  { %v785_v20 = vpop.eup %784  ;;  %804 = vrcp.f32 %v477_v16  ;;  %v573_v21 = vmul.f32 -1.442695, %v412_v17 }
 0x1d5   :  { %v787_v22 = vpop.eup %786  ;;  %v480_v23 = vadd.f32 1.0, %v785_v20  ;;  %806 = vpow2.f32 %v570_v14  ;;  %v572_v24 = vmul.f32 -1.442695, %v407_v19  ;;  %v715_v25 = vpop.f32.mrb[8].mxu1 }
 0x1d6   :  { %v789_v26 = vpop.eup %788  ;;  %523 = vst.msk [vmem:[%s1083_s5 + $0x8] sm:$0xff] %vm521_vm1, %v787_v22  ;;  %808 = vpow2.f32 %v573_v21  ;;  %v422_v27 = vadd.f32 %v715_v25, %v996_v31  ;;  %v416_v28 = vpop.f32.mrb[9].mxu1 }
 0x1d7   :  { %v791_v29 = vpop.eup %790  ;;  %522 = vst.msk [vmem:[%s1083_s5] sm:$0xff] %vm521_vm1, %v789_v26  ;;  %810 = vrcp.f32 %v480_v23  ;;  %v417_v30 = vadd.f32 %v996_v31, %v416_v28 }
 0x1d8   :  { %v793_v32 = vpop.eup %792  ;;  %v479_v33 = vadd.f32 1.0, %v791_v29  ;;  %812 = vpow2.f32 %v572_v24  ;;  %v575_v34 = vmul.f32 -1.442695, %v422_v27 }
 0x1d9   :  { %v795_v35 = vpop.eup %794  ;;  %v482_v36 = vadd.f32 1.0, %v793_v32  ;;  %v574_v37 = vmul.f32 -1.442695, %v417_v30 }
 0x1da   :  { %v797_v38 = vpop.eup %796  ;;  %525 = vst.msk [vmem:[%s1083_s5 + $0x18] sm:$0xff] %vm521_vm1, %v795_v35  ;;  %814 = vrcp.f32 %v479_v33 }
 0x1db   :  { %v799_v39 = vpop.eup %798  ;;  %524 = vst.msk [vmem:[%s1083_s5 + $0x10] sm:$0xff] %vm521_vm1, %v797_v38  ;;  %816 = vrcp.f32 %v482_v36 }
 0x1dc   :  { %v801_v31 = vpop.eup %800  ;;  %v481_v40 = vadd.f32 1.0, %v799_v39  ;;  %818 = vpow2.f32 %v575_v34 }
 0x1dd   :  { %v803_v41 = vpop.eup %802  ;;  %v484_v42 = vadd.f32 1.0, %v801_v31  ;;  %820 = vpow2.f32 %v574_v37 }
 0x1de   :  { %v805_v43 = vpop.eup %804  ;;  %527 = vst.msk [vmem:[%s1083_s5 + $0x28] sm:$0xff] %vm521_vm1, %v803_v41  ;;  %822 = vrcp.f32 %v481_v40 }
 0x1df   :  { %v807_v44 = vpop.eup %806  ;;  %526 = vst.msk [vmem:[%s1083_s5 + $0x20] sm:$0xff] %vm521_vm1, %v805_v43  ;;  %824 = vrcp.f32 %v484_v42 }
 0x1e0   :  { %v809_v45 = vpop.eup %808  ;;  %v483_v46 = vadd.f32 1.0, %v807_v44 }
 0x1e1   :  { %v811_v47 = vpop.eup %810  ;;  %v486_v48 = vadd.f32 1.0, %v809_v45 }
 0x1e2   :  { %v813_v49 = vpop.eup %812  ;;  %529 = vst.msk [vmem:[%s1083_s5 + $0x38] sm:$0xff] %vm521_vm1, %v811_v47  ;;  %826 = vrcp.f32 %v483_v46 }
 0x1e3   :  { %828 = vrcp.f32 %v486_v48  ;;  %v485_v50 = vadd.f32 1.0, %v813_v49 }
 0x1e4   :  { %v815_v51 = vpop.eup %814 }
 0x1e5   :  { %v817_v52 = vpop.eup %816  ;;  %528 = vst.msk [vmem:[%s1083_s5 + $0x30] sm:$0xff] %vm521_vm1, %v815_v51  ;;  %830 = vrcp.f32 %v485_v50 }
 0x1e6   :  { %v819_v53 = vpop.eup %818  ;;  %531 = vst.msk [vmem:[%s1083_s5 + $0x48] sm:$0xff] %vm521_vm1, %v817_v52 }
 0x1e7   :  { %v821_v54 = vpop.eup %820  ;;  %v488_v55 = vadd.f32 1.0, %v819_v53 }
 0x1e8   :  { %v823_v56 = vpop.eup %822  ;;  %v487_v57 = vadd.f32 1.0, %v821_v54 }
 0x1e9   :  { %v825_v58 = vpop.eup %824  ;;  %530 = vst.msk [vmem:[%s1083_s5 + $0x40] sm:$0xff] %vm521_vm1, %v823_v56  ;;  %832 = vrcp.f32 %v488_v55 }
 0x1ea   :  { %533 = vst.msk [vmem:[%s1083_s5 + $0x58] sm:$0xff] %vm521_vm1, %v825_v58  ;;  %834 = vrcp.f32 %v487_v57 }
 0x1ec   :  { %v827_v59 = vpop.eup %826 }
 0x1ed   :  { %v829_v60 = vpop.eup %828  ;;  %532 = vst.msk [vmem:[%s1083_s5 + $0x50] sm:$0xff] %vm521_vm1, %v827_v59 }
 0x1ee   :  { %535 = vst.msk [vmem:[%s1083_s5 + $0x68] sm:$0xff] %vm521_vm1, %v829_v60 }
 0x1ef   :  { %v831_v61 = vpop.eup %830 }
 0x1f0   :  { %534 = vst.msk [vmem:[%s1083_s5 + $0x60] sm:$0xff] %vm521_vm1, %v831_v61 }
 0x1f3   :  { %v833_v62 = vpop.eup %832 }
 0x1f4   :  { %v835_v63 = vpop.eup %834  ;;  %537 = vst.msk [vmem:[%s1083_s5 + $0x78] sm:$0xff] %vm521_vm1, %v833_v62 }
 0x1f5   :  { %536 = vst.msk [vmem:[%s1083_s5 + $0x70] sm:$0xff] %vm521_vm1, %v835_v63 }

// kernel: dc_mixhop_forward.4
= control target key start
LH: loop header
LB: loop body
LE: loop exit
PB: predicated region body
PF: predicated region fallthrough
CT: control target
= control target key end

     0   :  { %10 = vsyncpa [#allocation4], 0  ;;  %s3677_s18 = smov 0   ;;  %s3679_s19 = smov 0   ;;  %s5384_s0 = inlined_call_operand.vmem [shape: bf16[128,128], index: 0, kind: input, shape index: {}]   ;;  %s5385_s1 = inlined_call_operand.vmem [shape: f32[128,128], index: 1, kind: input, shape index: {}]   ;;  %s5386_s2 = inlined_call_operand.vmem [shape: f32[128,3], index: 2, kind: input, shape index: {}]   ;;  %s5387_s3 = inlined_call_operand.vmem [shape: f32[128,7], index: 3, kind: input, shape index: {}]   ;;  %s5388_s4 = inlined_call_operand.vmem [shape: f32[1,128], index: 4, kind: input, shape index: {}]   ;;  %s5389_s5 = inlined_call_operand.hbm [shape: f32[1,1], index: 5, kind: output, shape index: {}]  }
   0x1   :  { %s3681_s20 = smov 0  }
   0x2 LB: > { %s3121_s21 = sadd.s32 4294967295, %s3626_s20   ;;  %s28_s22 = sadd.s32 1, %s3622_s19  ;;  %s3626_s20 = sphi %s3681_s20, %s16_s20   ;;  %s3622_s19 = sphi %s3679_s19, %s5594_s19   ;;  %s3618_s18 = sphi %s3677_s18, %s5593_s18  }
   0x3   : > { %p30_p0 = scmp.ge.s32.totalorder %s28_s22, 2  ;;  %p3126_p1 = scmp.ge.s32.totalorder %s3626_s20, 1 }
   0x4   : > { %p218_p2 = scmp.lt.s32.totalorder %s3626_s20, 3 }
   0x5   : > { %s5596_s22 = smov (%p30_p0, %s28_s22), 0 }
   0x6   : > { %p219_p3 = pnand %p3126_p1, %p218_p2 }
   0x8   : > { %222 = sbr.rel (%p219_p3) target bundleno = 2155 (0x86b), region = 40 }
   0xf   : > { %v286_v0 = vld [vmem:[%s5385_s1] sm:$0xff]  ;;  %v287_v1 = vld [vmem:[%s5385_s1 + $0x8] sm:$0xff]  ;;  %v288_v2 = vld [vmem:[%s5385_s1 + $0x10] sm:$0xff]  ;;  %p3127_p4 = scmp.ne.s32.totalorder %s3618_s18, 0 }
  0x10   : > { %v289_v3 = vld [vmem:[%s5385_s1 + $0x18] sm:$0xff]  ;;  %v290_v4 = vld [vmem:[%s5385_s1 + $0x20] sm:$0xff]  ;;  %v302_v5 = vmul.f32 0.5, %v286_v0  ;;  %v303_v6 = vmul.f32 0.5, %v287_v1  ;;  %v291_v7 = vld [vmem:[%s5385_s1 + $0x28] sm:$0xff]  ;;  %v304_v8 = vmul.f32 0.5, %v288_v2 }
  0x11   : > { %v292_v9 = vld [vmem:[%s5385_s1 + $0x30] sm:$0xff]  ;;  %v293_v10 = vld [vmem:[%s5385_s1 + $0x38] sm:$0xff]  ;;  %v294_v11 = vld [vmem:[%s5385_s1 + $0x40] sm:$0xff]  ;;  %v305_v12 = vmul.f32 0.5, %v289_v3  ;;  %v306_v14 = vmul.f32 0.5, %v290_v4  ;;  %v307_v18 = vmul.f32 0.5, %v291_v7 }
  0x12   : > { %3494 = vtanh.f32 %v302_v5  ;;  %v295_v13 = vld [vmem:[%s5385_s1 + $0x48] sm:$0xff]  ;;  %v3731_v15 = vld [vmem:[%s5386_s2] sm:$0xff]  ;;  %v296_v17 = vld [vmem:[%s5385_s1 + $0x50] sm:$0xff]  ;;  %v308_v23 = vmul.f32 0.5, %v292_v9  ;;  %v309_v27 = vmul.f32 0.5, %v293_v10  ;;  %v310_v31 = vmul.f32 0.5, %v294_v11 }
  0x13   : > { %v3736_v16 = vld [vmem:[%s5386_s2 + $0x8] sm:$0xff]  ;;  %3496 = vtanh.f32 %v303_v6  ;;  %v3744_v19 = vld [vmem:[%s5386_s2 + $0x10] sm:$0xff]  ;;  %v3749_v20 = vld [vmem:[%s5386_s2 + $0x18] sm:$0xff]  ;;  %v311_v36 = vmul.f32 0.5, %v295_v13  ;;  %v312_v40 = vmul.f32 0.5, %v296_v17 }
  0x14   : > { %v3754_v21 = vld [vmem:[%s5386_s2 + $0x20] sm:$0xff]  ;;  %v297_v22 = vld [vmem:[%s5385_s1 + $0x58] sm:$0xff]  ;;  %3498 = vtanh.f32 %v304_v8  ;;  %v3762_v24 = vld [vmem:[%s5386_s2 + $0x28] sm:$0xff] }
  0x15   : > { %v3767_v25 = vld [vmem:[%s5386_s2 + $0x30] sm:$0xff]  ;;  %v3772_v26 = vld [vmem:[%s5386_s2 + $0x38] sm:$0xff]  ;;  %3500 = vtanh.f32 %v305_v12  ;;  %v3777_v28 = vld [vmem:[%s5386_s2 + $0x40] sm:$0xff]  ;;  %v313_v43 = vmul.f32 0.5, %v297_v22 }
  0x16   : > { %v3782_v29 = vld [vmem:[%s5386_s2 + $0x48] sm:$0xff]  ;;  %v3787_v30 = vld [vmem:[%s5386_s2 + $0x50] sm:$0xff]  ;;  %3502 = vtanh.f32 %v306_v14  ;;  %v3792_v32 = vld [vmem:[%s5386_s2 + $0x58] sm:$0xff] }
  0x17   : > { %v3797_v33 = vld [vmem:[%s5386_s2 + $0x60] sm:$0xff]  ;;  %v3802_v34 = vld [vmem:[%s5386_s2 + $0x68] sm:$0xff]  ;;  %3504 = vtanh.f32 %v307_v18  ;;  %v3810_v37 = vld [vmem:[%s5386_s2 + $0x70] sm:$0xff] }
  0x18   : > { %v298_v35 = vld [vmem:[%s5385_s1 + $0x60] sm:$0xff]  ;;  %v3815_v38 = vld [vmem:[%s5386_s2 + $0x78] sm:$0xff]  ;;  %v299_v39 = vld [vmem:[%s5385_s1 + $0x68] sm:$0xff]  ;;  %3506 = vtanh.f32 %v308_v23 }
  0x19   : > { %v3135_v41 = vld [vmem:[%s5384_s0] sm:$0xff]   ;;  %v300_v42 = vld [vmem:[%s5385_s1 + $0x70] sm:$0xff]  ;;  %3508 = vtanh.f32 %v309_v27  ;;  %v301_v44 = vld [vmem:[%s5385_s1 + $0x78] sm:$0xff]  ;;  %v314_v45 = vmul.f32 0.5, %v298_v35  ;;  %v315_v47 = vmul.f32 0.5, %v299_v39 }
  0x1a   : > { %3510 = vtanh.f32 %v310_v31  ;;  %v3136_v48 = vunpack.c.l.bf16 %v3135_v41  ;;  %v3166_v49 = vld [vmem:[%s5384_s0 + $0x8] sm:$0xff]   ;;  %v316_v50 = vmul.f32 0.5, %v300_v42  ;;  %v317_v53 = vmul.f32 0.5, %v301_v44  ;;  %v3167_v56 = vld [vmem:[%s5384_s0 + $0x10] sm:$0xff]   ;;  %v3168_v0 = vld [vmem:[%s5384_s0 + $0x18] sm:$0xff]  }
  0x1b   : > { %3512 = vtanh.f32 %v311_v36  ;;  %v3137_v55 = vunpack.c.h.bf16 %v3135_v41  ;;  %v3140_v60 = vunpack.c.l.bf16 %v3166_v49  ;;  %v3141_v61 = vunpack.c.h.bf16 %v3166_v49  ;;  %v3169_v10 = vld [vmem:[%s5384_s0 + $0x20] sm:$0xff]   ;;  %v3170_v35 = vld [vmem:[%s5384_s0 + $0x28] sm:$0xff]  }
  0x1c   : > { %v3495_v46 = vpop.eup %3494  ;;  %3514 = vtanh.f32 %v312_v40  ;;  %v3144_v5 = vunpack.c.l.bf16 %v3167_v56  ;;  %v3145_v9 = vunpack.c.h.bf16 %v3167_v56  ;;  %v3148_v17 = vunpack.c.l.bf16 %v3168_v0 }
  0x1d   : > { %v334_v51 = vadd.f32 1.0, %v3495_v46  ;;  %v3497_v52 = vpop.eup %3496  ;;  %3516 = vtanh.f32 %v313_v43  ;;  %v3149_v31 = vunpack.c.h.bf16 %v3168_v0  ;;  %v3152_v42 = vunpack.c.l.bf16 %v3169_v10 }
  0x1e   : > { %v3499_v54 = vpop.eup %3498  ;;  %3518 = vtanh.f32 %v314_v45  ;;  %v335_v57 = vadd.f32 1.0, %v3497_v52 }
  0x1f   : > { %v350_v58 = vmul.f32 0.5, %v334_v51  ;;  %v3501_v59 = vpop.eup %3500  ;;  %3520 = vtanh.f32 %v315_v47  ;;  %v336_v62 = vadd.f32 1.0, %v3499_v54  ;;  %v3153_v47 = vunpack.c.h.bf16 %v3169_v10 }
  0x20   : > { %v3503_v63 = vpop.eup %3502  ;;  %3522 = vtanh.f32 %v316_v50  ;;  %v337_v1 = vadd.f32 1.0, %v3501_v59  ;;  %v351_v2 = vmul.f32 0.5, %v335_v57  ;;  %v3172_v59 = vld [vmem:[%s5384_s0 + $0x38] sm:$0xff]  }
  0x21   : > { %v3838_v3 = vmul.f32 %v3136_v48, %v350_v58  ;;  %v3505_v4 = vpop.eup %3504  ;;  %3524 = vtanh.f32 %v317_v53  ;;  %v338_v6 = vadd.f32 1.0, %v3503_v63  ;;  %v352_v7 = vmul.f32 0.5, %v336_v62  ;;  %v3171_v48 = vld [vmem:[%s5384_s0 + $0x30] sm:$0xff]  }
  0x22   : > { %v3507_v8 = vpop.eup %3506  ;;  %v339_v11 = vadd.f32 1.0, %v3505_v4  ;;  %v353_v12 = vmul.f32 0.5, %v337_v1  ;;  %v3843_v13 = vmul.f32 %v3137_v55, %v351_v2  ;;  %v3156_v53 = vunpack.c.l.bf16 %v3170_v35 }
  0x23   : > { %5436 = vst [vmem:[#allocation6_spill] sm:$0xff] %v3838_v3  ;;  %v3509_v14 = vpop.eup %3508  ;;  %v340_v18 = vadd.f32 1.0, %v3507_v8  ;;  %v354_v22 = vmul.f32 0.5, %v338_v6  ;;  %v3845_v23 = vmul.f32 %v3140_v60, %v352_v7  ;;  %v3157_v58 = vunpack.c.h.bf16 %v3170_v35 }
  0x24   : > { %5437 = vst [vmem:[#allocation7_spill] sm:$0xff] %v3843_v13  ;;  %v3511_v27 = vpop.eup %3510  ;;  %v341_v36 = vadd.f32 1.0, %v3509_v14  ;;  %v355_v39 = vmul.f32 0.5, %v339_v11  ;;  %v3850_v40 = vmul.f32 %v3141_v61, %v353_v12  ;;  %v3160_v0 = vunpack.c.l.bf16 %v3171_v48 }
  0x25   : > { %5438 = vst [vmem:[#allocation8_spill] sm:$0xff] %v3845_v23  ;;  %v3513_v41 = vpop.eup %3512  ;;  %v342_v43 = vadd.f32 1.0, %v3511_v27  ;;  %v356_v44 = vmul.f32 0.5, %v340_v18  ;;  %v3852_v45 = vmul.f32 %v3144_v5, %v354_v22  ;;  %v3161_v6 = vunpack.c.h.bf16 %v3171_v48 }
  0x26   : > { %5439 = vst [vmem:[#allocation9_spill] sm:$0xff] %v3850_v40  ;;  %v3515_v46 = vpop.eup %3514  ;;  %v343_v49 = vadd.f32 1.0, %v3513_v41  ;;  %v357_v50 = vmul.f32 0.5, %v341_v36  ;;  %v3857_v51 = vmul.f32 %v3145_v9, %v355_v39  ;;  %v3164_v11 = vunpack.c.l.bf16 %v3172_v59 }
  0x27   : > { %5440 = vst [vmem:[#allocation10_spill] sm:$0xff] %v3852_v45  ;;  %v3517_v52 = vpop.eup %3516  ;;  %v344_v54 = vadd.f32 1.0, %v3515_v46  ;;  %v358_v55 = vmul.f32 0.5, %v342_v43  ;;  %v3859_v56 = vmul.f32 %v3148_v17, %v356_v44  ;;  %v3165_v18 = vunpack.c.h.bf16 %v3172_v59 }
  0x28   : > { %5441 = vst [vmem:[#allocation11_spill] sm:$0xff] %v3857_v51  ;;  %v3519_v57 = vpop.eup %3518  ;;  %v345_v60 = vadd.f32 1.0, %v3517_v52  ;;  %v359_v61 = vmul.f32 0.5, %v343_v49  ;;  %v3864_v62 = vmul.f32 %v3149_v31, %v357_v50 }
  0x29   : > { %5442 = vst [vmem:[#allocation12_spill] sm:$0xff] %v3859_v56  ;;  %v3521_v63 = vpop.eup %3520  ;;  %v346_v1 = vadd.f32 1.0, %v3519_v57  ;;  %v360_v2 = vmul.f32 0.5, %v344_v54  ;;  %v3866_v4 = vmul.f32 %v3152_v42, %v358_v55 }
  0x2a   : > { %5443 = vst [vmem:[#allocation13_spill] sm:$0xff] %v3864_v62  ;;  %v3523_v5 = vpop.eup %3522  ;;  %v347_v7 = vadd.f32 1.0, %v3521_v63  ;;  %v361_v8 = vmul.f32 0.5, %v345_v60  ;;  %v3868_v9 = vmul.f32 %v3153_v47, %v359_v61 }
  0x2b   : > { %5444 = vst [vmem:[#allocation14_spill] sm:$0xff] %v3866_v4  ;;  %v3525_v10 = vpop.eup %3524  ;;  %v348_v12 = vadd.f32 1.0, %v3523_v5  ;;  %v362_v14 = vmul.f32 0.5, %v346_v1  ;;  %v3870_v17 = vmul.f32 %v3156_v53, %v360_v2 }
  0x2c   : > { %5445 = vst [vmem:[#allocation15_spill] sm:$0xff] %v3868_v9  ;;  %v349_v22 = vadd.f32 1.0, %v3525_v10  ;;  %v363_v27 = vmul.f32 0.5, %v347_v7  ;;  %v3872_v31 = vmul.f32 %v3157_v58, %v361_v8  ;;  %417 = sbr.rel (%p3127_p4) target bundleno = 936 (0x3a8), region = 44 }
  0x2d   : > { %5446 = vst [vmem:[#allocation16_spill] sm:$0xff] %v3870_v17  ;;  %v364_v35 = vmul.f32 0.5, %v348_v12  ;;  %v3874_v36 = vmul.f32 %v3160_v0, %v362_v14 }
  0x2e   : > { %5447 = vst [vmem:[#allocation17_spill] sm:$0xff] %v3872_v31  ;;  %v365_v39 = vmul.f32 0.5, %v349_v22  ;;  %v3876_v41 = vmul.f32 %v3161_v6, %v363_v27 }
  0x2f   : > { %5448 = vst [vmem:[#allocation18_spill] sm:$0xff] %v3874_v36  ;;  %v3878_v42 = vmul.f32 %v3164_v11, %v364_v35 }
  0x30   : > { %5449 = vst [vmem:[#allocation19_spill] sm:$0xff] %v3876_v41  ;;  %v3880_v43 = vmul.f32 %v3165_v18, %v365_v39 }
  0x31   : > { %5450 = vst [vmem:[#allocation20_spill] sm:$0xff] %v3878_v42 }
  0x32   : > { %5451 = vst [vmem:[#allocation21_spill] sm:$0xff] %v3880_v43 }
  0x33   : > { %v418_v44 = vld [vmem:[%s5387_s3] sm:$0xff]  ;;  %v419_v46 = vld [vmem:[%s5387_s3 + $0x8] sm:$0xff]  ;;  %v420_v47 = vld [vmem:[%s5387_s3 + $0x10] sm:$0xff]  ;;  %3269 = vmatprep.mubr.f32.mxu0 %v3838_v3  ;;  %3281 = vmatprep.mubr.f32.mxu1 %v3866_v4  ;;  %v3628_v50 = vmov 0   ;;  %s3629_s10 = smov 127   ;;  %s3630_s11 = smov 9  }
  0x34   : > { %v3349_v48 = vpack.c.bf16 %v419_v46, %v418_v44  ;;  %v421_v49 = vld [vmem:[%s5387_s3 + $0x18] sm:$0xff]  ;;  %3527 = vset.pattern.permute.xlu1 %v3628_v50  ;;  %3526 = vset.pattern.permute.xlu0 %v3628_v50  ;;  %v422_v53 = vld [vmem:[%s5387_s3 + $0x20] sm:$0xff]  ;;  %v423_v54 = vld [vmem:[%s5387_s3 + $0x28] sm:$0xff]  ;;  %s3631_s12 = smov 4   ;;  %s3632_s13 = smov 1   ;;  %vm1347_vm0 = vcmask 23552  }
  0x35   : > { %v3353_v52 = vpack.c.bf16 %v421_v49, %v420_v47  ;;  %v3357_v55 = vpack.c.bf16 %v423_v54, %v422_v53  ;;  %v424_v57 = vld [vmem:[%s5387_s3 + $0x30] sm:$0xff]  ;;  %v425_v58 = vld [vmem:[%s5387_s3 + $0x38] sm:$0xff]  ;;  %v426_v60 = vld [vmem:[%s5387_s3 + $0x40] sm:$0xff]  ;;  %s3633_s14 = smov 2   ;;  %s3634_s15 = smov 124   ;;  %vm1364_vm1 = vcmask 48128  }
  0x36   : > { %3350 = vmatprep.subr.bf16.mxu0 %v3349_v48  ;;  %3413 = vmatprep.subr.bf16.mxu1 %v3349_v48  ;;  %v3361_v59 = vpack.c.bf16 %v425_v58, %v424_v57  ;;  %v427_v61 = vld [vmem:[%s5387_s3 + $0x48] sm:$0xff]  ;;  %v428_v0 = vld [vmem:[%s5387_s3 + $0x50] sm:$0xff]  ;;  %v429_v1 = vld [vmem:[%s5387_s3 + $0x58] sm:$0xff]  ;;  %v756_v58 = vmul.f32 2.0, %v3736_v16  ;;  %s3635_s16 = smov 6   ;;  %vm1381_vm2 = vcmask 72704  }
  0x37   : > { %3352 = vmatpush3.bf16.msra.mxu0 %v3349_v48  ;;  %3421 = vmatpush3.bf16.msra.mxu1 %v3349_v48  ;;  %v3365_v63 = vpack.c.bf16 %v427_v61, %v426_v60  ;;  %v3369_v2 = vpack.c.bf16 %v429_v1, %v428_v0  ;;  %v430_v5 = vld [vmem:[%s5387_s3 + $0x60] sm:$0xff]  ;;  %v431_v6 = vld [vmem:[%s5387_s3 + $0x68] sm:$0xff]  ;;  %v432_v8 = vld [vmem:[%s5387_s3 + $0x70] sm:$0xff]  ;;  %vm1398_vm3 = vcmask 80896   ;;  %vm1416_vm4 = vcmask 105472  }
  0x38   : > { %3354 = vmatprep.subr.bf16.mxu0 %v3353_v52  ;;  %3414 = vmatprep.subr.bf16.mxu1 %v3353_v52  ;;  %v3373_v7 = vpack.c.bf16 %v431_v6, %v430_v5  ;;  %v433_v10 = vld [vmem:[%s5387_s3 + $0x78] sm:$0xff]  ;;  %v755_v5 = vmul.f32 2.0, %v3731_v15 }
  0x39   : > { %v3377_v11 = vpack.c.bf16 %v433_v10, %v432_v8  ;;  %v763_v10 = vmul.f32 2.0, %v3777_v28 }
  0x3b   : > { %3356 = vmatpush3.bf16.msra.mxu0 %v3353_v52  ;;  %3422 = vmatpush3.bf16.msra.mxu1 %v3353_v52 }
  0x3c   : > { %3358 = vmatprep.subr.bf16.mxu0 %v3357_v55  ;;  %3415 = vmatprep.subr.bf16.mxu1 %v3357_v55 }
  0x3f   : > { %3360 = vmatpush3.bf16.msra.mxu0 %v3357_v55  ;;  %3423 = vmatpush3.bf16.msra.mxu1 %v3357_v55 }
  0x40   : > { %3362 = vmatprep.subr.bf16.mxu0 %v3361_v59  ;;  %3416 = vmatprep.subr.bf16.mxu1 %v3361_v59 }
  0x43   : > { %3364 = vmatpush3.bf16.msra.mxu0 %v3361_v59  ;;  %3424 = vmatpush3.bf16.msra.mxu1 %v3361_v59 }
  0x44   : > { %3366 = vmatprep.subr.bf16.mxu0 %v3365_v63  ;;  %3417 = vmatprep.subr.bf16.mxu1 %v3365_v63 }
  0x47   : > { %3368 = vmatpush3.bf16.msra.mxu0 %v3365_v63  ;;  %3425 = vmatpush3.bf16.msra.mxu1 %v3365_v63  ;;  %v764_v63 = vmul.f32 2.0, %v3782_v29 }
  0x48   : > { %3370 = vmatprep.subr.bf16.mxu0 %v3369_v2  ;;  %3418 = vmatprep.subr.bf16.mxu1 %v3369_v2 }
  0x4b   : > { %3372 = vmatpush3.bf16.msra.mxu0 %v3369_v2  ;;  %3426 = vmatpush3.bf16.msra.mxu1 %v3369_v2 }
  0x4c   : > { %3374 = vmatprep.subr.bf16.mxu0 %v3373_v7  ;;  %3419 = vmatprep.subr.bf16.mxu1 %v3373_v7 }
  0x4f   : > { %3376 = vmatpush3.bf16.msra.mxu0 %v3373_v7  ;;  %3427 = vmatpush3.bf16.msra.mxu1 %v3373_v7 }
  0x50   : > { %3378 = vmatprep.subr.bf16.mxu0 %v3377_v11  ;;  %3420 = vmatprep.subr.bf16.mxu1 %v3377_v11 }
  0x53   : > { %3380 = vmatpush3.bf16.msra.mxu0 %v3377_v11  ;;  %3428 = vmatpush3.bf16.msra.mxu1 %v3377_v11 }
  0x56   : > { %3270 = vmatmul.mubr.f32.vlgmr.msra.gmra.mrb[0].mxu0 %v3843_v13  ;;  %3282 = vmatmul.mubr.f32.vlgmr.msra.gmra.mrb[0].mxu1 %v3868_v9  ;;  %v769_v13 = vmul.f32 2.0, %v3810_v37 }
  0x57   : > { %3272 = vmatprep.mubr.f32.mxu0 %v3845_v23  ;;  %3284 = vmatprep.mubr.f32.mxu1 %v3870_v17 }
  0x5a   : > { %3273 = vmatmul.mubr.f32.gmra.mrb[2].mxu0 %v3850_v40  ;;  %3285 = vmatmul.mubr.f32.gmra.mrb[2].mxu1 %v3872_v31 }
  0x5b   : > { %3275 = vmatprep.mubr.f32.mxu0 %v3852_v45  ;;  %3287 = vmatprep.mubr.f32.mxu1 %v3874_v36  ;;  %v768_v36 = vmul.f32 2.0, %v3802_v34  ;;  %v767_v45 = vmul.f32 2.0, %v3797_v33 }
  0x5e   : > { %3276 = vmatmul.mubr.f32.gmra.mrb[4].mxu0 %v3857_v51  ;;  %3288 = vmatmul.mubr.f32.gmra.mrb[4].mxu1 %v3876_v41 }
  0x5f   : > { %3278 = vmatprep.mubr.f32.mxu0 %v3859_v56  ;;  %3290 = vmatprep.mubr.f32.mxu1 %v3878_v42  ;;  %v765_v42 = vmul.f32 2.0, %v3787_v30 }
  0x62   : > { %3279 = vmatmul.mubr.f32.gmra.mrb[6].mxu0 %v3864_v62  ;;  %3291 = vmatmul.mubr.f32.gmra.mrb[6].mxu1 %v3880_v43 }
 0x129   : > { %v3947_v12 = vpop.f32.mrb[0].mxu0  ;;  %v3949_v14 = vpop.f32.mrb[0].mxu1 }
 0x12a   : > { %626 = vperm.xlu1 %3527, %v3949_v14   ;;  %v3952_v18 = vpop.f32.mrb[1].mxu1  ;;  %586 = vperm.xlu0 %3526, %v3947_v12   ;;  %v3955_v22 = vpop.f32.mrb[1].mxu0 }
 0x12d   : > { %v3957_v27 = vpop.f32.mrb[2].mxu0  ;;  %v3959_v35 = vpop.f32.mrb[2].mxu1 }
 0x12e   : > { %773 = vrot.lane.b32.xlu1 %v3947_v12, %s3629_s10  ;;  %581 = vperm.xlu0 %3526, %v3955_v22   ;;  %v3964_v39 = vpop.f32.mrb[3].mxu0  ;;  %v3966_v44 = vpop.f32.mrb[3].mxu1 }
 0x131   : > { %v3968_v46 = vpop.f32.mrb[4].mxu0  ;;  %v3970_v47 = vpop.f32.mrb[4].mxu1 }
 0x132   : > { %789 = vrot.lane.b32.xlu1 %v3949_v14, %s3629_s10  ;;  %621 = vperm.xlu0 %3526, %v3952_v18   ;;  %v3975_v48 = vpop.f32.mrb[5].mxu0  ;;  %v3977_v49 = vpop.f32.mrb[5].mxu1 }
 0x135   : > { %v3979_v50 = vpop.f32.mrb[6].mxu0  ;;  %v3981_v52 = vpop.f32.mrb[6].mxu1 }
 0x136   : > { %1301 = vrot.lane.b32.xlu1 %v3947_v12, %s3630_s11  ;;  %771 = vrot.lane.b32.xlu0 %v3955_v22, %s3629_s10  ;;  %v3987_v53 = vpop.f32.mrb[7].mxu0  ;;  %v3989_v54 = vpop.f32.mrb[7].mxu1 }
 0x13a   : > { %787 = vrot.lane.b32.xlu0 %v3952_v18, %s3629_s10  ;;  %596 = vperm.xlu1 %3527, %v3957_v27  }
 0x13e   : > { %1299 = vrot.lane.b32.xlu0 %v3955_v22, %s3630_s11  ;;  %636 = vperm.xlu1 %3527, %v3959_v35  }
 0x142   : > { %631 = vperm.xlu0 %3526, %v3966_v44   ;;  %777 = vrot.lane.b32.xlu1 %v3957_v27, %s3629_s10 }
 0x146   : > { %793 = vrot.lane.b32.xlu1 %v3959_v35, %s3629_s10  ;;  %775 = vrot.lane.b32.xlu0 %v3964_v39, %s3629_s10 }
 0x14a   : > { %1305 = vrot.lane.b32.xlu1 %v3957_v27, %s3630_s11  ;;  %791 = vrot.lane.b32.xlu0 %v3966_v44, %s3629_s10 }
 0x14e   : > { %1303 = vrot.lane.b32.xlu0 %v3964_v39, %s3630_s11  ;;  %591 = vperm.xlu1 %3527, %v3964_v39  }
 0x152   : > { %606 = vperm.xlu1 %3527, %v3968_v46   ;;  %601 = vperm.xlu0 %3526, %v3975_v48  }
 0x156   : > { %646 = vperm.xlu1 %3527, %v3970_v47   ;;  %641 = vperm.xlu0 %3526, %v3977_v49  }
 0x15a   : > { %781 = vrot.lane.b32.xlu1 %v3968_v46, %s3629_s10  ;;  %779 = vrot.lane.b32.xlu0 %v3975_v48, %s3629_s10 }
 0x15e   : > { %797 = vrot.lane.b32.xlu1 %v3970_v47, %s3629_s10  ;;  %795 = vrot.lane.b32.xlu0 %v3977_v49, %s3629_s10 }
 0x162   : > { %1309 = vrot.lane.b32.xlu1 %v3968_v46, %s3630_s11  ;;  %1307 = vrot.lane.b32.xlu0 %v3975_v48, %s3630_s11 }
 0x166   : > { %616 = vperm.xlu1 %3527, %v3979_v50   ;;  %611 = vperm.xlu0 %3526, %v3987_v53  }
 0x16a   : > { %656 = vperm.xlu1 %3527, %v3981_v52   ;;  %651 = vperm.xlu0 %3526, %v3989_v54  }
 0x16e   : > { %785 = vrot.lane.b32.xlu1 %v3979_v50, %s3629_s10  ;;  %783 = vrot.lane.b32.xlu0 %v3987_v53, %s3629_s10 }
 0x172   : > { %801 = vrot.lane.b32.xlu1 %v3981_v52, %s3629_s10  ;;  %799 = vrot.lane.b32.xlu0 %v3989_v54, %s3629_s10 }
 0x176   : > { %1313 = vrot.lane.b32.xlu1 %v3979_v50, %s3630_s11  ;;  %1311 = vrot.lane.b32.xlu0 %v3987_v53, %s3630_s11 }
 0x1a9   : > { %v4043_v55 = vpop.permute.xlu1 %626  ;;  %v4045_v57 = vpop.permute.xlu0 %586 }
 0x1ad   : > { %v774_v59 = vpop.permute.xlu1 %773  ;;  %v4048_v60 = vpop.permute.xlu0 %581 }
 0x1ae   : > { %v820_v61 = vmul.f32 %v774_v59, %v756_v58 }
 0x1b0   : > { %853 = vrot.lane.b32.xlu1 %v820_v61, %s3631_s12 }
 0x1b1   : > { %v790_v0 = vpop.permute.xlu1 %789  ;;  %v4052_v1 = vpop.permute.xlu0 %621 }
 0x1b2   : > { %v828_v2 = vmul.f32 %v790_v0, %v764_v63  ;;  %v758_v0 = vmul.f32 2.0, %v3749_v20 }
 0x1b4   : > { %869 = vrot.lane.b32.xlu1 %v828_v2, %s3631_s12 }
 0x1b5   : > { %v4056_v6 = vpop.permute.xlu1 %1301  ;;  %v772_v7 = vpop.permute.xlu0 %771 }
 0x1b6   : > { %v819_v8 = vmul.f32 %v772_v7, %v755_v5  ;;  %v766_v7 = vmul.f32 2.0, %v3792_v32 }
 0x1b8   : > { %851 = vrot.lane.b32.xlu0 %v819_v8, %s3631_s12  ;;  %v757_v8 = vmul.f32 2.0, %v3744_v19 }
 0x1b9   : > { %v788_v11 = vpop.permute.xlu0 %787  ;;  %v4060_v58 = vpop.permute.xlu1 %596 }
 0x1ba   : > { %v827_v59 = vmul.f32 %v788_v11, %v763_v10 }
 0x1bc   : > { %867 = vrot.lane.b32.xlu0 %v827_v59, %s3631_s12 }
 0x1bd   : > { %v4063_v61 = vpop.permute.xlu0 %1299  ;;  %v4065_v63 = vpop.permute.xlu1 %636 }
 0x1c1   : > { %v4068_v2 = vpop.permute.xlu0 %631  ;;  %v778_v43 = vpop.permute.xlu1 %777 }
 0x1c2   : > { %v822_v5 = vmul.f32 %v778_v43, %v758_v0 }
 0x1c4   : > { %857 = vrot.lane.b32.xlu1 %v822_v5, %s3631_s12 }
 0x1c5   : > { %v794_v62 = vpop.permute.xlu1 %793  ;;  %v776_v10 = vpop.permute.xlu0 %775 }
 0x1c6   : > { %v830_v11 = vmul.f32 %v794_v62, %v766_v7  ;;  %v821_v59 = vmul.f32 %v776_v10, %v757_v8  ;;  %v760_v10 = vmul.f32 2.0, %v3762_v24 }
 0x1c8   : > { %873 = vrot.lane.b32.xlu1 %v830_v11, %s3631_s12  ;;  %855 = vrot.lane.b32.xlu0 %v821_v59, %s3631_s12  ;;  %v759_v11 = vmul.f32 2.0, %v3754_v21 }
 0x1c9   : > { %v4076_v56 = vpop.permute.xlu1 %1305  ;;  %v792_v41 = vpop.permute.xlu0 %791 }
 0x1ca   : > { %5452 = vst [vmem:[#allocation22_spill] sm:$0xff] %v4076_v56  ;;  %v829_v43 = vmul.f32 %v792_v41, %v765_v42 }
 0x1cc   : > { %871 = vrot.lane.b32.xlu0 %v829_v43, %s3631_s12 }
 0x1cd   : > { %v4079_v0 = vpop.permute.xlu0 %1303  ;;  %v4081_v51 = vpop.permute.xlu1 %591 }
 0x1ce   : > { %5453 = vst [vmem:[#allocation23_spill] sm:$0xff] %v4079_v0 }
 0x1d1   : > { %v4083_v5 = vpop.permute.xlu1 %606  ;;  %v4085_v62 = vpop.permute.xlu0 %601 }
 0x1d5   : > { %v4087_v7 = vpop.permute.xlu1 %646  ;;  %v4089_v8 = vpop.permute.xlu0 %641 }
 0x1d9   : > { %v782_v59 = vpop.permute.xlu1 %781  ;;  %v780_v41 = vpop.permute.xlu0 %779 }
 0x1da   : > { %v824_v42 = vmul.f32 %v782_v59, %v760_v10  ;;  %v823_v43 = vmul.f32 %v780_v41, %v759_v11 }
 0x1dc   : > { %861 = vrot.lane.b32.xlu1 %v824_v42, %s3631_s12  ;;  %859 = vrot.lane.b32.xlu0 %v823_v43, %s3631_s12  ;;  %v762_v43 = vmul.f32 2.0, %v3772_v26 }
 0x1dd   : > { %v798_v31 = vpop.permute.xlu1 %797  ;;  %v796_v40 = vpop.permute.xlu0 %795 }
 0x1de   : > { %v832_v17 = vmul.f32 %v798_v31, %v768_v36  ;;  %v831_v23 = vmul.f32 %v796_v40, %v767_v45  ;;  %v761_v40 = vmul.f32 2.0, %v3767_v25  ;;  %v770_v36 = vmul.f32 2.0, %v3815_v38 }
 0x1e0   : > { %877 = vrot.lane.b32.xlu1 %v832_v17, %s3631_s12  ;;  %875 = vrot.lane.b32.xlu0 %v831_v23, %s3631_s12 }
 0x1e1   : > { %v4099_v9 = vpop.permute.xlu1 %1309  ;;  %v4101_v10 = vpop.permute.xlu0 %1307 }
 0x1e2   : > { %5454 = vst [vmem:[#allocation24_spill] sm:$0xff] %v4099_v9  ;;  %5455 = vst [vmem:[#allocation25_spill] sm:$0xff] %v4101_v10 }
 0x1e5   : > { %v4103_v11 = vpop.permute.xlu1 %616  ;;  %v4105_v59 = vpop.permute.xlu0 %611 }
 0x1e9   : > { %v4107_v41 = vpop.permute.xlu1 %656  ;;  %v4109_v42 = vpop.permute.xlu0 %651 }
 0x1ed   : > { %v786_v45 = vpop.permute.xlu1 %785  ;;  %v784_v17 = vpop.permute.xlu0 %783 }
 0x1ee   : > { %v826_v31 = vmul.f32 %v786_v45, %v762_v43  ;;  %v825_v23 = vmul.f32 %v784_v17, %v761_v40  ;;  %v660_v43 = vmul.f32 %v4045_v57, %v3736_v16  ;;  %v659_v40 = vmul.f32 %v4048_v60, %v3731_v15 }
 0x1ef   : > { %v668_v45 = vmul.f32 %v4043_v55, %v3782_v29 }
 0x1f0   : > { %865 = vrot.lane.b32.xlu1 %v826_v31, %s3631_s12  ;;  %863 = vrot.lane.b32.xlu0 %v825_v23, %s3631_s12  ;;  %v923_v31 = vmul.f32 %v3777_v28, %v3777_v28 }
 0x1f1   : > { %v802_v4 = vpop.permute.xlu1 %801  ;;  %v800_v3 = vpop.permute.xlu0 %799 }
 0x1f2   : > { %v834_v10 = vmul.f32 %v802_v4, %v770_v36  ;;  %v833_v9 = vmul.f32 %v800_v3, %v769_v13  ;;  %v916_v3 = vmul.f32 %v3736_v16, %v3736_v16  ;;  %v915_v13 = vmul.f32 %v3731_v15, %v3731_v15 }
 0x1f3   : > { %v667_v4 = vmul.f32 %v4052_v1, %v3777_v28  ;;  %v939_v36 = vmul.f32 %v923_v31, %v4052_v1  ;;  %v669_v1 = vmul.f32 %v4068_v2, %v3787_v30  ;;  %v671_v31 = vmul.f32 %v4089_v8, %v3797_v33 }
 0x1f4   : > { %881 = vrot.lane.b32.xlu1 %v834_v10, %s3631_s12  ;;  %879 = vrot.lane.b32.xlu0 %v833_v9, %s3631_s12  ;;  %v924_v9 = vmul.f32 %v3782_v29, %v3782_v29  ;;  %v932_v10 = vmul.f32 %v916_v3, %v4045_v57  ;;  %v931_v17 = vmul.f32 %v915_v13, %v4048_v60 }
 0x1f5   : > { %v662_v57 = vmul.f32 %v4060_v58, %v3749_v20  ;;  %v661_v60 = vmul.f32 %v4081_v51, %v3744_v19  ;;  %v926_v3 = vmul.f32 %v3792_v32, %v3792_v32  ;;  %v925_v13 = vmul.f32 %v3787_v30, %v3787_v30 }
 0x1f6   : > { %v940_v23 = vmul.f32 %v924_v9, %v4043_v55  ;;  %v670_v55 = vmul.f32 %v4065_v63, %v3792_v32 }
 0x1f7   : > { %v942_v9 = vmul.f32 %v926_v3, %v4065_v63  ;;  %v919_v63 = vmul.f32 %v3754_v21, %v3754_v21 }
 0x1f8   : > { %693 = vrot.lane.b32.xlu1 %v660_v43, %s3632_s13  ;;  %691 = vrot.lane.b32.xlu0 %v659_v40, %s3632_s13  ;;  %v918_v43 = vmul.f32 %v3749_v20, %v3749_v20  ;;  %v917_v40 = vmul.f32 %v3744_v19, %v3744_v19 }
 0x1fc   : > { %709 = vrot.lane.b32.xlu1 %v668_v45, %s3632_s13  ;;  %707 = vrot.lane.b32.xlu0 %v667_v4, %s3632_s13  ;;  %v934_v45 = vmul.f32 %v918_v43, %v4060_v58  ;;  %v933_v4 = vmul.f32 %v917_v40, %v4081_v51  ;;  %v664_v58 = vmul.f32 %v4083_v5, %v3762_v24 }
 0x1fd   : > { %v920_v51 = vmul.f32 %v3762_v24, %v3762_v24  ;;  %v673_v40 = vmul.f32 %v4109_v42, %v3810_v37 }
 0x200   : > { %965 = vrot.lane.b32.xlu1 %v932_v10, %s3631_s12  ;;  %963 = vrot.lane.b32.xlu0 %v931_v17, %s3631_s12  ;;  %v941_v10 = vmul.f32 %v925_v13, %v4068_v2  ;;  %v663_v17 = vmul.f32 %v4085_v62, %v3754_v21  ;;  %v672_v2 = vmul.f32 %v4087_v7, %v3802_v34 }
 0x201   : > { %v930_v13 = vmul.f32 %v3815_v38, %v3815_v38 }
 0x204   : > { %981 = vrot.lane.b32.xlu1 %v940_v23, %s3631_s12  ;;  %979 = vrot.lane.b32.xlu0 %v939_v36, %s3631_s12  ;;  %v936_v23 = vmul.f32 %v920_v51, %v4083_v5  ;;  %v935_v36 = vmul.f32 %v919_v63, %v4085_v62  ;;  %v666_v5 = vmul.f32 %v4103_v11, %v3772_v26 }
 0x205   : > { %v665_v62 = vmul.f32 %v4105_v59, %v3767_v25 }
 0x208   : > { %697 = vrot.lane.b32.xlu1 %v662_v57, %s3632_s13  ;;  %695 = vrot.lane.b32.xlu0 %v661_v60, %s3632_s13  ;;  %v928_v57 = vmul.f32 %v3802_v34, %v3802_v34  ;;  %v927_v60 = vmul.f32 %v3797_v33, %v3797_v33 }
 0x20a   : > { %v944_v43 = vmul.f32 %v928_v57, %v4087_v7  ;;  %v921_v7 = vmul.f32 %v3767_v25, %v3767_v25 }
 0x20c   : > { %713 = vrot.lane.b32.xlu1 %v670_v55, %s3632_s13  ;;  %711 = vrot.lane.b32.xlu0 %v669_v1, %s3632_s13  ;;  %v943_v55 = vmul.f32 %v927_v60, %v4089_v8  ;;  %v922_v1 = vmul.f32 %v3772_v26, %v3772_v26  ;;  %v674_v8 = vmul.f32 %v4107_v41, %v3815_v38 }
 0x20d   : > { %v937_v3 = vmul.f32 %v921_v7, %v4105_v59  ;;  %v4233_v59 = vpop.permute.xlu0 %1311 }
 0x20e   : > { %5457 = vst [vmem:[#allocation27_spill] sm:$0xff] %v4233_v59 }
 0x210   : > { %969 = vrot.lane.b32.xlu1 %v934_v45, %s3631_s12  ;;  %967 = vrot.lane.b32.xlu0 %v933_v4, %s3631_s12  ;;  %v938_v45 = vmul.f32 %v922_v1, %v4103_v11  ;;  %v929_v4 = vmul.f32 %v3810_v37, %v3810_v37  ;;  %v4231_v11 = vpop.permute.xlu1 %1313 }
 0x211   : > { %5456 = vst [vmem:[#allocation26_spill] sm:$0xff] %v4231_v11 }
 0x214   : > { %985 = vrot.lane.b32.xlu1 %v942_v9, %s3631_s12  ;;  %983 = vrot.lane.b32.xlu0 %v941_v10, %s3631_s12  ;;  %v946_v9 = vmul.f32 %v930_v13, %v4107_v41  ;;  %v945_v10 = vmul.f32 %v929_v4, %v4109_v42 }
 0x218   : > { %701 = vrot.lane.b32.xlu1 %v664_v58, %s3632_s13  ;;  %699 = vrot.lane.b32.xlu0 %v663_v17, %s3632_s13 }
 0x21c   : > { %717 = vrot.lane.b32.xlu1 %v672_v2, %s3632_s13  ;;  %715 = vrot.lane.b32.xlu0 %v671_v31, %s3632_s13 }
 0x220   : > { %973 = vrot.lane.b32.xlu1 %v936_v23, %s3631_s12  ;;  %971 = vrot.lane.b32.xlu0 %v935_v36, %s3631_s12 }
 0x222   : > { %v854_v58 = vpop.permute.xlu1 %853 }
 0x224   : > { %989 = vrot.lane.b32.xlu1 %v944_v43, %s3631_s12  ;;  %987 = vrot.lane.b32.xlu0 %v943_v55, %s3631_s12 }
 0x226   : > { %v870_v51 = vpop.permute.xlu1 %869 }
 0x228   : > { %705 = vrot.lane.b32.xlu1 %v666_v5, %s3632_s13  ;;  %703 = vrot.lane.b32.xlu0 %v665_v62, %s3632_s13 }
 0x22a   : > { %v852_v17 = vpop.permute.xlu0 %851 }
 0x22c   : > { %721 = vrot.lane.b32.xlu1 %v674_v8, %s3632_s13  ;;  %719 = vrot.lane.b32.xlu0 %v673_v40, %s3632_s13 }
 0x22e   : > { %v868_v63 = vpop.permute.xlu0 %867 }
 0x22f   : > { %v907_v56 = vsub.f32 %v3952_v18, %v868_v63 }
 0x230   : > { %977 = vrot.lane.b32.xlu1 %v938_v45, %s3631_s12  ;;  %975 = vrot.lane.b32.xlu0 %v937_v3, %s3631_s12 }
 0x234   : > { %993 = vrot.lane.b32.xlu1 %v946_v9, %s3631_s12  ;;  %991 = vrot.lane.b32.xlu0 %v945_v10, %s3631_s12 }
 0x236   : > { %v4235_v2 = vpop.permute.xlu1 %857 }
 0x23a   : > { %v4237_v31 = vpop.permute.xlu0 %855  ;;  %v4239_v23 = vpop.permute.xlu1 %873 }
 0x23e   : > { %v4241_v41 = vpop.permute.xlu0 %871 }
 0x24e   : > { %v4243_v42 = vpop.permute.xlu1 %861  ;;  %v4245_v36 = vpop.permute.xlu0 %859 }
 0x252   : > { %v4247_v57 = vpop.permute.xlu1 %877  ;;  %v4249_v60 = vpop.permute.xlu0 %875 }
 0x262   : > { %v4251_v43 = vpop.permute.xlu1 %865  ;;  %v4253_v55 = vpop.permute.xlu0 %863 }
 0x266   : > { %v4255_v5 = vpop.permute.xlu1 %881  ;;  %v4257_v62 = vpop.permute.xlu0 %879 }
 0x26a   : > { %v694_v1 = vpop.permute.xlu1 %693  ;;  %v692_v7 = vpop.permute.xlu0 %691 }
 0x26b   : > { %v740_v8 = vsub.f32 %v3947_v12, %v694_v1  ;;  %v739_v40 = vsub.f32 %v3955_v22, %v692_v7  ;;  %v900_v1 = vsub.f32 %v3947_v12, %v854_v58  ;;  %v899_v7 = vsub.f32 %v3955_v22, %v852_v17 }
 0x26d   : > { %1061 = vrot.lane.b32.xlu1 %v740_v8, %s3629_s10  ;;  %1059 = vrot.lane.b32.xlu0 %v739_v40, %s3629_s10 }
 0x26e   : > { %v710_v45 = vpop.permute.xlu1 %709  ;;  %v708_v3 = vpop.permute.xlu0 %707 }
 0x26f   : > { %v748_v13 = vsub.f32 %v3949_v14, %v710_v45  ;;  %v747_v4 = vsub.f32 %v3952_v18, %v708_v3  ;;  %v908_v3 = vsub.f32 %v3949_v14, %v870_v51 }
 0x271   : > { %1077 = vrot.lane.b32.xlu1 %v748_v13, %s3629_s10  ;;  %1075 = vrot.lane.b32.xlu0 %v747_v4, %s3629_s10 }
 0x272   : > { %v966_v9 = vpop.permute.xlu1 %965  ;;  %v964_v10 = vpop.permute.xlu0 %963 }
 0x273   : > { %v1012_v59 = vadd.f32 %v966_v9, %v900_v1  ;;  %v1011_v11 = vadd.f32 %v964_v10, %v899_v7  ;;  %v902_v1 = vsub.f32 %v3957_v27, %v4235_v2  ;;  %v901_v7 = vsub.f32 %v3964_v39, %v4237_v31 }
 0x275   : > { %1189 = vrot.lane.b32.xlu1 %v740_v8, %s3633_s14  ;;  %1187 = vrot.lane.b32.xlu0 %v739_v40, %s3633_s14  ;;  %v1028_v12 = vmul.f32 0.5, %v1012_v59  ;;  %v1027_v58 = vmul.f32 0.5, %v1011_v11 }
 0x276   : > { %v982_v45 = vpop.permute.xlu1 %981  ;;  %v980_v0 = vpop.permute.xlu0 %979 }
 0x277   : > { %v1020_v22 = vadd.f32 %v982_v45, %v908_v3  ;;  %v1019_v17 = vadd.f32 %v980_v0, %v907_v56 }
 0x279   : > { %1205 = vrot.lane.b32.xlu1 %v748_v13, %s3633_s14  ;;  %1203 = vrot.lane.b32.xlu0 %v747_v4, %s3633_s14  ;;  %v1036_v9 = vmul.f32 0.5, %v1020_v22  ;;  %v1035_v10 = vmul.f32 0.5, %v1019_v17  ;;  %v910_v22 = vsub.f32 %v3959_v35, %v4239_v23  ;;  %v909_v17 = vsub.f32 %v3966_v44, %v4241_v41 }
 0x27a   : > { %v698_v8 = vpop.permute.xlu1 %697  ;;  %v696_v40 = vpop.permute.xlu0 %695 }
 0x27b   : > { %v742_v51 = vsub.f32 %v3957_v27, %v698_v8  ;;  %v741_v59 = vsub.f32 %v3964_v39, %v696_v40 }
 0x27d   : > { %1141 = vrot.lane.b32.xlu1 %v1028_v12, %s3634_s15  ;;  %1139 = vrot.lane.b32.xlu0 %v1027_v58, %s3634_s15 }
 0x27e   : > { %v714_v11 = vpop.permute.xlu1 %713  ;;  %v712_v63 = vpop.permute.xlu0 %711 }
 0x27f   : > { %v750_v56 = vsub.f32 %v3959_v35, %v714_v11  ;;  %v749_v0 = vsub.f32 %v3966_v44, %v712_v63 }
 0x281   : > { %1157 = vrot.lane.b32.xlu1 %v1036_v9, %s3634_s15  ;;  %1155 = vrot.lane.b32.xlu0 %v1035_v10, %s3634_s15 }
 0x282   : > { %v970_v13 = vpop.permute.xlu1 %969  ;;  %v968_v4 = vpop.permute.xlu0 %967 }
 0x283   : > { %v1014_v45 = vadd.f32 %v970_v13, %v902_v1  ;;  %v1013_v3 = vadd.f32 %v968_v4, %v901_v7  ;;  %v904_v13 = vsub.f32 %v3968_v46, %v4243_v42  ;;  %v903_v4 = vsub.f32 %v3975_v48, %v4245_v36 }
 0x285   : > { %1065 = vrot.lane.b32.xlu1 %v742_v51, %s3629_s10  ;;  %1063 = vrot.lane.b32.xlu0 %v741_v59, %s3629_s10  ;;  %v1030_v27 = vmul.f32 0.5, %v1014_v45  ;;  %v1029_v39 = vmul.f32 0.5, %v1013_v3 }
 0x286   : > { %v986_v12 = vpop.permute.xlu1 %985  ;;  %v984_v58 = vpop.permute.xlu0 %983 }
 0x287   : > { %v1022_v2 = vadd.f32 %v986_v12, %v910_v22  ;;  %v1021_v31 = vadd.f32 %v984_v58, %v909_v17  ;;  %v912_v12 = vsub.f32 %v3970_v47, %v4247_v57  ;;  %v911_v58 = vsub.f32 %v3977_v49, %v4249_v60 }
 0x289   : > { %1081 = vrot.lane.b32.xlu1 %v750_v56, %s3629_s10  ;;  %1079 = vrot.lane.b32.xlu0 %v749_v0, %s3629_s10  ;;  %v1038_v9 = vmul.f32 0.5, %v1022_v2  ;;  %v1037_v10 = vmul.f32 0.5, %v1021_v31 }
 0x28a   : > { %v702_v8 = vpop.permute.xlu1 %701  ;;  %v700_v40 = vpop.permute.xlu0 %699 }
 0x28b   : > { %v744_v23 = vsub.f32 %v3968_v46, %v702_v8  ;;  %v743_v41 = vsub.f32 %v3975_v48, %v700_v40 }
 0x28d   : > { %1193 = vrot.lane.b32.xlu1 %v742_v51, %s3633_s14  ;;  %1191 = vrot.lane.b32.xlu0 %v741_v59, %s3633_s14 }
 0x28e   : > { %v718_v51 = vpop.permute.xlu1 %717  ;;  %v716_v59 = vpop.permute.xlu0 %715 }
 0x28f   : > { %v752_v11 = vsub.f32 %v3970_v47, %v718_v51  ;;  %v751_v63 = vsub.f32 %v3977_v49, %v716_v59  ;;  %v913_v59 = vsub.f32 %v3989_v54, %v4257_v62 }
 0x291   : > { %1209 = vrot.lane.b32.xlu1 %v750_v56, %s3633_s14  ;;  %1207 = vrot.lane.b32.xlu0 %v749_v0, %s3633_s14 }
 0x292   : > { %v974_v56 = vpop.permute.xlu1 %973  ;;  %v972_v0 = vpop.permute.xlu0 %971 }
 0x293   : > { %v1016_v1 = vadd.f32 %v974_v56, %v904_v13  ;;  %v1015_v7 = vadd.f32 %v972_v0, %v903_v4 }
 0x295   : > { %1145 = vrot.lane.b32.xlu1 %v1030_v27, %s3634_s15  ;;  %1143 = vrot.lane.b32.xlu0 %v1029_v39, %s3634_s15  ;;  %v1032_v46 = vmul.f32 0.5, %v1016_v1  ;;  %v1031_v48 = vmul.f32 0.5, %v1015_v7 }
 0x296   : > { %v990_v45 = vpop.permute.xlu1 %989  ;;  %v988_v3 = vpop.permute.xlu0 %987 }
 0x297   : > { %v1024_v42 = vadd.f32 %v990_v45, %v912_v12  ;;  %v1023_v36 = vadd.f32 %v988_v3, %v911_v58 }
 0x299   : > { %1161 = vrot.lane.b32.xlu1 %v1038_v9, %s3634_s15  ;;  %1159 = vrot.lane.b32.xlu0 %v1037_v10, %s3634_s15  ;;  %v1040_v27 = vmul.f32 0.5, %v1024_v42  ;;  %v1039_v39 = vmul.f32 0.5, %v1023_v36 }
 0x29a   : > { %v706_v22 = vpop.permute.xlu1 %705  ;;  %v704_v17 = vpop.permute.xlu0 %703 }
 0x29b   : > { %v746_v57 = vsub.f32 %v3979_v50, %v706_v22  ;;  %v745_v60 = vsub.f32 %v3987_v53, %v704_v17 }
 0x29d   : > { %1069 = vrot.lane.b32.xlu1 %v744_v23, %s3629_s10  ;;  %1067 = vrot.lane.b32.xlu0 %v743_v41, %s3629_s10 }
 0x29e   : > { %v722_v2 = vpop.permute.xlu1 %721  ;;  %v720_v31 = vpop.permute.xlu0 %719 }
 0x29f   : > { %v754_v8 = vsub.f32 %v3981_v52, %v722_v2  ;;  %v753_v40 = vsub.f32 %v3989_v54, %v720_v31 }
 0x2a1   : > { %1085 = vrot.lane.b32.xlu1 %v752_v11, %s3629_s10  ;;  %1083 = vrot.lane.b32.xlu0 %v751_v63, %s3629_s10 }
 0x2a2   : > { %v978_v9 = vpop.permute.xlu1 %977  ;;  %v976_v10 = vpop.permute.xlu0 %975 }
 0x2a5   : > { %1197 = vrot.lane.b32.xlu1 %v744_v23, %s3633_s14  ;;  %1195 = vrot.lane.b32.xlu0 %v743_v41, %s3633_s14  ;;  %v906_v23 = vsub.f32 %v3979_v50, %v4251_v43  ;;  %v905_v41 = vsub.f32 %v3987_v53, %v4253_v55 }
 0x2a6   : > { %v994_v51 = vpop.permute.xlu1 %993 }
 0x2a9   : > { %1213 = vrot.lane.b32.xlu1 %v752_v11, %s3633_s14  ;;  %1211 = vrot.lane.b32.xlu0 %v751_v63, %s3633_s14 }
 0x2ad   : > { %1149 = vrot.lane.b32.xlu1 %v1032_v46, %s3634_s15  ;;  %1147 = vrot.lane.b32.xlu0 %v1031_v48, %s3634_s15 }
 0x2b1   : > { %1165 = vrot.lane.b32.xlu1 %v1040_v27, %s3634_s15  ;;  %1163 = vrot.lane.b32.xlu0 %v1039_v39, %s3634_s15 }
 0x2b5   : > { %1073 = vrot.lane.b32.xlu1 %v746_v57, %s3629_s10  ;;  %1071 = vrot.lane.b32.xlu0 %v745_v60, %s3629_s10 }
 0x2b9   : > { %1089 = vrot.lane.b32.xlu1 %v754_v8, %s3629_s10  ;;  %1087 = vrot.lane.b32.xlu0 %v753_v40, %s3629_s10 }
 0x2bd   : > { %1201 = vrot.lane.b32.xlu1 %v746_v57, %s3633_s14  ;;  %1315 = vrot.lane.b32.xlu0 %v3952_v18, %s3630_s11  ;;  %v1018_v18 = vadd.f32 %v978_v9, %v906_v23 }
 0x2bf   : > { %v1034_v50 = vmul.f32 0.5, %v1018_v18 }
 0x2c1   : > { %1217 = vrot.lane.b32.xlu1 %v754_v8, %s3633_s14  ;;  %1319 = vrot.lane.b32.xlu0 %v3966_v44, %s3630_s11  ;;  %v1017_v44 = vadd.f32 %v976_v10, %v905_v41 }
 0x2c3   : > { %v1033_v53 = vmul.f32 0.5, %v1017_v44 }
 0x2c5   : > { %1317 = vrot.lane.b32.xlu1 %v3949_v14, %s3630_s11  ;;  %1323 = vrot.lane.b32.xlu0 %v3977_v49, %s3630_s11  ;;  %v992_v14 = vpop.permute.xlu0 %991  ;;  %v914_v49 = vsub.f32 %v3981_v52, %v4255_v5 }
 0x2c6   : > { %v1025_v43 = vadd.f32 %v992_v14, %v913_v59 }
 0x2c8   : > { %v1041_v11 = vmul.f32 0.5, %v1025_v43 }
 0x2c9   : > { %1321 = vrot.lane.b32.xlu1 %v3959_v35, %s3630_s11  ;;  %1199 = vrot.lane.b32.xlu0 %v745_v60, %s3633_s14  ;;  %v1026_v35 = vadd.f32 %v994_v51, %v914_v49 }
 0x2cb   : > { %v1042_v55 = vmul.f32 0.5, %v1026_v35 }
 0x2cd   : > { %1325 = vrot.lane.b32.xlu1 %v3970_v47, %s3630_s11  ;;  %1215 = vrot.lane.b32.xlu0 %v753_v40, %s3633_s14 }
 0x2d1   : > { %1153 = vrot.lane.b32.xlu1 %v1034_v50, %s3634_s15  ;;  %1151 = vrot.lane.b32.xlu0 %v1033_v53, %s3634_s15 }
 0x2d5   : > { %1169 = vrot.lane.b32.xlu1 %v1042_v55, %s3634_s15  ;;  %1167 = vrot.lane.b32.xlu0 %v1041_v11, %s3634_s15 }
 0x2df   : > { %v1062_v5 = vpop.permute.xlu1 %1061  ;;  %v1060_v62 = vpop.permute.xlu0 %1059 }
 0x2e0   : > { %v1108_v47 = vmul.f32 %v1062_v5, %v3736_v16  ;;  %v1107_v63 = vmul.f32 %v1060_v62, %v3731_v15 }
 0x2e2   : > { %1253 = vrot.lane.b32.xlu1 %v1108_v47, %s3635_s16  ;;  %1251 = vrot.lane.b32.xlu0 %v1107_v63, %s3635_s16 }
 0x2e3   : > { %v1078_v56 = vpop.permute.xlu1 %1077  ;;  %v1076_v0 = vpop.permute.xlu0 %1075 }
 0x2e4   : > { %v1116_v13 = vmul.f32 %v1078_v56, %v3782_v29  ;;  %v1115_v4 = vmul.f32 %v1076_v0, %v3777_v28 }
 0x2e6   : > { %1269 = vrot.lane.b32.xlu1 %v1116_v13, %s3635_s16  ;;  %1267 = vrot.lane.b32.xlu0 %v1115_v4, %s3635_s16 }
 0x2e7   : > { %v1190_v1 = vpop.permute.xlu1 %1189  ;;  %v1188_v7 = vpop.permute.xlu0 %1187 }
 0x2eb   : > { %v1206_v45 = vpop.permute.xlu1 %1205  ;;  %v1204_v3 = vpop.permute.xlu0 %1203 }
 0x2ef   : > { %v1142_v12 = vpop.permute.xlu1 %1141  ;;  %v1140_v58 = vpop.permute.xlu0 %1139 }
 0x2f0   : > { %v4372_v46 = vsel %vm1347_vm0, %v1142_v12, %v1190_v1  ;;  %v4375_v48 = vsel %vm1347_vm0, %v1140_v58, %v1188_v7 }
 0x2f3   : > { %v1158_v42 = vpop.permute.xlu1 %1157  ;;  %v1156_v36 = vpop.permute.xlu0 %1155 }
 0x2f4   : > { %v4378_v22 = vsel %vm1347_vm0, %v1158_v42, %v1206_v45  ;;  %v4381_v17 = vsel %vm1347_vm0, %v1156_v36, %v1204_v3 }
 0x2f7   : > { %v1066_v27 = vpop.permute.xlu1 %1065  ;;  %v1064_v39 = vpop.permute.xlu0 %1063 }
 0x2f8   : > { %v1110_v57 = vmul.f32 %v1066_v27, %v3749_v20  ;;  %v1109_v60 = vmul.f32 %v1064_v39, %v3744_v19 }
 0x2fa   : > { %1257 = vrot.lane.b32.xlu1 %v1110_v57, %s3635_s16  ;;  %1255 = vrot.lane.b32.xlu0 %v1109_v60, %s3635_s16 }
 0x2fb   : > { %v1082_v2 = vpop.permute.xlu1 %1081  ;;  %v1080_v31 = vpop.permute.xlu0 %1079 }
 0x2fc   : > { %v1118_v8 = vmul.f32 %v1082_v2, %v3792_v32  ;;  %v1117_v40 = vmul.f32 %v1080_v31, %v3787_v30 }
 0x2fe   : > { %1273 = vrot.lane.b32.xlu1 %v1118_v8, %s3635_s16  ;;  %1271 = vrot.lane.b32.xlu0 %v1117_v40, %s3635_s16 }
 0x2ff   : > { %v1194_v9 = vpop.permute.xlu1 %1193  ;;  %v1192_v10 = vpop.permute.xlu0 %1191 }
 0x303   : > { %v1210_v23 = vpop.permute.xlu1 %1209  ;;  %v1208_v41 = vpop.permute.xlu0 %1207 }
 0x307   : > { %v1146_v18 = vpop.permute.xlu1 %1145  ;;  %v1144_v44 = vpop.permute.xlu0 %1143 }
 0x308   : > { %v4392_v51 = vsel %vm1347_vm0, %v1146_v18, %v1194_v9  ;;  %v4395_v14 = vsel %vm1347_vm0, %v1144_v44, %v1192_v10 }
 0x30b   : > { %v1162_v49 = vpop.permute.xlu1 %1161  ;;  %v1160_v59 = vpop.permute.xlu0 %1159 }
 0x30c   : > { %v4398_v50 = vsel %vm1347_vm0, %v1162_v49, %v1210_v23  ;;  %v4401_v53 = vsel %vm1347_vm0, %v1160_v59, %v1208_v41 }
 0x30f   : > { %v1070_v35 = vpop.permute.xlu1 %1069  ;;  %v1068_v43 = vpop.permute.xlu0 %1067 }
 0x310   : > { %v1112_v55 = vmul.f32 %v1070_v35, %v3762_v24  ;;  %v1111_v11 = vmul.f32 %v1068_v43, %v3754_v21 }
 0x312   : > { %1261 = vrot.lane.b32.xlu1 %v1112_v55, %s3635_s16  ;;  %1259 = vrot.lane.b32.xlu0 %v1111_v11, %s3635_s16 }
 0x313   : > { %v1086_v5 = vpop.permute.xlu1 %1085  ;;  %v1084_v62 = vpop.permute.xlu0 %1083 }
 0x314   : > { %v1120_v47 = vmul.f32 %v1086_v5, %v3802_v34  ;;  %v1119_v63 = vmul.f32 %v1084_v62, %v3797_v33 }
 0x316   : > { %1277 = vrot.lane.b32.xlu1 %v1120_v47, %s3635_s16  ;;  %1275 = vrot.lane.b32.xlu0 %v1119_v63, %s3635_s16 }
 0x317   : > { %v1198_v56 = vpop.permute.xlu1 %1197  ;;  %v1196_v0 = vpop.permute.xlu0 %1195 }
 0x31b   : > { %v1214_v13 = vpop.permute.xlu1 %1213  ;;  %v1212_v4 = vpop.permute.xlu0 %1211 }
 0x31f   : > { %v1150_v1 = vpop.permute.xlu1 %1149  ;;  %v1148_v7 = vpop.permute.xlu0 %1147 }
 0x320   : > { %v4412_v45 = vsel %vm1347_vm0, %v1150_v1, %v1198_v56  ;;  %v4415_v3 = vsel %vm1347_vm0, %v1148_v7, %v1196_v0 }
 0x323   : > { %v1166_v12 = vpop.permute.xlu1 %1165  ;;  %v1164_v58 = vpop.permute.xlu0 %1163 }
 0x324   : > { %v4418_v42 = vsel %vm1347_vm0, %v1166_v12, %v1214_v13  ;;  %v4421_v36 = vsel %vm1347_vm0, %v1164_v58, %v1212_v4 }
 0x327   : > { %v1074_v27 = vpop.permute.xlu1 %1073  ;;  %v1072_v39 = vpop.permute.xlu0 %1071 }
 0x328   : > { %v1114_v57 = vmul.f32 %v1074_v27, %v3772_v26  ;;  %v1113_v60 = vmul.f32 %v1072_v39, %v3767_v25 }
 0x32a   : > { %1265 = vrot.lane.b32.xlu1 %v1114_v57, %s3635_s16  ;;  %1263 = vrot.lane.b32.xlu0 %v1113_v60, %s3635_s16 }
 0x32b   : > { %v1090_v2 = vpop.permute.xlu1 %1089  ;;  %v1088_v31 = vpop.permute.xlu0 %1087 }
 0x32c   : > { %v1122_v8 = vmul.f32 %v1090_v2, %v3815_v38  ;;  %v1121_v40 = vmul.f32 %v1088_v31, %v3810_v37 }
 0x32e   : > { %1281 = vrot.lane.b32.xlu1 %v1122_v8, %s3635_s16  ;;  %1279 = vrot.lane.b32.xlu0 %v1121_v40, %s3635_s16  ;;  %v5458_v8 = vld [vmem:[#allocation22_spill] sm:$0xff] }
 0x32f   : > { %v1202_v9 = vpop.permute.xlu1 %1201  ;;  %v1316_v10 = vpop.permute.xlu0 %1315 }
 0x332   : > { %1329 = vrot.lane.b32.xlu1 %v3981_v52, %s3630_s11  ;;  %1327 = vrot.lane.b32.xlu0 %v3989_v54, %s3630_s11 }
 0x333   : > { %v1218_v23 = vpop.permute.xlu1 %1217  ;;  %v1320_v41 = vpop.permute.xlu0 %1319 }
 0x337   : > { %v1318_v18 = vpop.permute.xlu1 %1317  ;;  %v4435_v44 = vpop.permute.xlu0 %1323 }
 0x33b   : > { %v1322_v49 = vpop.permute.xlu1 %1321  ;;  %v1200_v59 = vpop.permute.xlu0 %1199 }
 0x33f   : > { %v4437_v35 = vpop.permute.xlu1 %1325  ;;  %v1216_v43 = vpop.permute.xlu0 %1215 }
 0x343   : > { %v1154_v55 = vpop.permute.xlu1 %1153  ;;  %v1152_v11 = vpop.permute.xlu0 %1151 }
 0x344   : > { %v4440_v5 = vsel %vm1347_vm0, %v1154_v55, %v1202_v9  ;;  %v4443_v52 = vsel %vm1347_vm0, %v1152_v11, %v1200_v59  ;;  %v5459_v9 = vld [vmem:[#allocation23_spill] sm:$0xff] }
 0x347   : > { %v1170_v62 = vpop.permute.xlu1 %1169  ;;  %v1168_v54 = vpop.permute.xlu0 %1167 }
 0x348   : > { %v4446_v47 = vsel %vm1347_vm0, %v1170_v62, %v1218_v23  ;;  %v4449_v63 = vsel %vm1347_vm0, %v1168_v54, %v1216_v43 }
 0x354   : > { %v1254_v56 = vpop.permute.xlu1 %1253  ;;  %v1252_v0 = vpop.permute.xlu0 %1251 }
 0x355   : > { %v1366_v13 = vsel %vm1364_vm1, %v4372_v46, %v1254_v56  ;;  %v1365_v4 = vsel %vm1364_vm1, %v4375_v48, %v1252_v0 }
 0x356   : > { %v1383_v1 = vsel %vm1381_vm2, %v1366_v13, %v4056_v6  ;;  %v1382_v7 = vsel %vm1381_vm2, %v1365_v4, %v4063_v61  ;;  %v5460_v13 = vld [vmem:[#allocation24_spill] sm:$0xff] }
 0x357   : > { %v1400_v12 = vsel %vm1398_vm3, %v1383_v1, %v4056_v6  ;;  %v1399_v58 = vsel %vm1398_vm3, %v1382_v7, %v4063_v61  ;;  %v5461_v1 = vld [vmem:[#allocation25_spill] sm:$0xff] }
 0x358   : > { %1418 = vst.msk [vmem:[#allocation2 + $0x8] sm:$0xff] %vm1416_vm4, %v1400_v12  ;;  %1417 = vst.msk [vmem:[#allocation2] sm:$0xff] %vm1416_vm4, %v1399_v58  ;;  %v1270_v46 = vpop.permute.xlu1 %1269  ;;  %v1268_v27 = vpop.permute.xlu0 %1267 }
 0x359   : > { %v1374_v48 = vsel %vm1364_vm1, %v4378_v22, %v1270_v46  ;;  %v1373_v39 = vsel %vm1364_vm1, %v4381_v17, %v1268_v27 }
 0x35a   : > { %v1391_v57 = vsel %vm1381_vm2, %v1374_v48, %v1318_v18  ;;  %v1390_v60 = vsel %vm1381_vm2, %v1373_v39, %v1316_v10 }
 0x35b   : > { %v1408_v6 = vsel %vm1398_vm3, %v1391_v57, %v1318_v18  ;;  %v1407_v61 = vsel %vm1398_vm3, %v1390_v60, %v1316_v10 }
 0x35c   : > { %1426 = vst.msk [vmem:[#allocation2 + $0x48] sm:$0xff] %vm1416_vm4, %v1408_v6  ;;  %1425 = vst.msk [vmem:[#allocation2 + $0x40] sm:$0xff] %vm1416_vm4, %v1407_v61  ;;  %v5462_v6 = vld [vmem:[#allocation26_spill] sm:$0xff] }
 0x36c   : > { %v1258_v2 = vpop.permute.xlu1 %1257  ;;  %v1256_v31 = vpop.permute.xlu0 %1255 }
 0x36d   : > { %v1368_v22 = vsel %vm1364_vm1, %v4392_v51, %v1258_v2  ;;  %v1367_v17 = vsel %vm1364_vm1, %v4395_v14, %v1256_v31  ;;  %v5463_v2 = vld [vmem:[#allocation27_spill] sm:$0xff] }
 0x36e   : > { %v1385_v40 = vsel %vm1381_vm2, %v1368_v22, %v5458_v8  ;;  %v1384_v23 = vsel %vm1381_vm2, %v1367_v17, %v5459_v9 }
 0x36f   : > { %v1402_v10 = vsel %vm1398_vm3, %v1385_v40, %v5458_v8  ;;  %v1401_v18 = vsel %vm1398_vm3, %v1384_v23, %v5459_v9 }
 0x370   : > { %1420 = vst.msk [vmem:[#allocation2 + $0x18] sm:$0xff] %vm1416_vm4, %v1402_v10  ;;  %1419 = vst.msk [vmem:[#allocation2 + $0x10] sm:$0xff] %vm1416_vm4, %v1401_v18  ;;  %v1274_v51 = vpop.permute.xlu1 %1273  ;;  %v1272_v59 = vpop.permute.xlu0 %1271 }
 0x371   : > { %v1376_v14 = vsel %vm1364_vm1, %v4398_v50, %v1274_v51  ;;  %v1375_v43 = vsel %vm1364_vm1, %v4401_v53, %v1272_v59 }
 0x372   : > { %v1393_v55 = vsel %vm1381_vm2, %v1376_v14, %v1322_v49  ;;  %v1392_v11 = vsel %vm1381_vm2, %v1375_v43, %v1320_v41 }
 0x373   : > { %v1410_v62 = vsel %vm1398_vm3, %v1393_v55, %v1322_v49  ;;  %v1409_v54 = vsel %vm1398_vm3, %v1392_v11, %v1320_v41 }
 0x374   : > { %1428 = vst.msk [vmem:[#allocation2 + $0x58] sm:$0xff] %vm1416_vm4, %v1410_v62  ;;  %1427 = vst.msk [vmem:[#allocation2 + $0x50] sm:$0xff] %vm1416_vm4, %v1409_v54 }
 0x384   : > { %v1262_v56 = vpop.permute.xlu1 %1261  ;;  %v1260_v0 = vpop.permute.xlu0 %1259 }
 0x385   : > { %v1370_v50 = vsel %vm1364_vm1, %v4412_v45, %v1262_v56  ;;  %v1369_v53 = vsel %vm1364_vm1, %v4415_v3, %v1260_v0 }
 0x386   : > { %v1387_v4 = vsel %vm1381_vm2, %v1370_v50, %v5460_v13  ;;  %v1386_v49 = vsel %vm1381_vm2, %v1369_v53, %v5461_v1 }
 0x387   : > { %v1404_v41 = vsel %vm1398_vm3, %v1387_v4, %v5460_v13  ;;  %v1403_v7 = vsel %vm1398_vm3, %v1386_v49, %v5461_v1 }
 0x388   : > { %1422 = vst.msk [vmem:[#allocation2 + $0x28] sm:$0xff] %vm1416_vm4, %v1404_v41  ;;  %1421 = vst.msk [vmem:[#allocation2 + $0x20] sm:$0xff] %vm1416_vm4, %v1403_v7  ;;  %v1278_v45 = vpop.permute.xlu1 %1277  ;;  %v1276_v12 = vpop.permute.xlu0 %1275 }
 0x389   : > { %v1378_v3 = vsel %vm1364_vm1, %v4418_v42, %v1278_v45  ;;  %v1377_v58 = vsel %vm1364_vm1, %v4421_v36, %v1276_v12 }
 0x38a   : > { %v1395_v46 = vsel %vm1381_vm2, %v1378_v3, %v4437_v35  ;;  %v1394_v27 = vsel %vm1381_vm2, %v1377_v58, %v4435_v44 }
 0x38b   : > { %v1412_v48 = vsel %vm1398_vm3, %v1395_v46, %v4437_v35  ;;  %v1411_v39 = vsel %vm1398_vm3, %v1394_v27, %v4435_v44 }
 0x38c   : > { %1430 = vst.msk [vmem:[#allocation2 + $0x68] sm:$0xff] %vm1416_vm4, %v1412_v48  ;;  %1429 = vst.msk [vmem:[#allocation2 + $0x60] sm:$0xff] %vm1416_vm4, %v1411_v39 }
 0x39c   : > { %v1266_v42 = vpop.permute.xlu1 %1265  ;;  %v1264_v57 = vpop.permute.xlu0 %1263 }
 0x39d   : > { %v1372_v36 = vsel %vm1364_vm1, %v4440_v5, %v1266_v42  ;;  %v1371_v60 = vsel %vm1364_vm1, %v4443_v52, %v1264_v57 }
 0x39e   : > { %v1389_v61 = vsel %vm1381_vm2, %v1372_v36, %v5462_v6  ;;  %v1388_v35 = vsel %vm1381_vm2, %v1371_v60, %v5463_v2 }
 0x39f   : > { %v1406_v44 = vsel %vm1398_vm3, %v1389_v61, %v5462_v6  ;;  %v1405_v31 = vsel %vm1398_vm3, %v1388_v35, %v5463_v2 }
 0x3a0   : > { %1424 = vst.msk [vmem:[#allocation2 + $0x38] sm:$0xff] %vm1416_vm4, %v1406_v44  ;;  %1423 = vst.msk [vmem:[#allocation2 + $0x30] sm:$0xff] %vm1416_vm4, %v1405_v31  ;;  %v1282_v5 = vpop.permute.xlu1 %1281  ;;  %v1280_v22 = vpop.permute.xlu0 %1279 }
 0x3a1   : > { %v1380_v52 = vsel %vm1364_vm1, %v4446_v47, %v1282_v5  ;;  %v1379_v17 = vsel %vm1364_vm1, %v4449_v63, %v1280_v22 }
 0x3a4   : > { %v1330_v8 = vpop.permute.xlu1 %1329  ;;  %v1328_v40 = vpop.permute.xlu0 %1327 }
 0x3a5   : > { %v1397_v9 = vsel %vm1381_vm2, %v1380_v52, %v1330_v8  ;;  %v1396_v23 = vsel %vm1381_vm2, %v1379_v17, %v1328_v40 }
 0x3a6   : > { %v1414_v10 = vsel %vm1398_vm3, %v1397_v9, %v1330_v8  ;;  %v1413_v18 = vsel %vm1398_vm3, %v1396_v23, %v1328_v40 }
 0x3a7   : > { %1432 = vst.msk [vmem:[#allocation2 + $0x78] sm:$0xff] %vm1416_vm4, %v1414_v10  ;;  %1431 = vst.msk [vmem:[#allocation2 + $0x70] sm:$0xff] %vm1416_vm4, %v1413_v18 }
 0x3a8 PF: > { %p3128_p5 = scmp.ne.s32.totalorder %s3618_s18, 1 }
 0x3aa   : > { %1436 = sbr.rel (%p3128_p5) target bundleno = 2130 (0x852), region = 48 }
 0x3b1   : > { %v4552_v47 = vld [vmem:[#allocation2 + $0x10] sm:$0xff]  ;;  %v4554_v63 = vld [vmem:[#allocation2] sm:$0xff]  ;;  %v4556_v51 = vld [vmem:[#allocation2 + $0x8] sm:$0xff]  ;;  %v3636_v43 = vmov 9   ;;  %s3637_s18 = smov 121   ;;  %s3638_s17 = smov 125  }
 0x3b2   : > { %v5464_v59 = vld [vmem:[#allocation6_spill] sm:$0xff]  ;;  %3529 = vset.pattern.permute.xlu1 %v3636_v43  ;;  %3528 = vset.pattern.permute.xlu0 %v3636_v43  ;;  %v3381_v55 = vpack.c.bf16 %v4556_v51, %v4554_v63  ;;  %v4562_v11 = vld [vmem:[#allocation2 + $0x18] sm:$0xff]  ;;  %v4578_v53 = vld [vmem:[#allocation2 + $0x30] sm:$0xff]  ;;  %s3639_s23 = smov 3   ;;  %s3642_s24 = smov 6   ;;  %vm1441_vm5 = vcmask 0  }
 0x3b3   : > { %3325 = vmatprep.mubr.f32.mxu0 %v5464_v59  ;;  %v5465_v14 = vld [vmem:[#allocation14_spill] sm:$0xff]  ;;  %1633 = vperm.xlu1 %3529, %v4552_v47   ;;  %v3385_v62 = vpack.c.bf16 %v4562_v11, %v4552_v47  ;;  %v4576_v50 = vld [vmem:[#allocation2 + $0x38] sm:$0xff]  ;;  %v4594_v7 = vld [vmem:[#allocation2 + $0x50] sm:$0xff]  ;;  %s3644_s25 = smov 122  }
 0x3b4   : > { %3337 = vmatprep.mubr.f32.mxu1 %v5465_v14  ;;  %1623 = vperm.xlu0 %3528, %v4554_v63   ;;  %v4568_v54 = vld [vmem:[#allocation2 + $0x28] sm:$0xff]  ;;  %v4570_v56 = vld [vmem:[#allocation2 + $0x20] sm:$0xff]  ;;  %v3393_v13 = vpack.c.bf16 %v4576_v50, %v4578_v53  ;;  %v4592_v41 = vld [vmem:[#allocation2 + $0x58] sm:$0xff] }
 0x3b5   : > { %3382 = vmatprep.subr.bf16.mxu0 %v3381_v55  ;;  %3429 = vmatprep.subr.bf16.mxu1 %v3381_v55  ;;  %v3389_v0 = vpack.c.bf16 %v4568_v54, %v4570_v56  ;;  %v4584_v4 = vld [vmem:[#allocation2 + $0x48] sm:$0xff]  ;;  %v4586_v1 = vld [vmem:[#allocation2 + $0x40] sm:$0xff]  ;;  %v3401_v45 = vpack.c.bf16 %v4592_v41, %v4594_v7  ;;  %v4608_v46 = vld [vmem:[#allocation2 + $0x78] sm:$0xff] }
 0x3b6   : > { %3384 = vmatpush3.bf16.msra.mxu0 %v3381_v55  ;;  %3437 = vmatpush3.bf16.msra.mxu1 %v3381_v55  ;;  %v3397_v49 = vpack.c.bf16 %v4584_v4, %v4586_v1  ;;  %v4600_v12 = vld [vmem:[#allocation2 + $0x68] sm:$0xff]  ;;  %v4602_v3 = vld [vmem:[#allocation2 + $0x60] sm:$0xff]  ;;  %v4610_v27 = vld [vmem:[#allocation2 + $0x70] sm:$0xff] }
 0x3b7   : > { %3386 = vmatprep.subr.bf16.mxu0 %v3385_v62  ;;  %3430 = vmatprep.subr.bf16.mxu1 %v3385_v62  ;;  %v3405_v58 = vpack.c.bf16 %v4600_v12, %v4602_v3  ;;  %v3409_v48 = vpack.c.bf16 %v4608_v46, %v4610_v27  ;;  %v5466_v39 = vld [vmem:[#allocation7_spill] sm:$0xff]  ;;  %v5468_v57 = vld [vmem:[#allocation8_spill] sm:$0xff]  ;;  %v5470_v60 = vld [vmem:[#allocation9_spill] sm:$0xff] }
 0x3b8   : > { %1638 = vperm.xlu1 %3529, %v4562_v11   ;;  %1628 = vperm.xlu0 %3528, %v4556_v51   ;;  %v5467_v42 = vld [vmem:[#allocation15_spill] sm:$0xff]  ;;  %v5469_v36 = vld [vmem:[#allocation16_spill] sm:$0xff]  ;;  %v5471_v6 = vld [vmem:[#allocation17_spill] sm:$0xff] }
 0x3b9   : > { %v5472_v61 = vld [vmem:[#allocation10_spill] sm:$0xff]  ;;  %v5474_v35 = vld [vmem:[#allocation11_spill] sm:$0xff]  ;;  %v5476_v31 = vld [vmem:[#allocation12_spill] sm:$0xff] }
 0x3ba   : > { %3388 = vmatpush3.bf16.msra.mxu0 %v3385_v62  ;;  %3438 = vmatpush3.bf16.msra.mxu1 %v3385_v62  ;;  %v5473_v2 = vld [vmem:[#allocation18_spill] sm:$0xff]  ;;  %v5475_v44 = vld [vmem:[#allocation19_spill] sm:$0xff]  ;;  %v5477_v5 = vld [vmem:[#allocation20_spill] sm:$0xff] }
 0x3bb   : > { %3390 = vmatprep.subr.bf16.mxu0 %v3389_v0  ;;  %3431 = vmatprep.subr.bf16.mxu1 %v3389_v0  ;;  %v5478_v22 = vld [vmem:[#allocation13_spill] sm:$0xff] }
 0x3bc   : > { %1648 = vperm.xlu1 %3529, %v4568_v54   ;;  %1643 = vperm.xlu0 %3528, %v4570_v56   ;;  %v5479_v52 = vld [vmem:[#allocation21_spill] sm:$0xff] }
 0x3be   : > { %3392 = vmatpush3.bf16.msra.mxu0 %v3389_v0  ;;  %3439 = vmatpush3.bf16.msra.mxu1 %v3389_v0 }
 0x3bf   : > { %3394 = vmatprep.subr.bf16.mxu0 %v3393_v13  ;;  %3432 = vmatprep.subr.bf16.mxu1 %v3393_v13 }
 0x3c0   : > { %1658 = vperm.xlu1 %3529, %v4576_v50   ;;  %1653 = vperm.xlu0 %3528, %v4578_v53  }
 0x3c2   : > { %3396 = vmatpush3.bf16.msra.mxu0 %v3393_v13  ;;  %3440 = vmatpush3.bf16.msra.mxu1 %v3393_v13 }
 0x3c3   : > { %3398 = vmatprep.subr.bf16.mxu0 %v3397_v49  ;;  %3433 = vmatprep.subr.bf16.mxu1 %v3397_v49 }
 0x3c4   : > { %1668 = vperm.xlu1 %3529, %v4584_v4   ;;  %1663 = vperm.xlu0 %3528, %v4586_v1  }
 0x3c6   : > { %3400 = vmatpush3.bf16.msra.mxu0 %v3397_v49  ;;  %3441 = vmatpush3.bf16.msra.mxu1 %v3397_v49 }
 0x3c7   : > { %3402 = vmatprep.subr.bf16.mxu0 %v3401_v45  ;;  %3434 = vmatprep.subr.bf16.mxu1 %v3401_v45 }
 0x3c8   : > { %1678 = vperm.xlu1 %3529, %v4592_v41   ;;  %1673 = vperm.xlu0 %3528, %v4594_v7  }
 0x3ca   : > { %3404 = vmatpush3.bf16.msra.mxu0 %v3401_v45  ;;  %3442 = vmatpush3.bf16.msra.mxu1 %v3401_v45 }
 0x3cb   : > { %3406 = vmatprep.subr.bf16.mxu0 %v3405_v58  ;;  %3435 = vmatprep.subr.bf16.mxu1 %v3405_v58 }
 0x3cc   : > { %1688 = vperm.xlu1 %3529, %v4600_v12   ;;  %1683 = vperm.xlu0 %3528, %v4602_v3  }
 0x3ce   : > { %3408 = vmatpush3.bf16.msra.mxu0 %v3405_v58  ;;  %3443 = vmatpush3.bf16.msra.mxu1 %v3405_v58 }
 0x3cf   : > { %3410 = vmatprep.subr.bf16.mxu0 %v3409_v48  ;;  %3436 = vmatprep.subr.bf16.mxu1 %v3409_v48 }
 0x3d0   : > { %1698 = vperm.xlu1 %3529, %v4608_v46   ;;  %1693 = vperm.xlu0 %3528, %v4610_v27  }
 0x3d2   : > { %3412 = vmatpush3.bf16.msra.mxu0 %v3409_v48  ;;  %3444 = vmatpush3.bf16.msra.mxu1 %v3409_v48 }
 0x3d4   : > { %1735 = vrot.lane.b32.xlu1 %v4556_v51, %s3637_s18  ;;  %1733 = vrot.lane.b32.xlu0 %v4554_v63, %s3637_s18 }
 0x3d5   : > { %3326 = vmatmul.mubr.f32.vlgmr.msra.gmra.mrb[0].mxu0 %v5466_v39  ;;  %3338 = vmatmul.mubr.f32.vlgmr.msra.gmra.mrb[0].mxu1 %v5467_v42 }
 0x3d6   : > { %3328 = vmatprep.mubr.f32.mxu0 %v5468_v57  ;;  %3340 = vmatprep.mubr.f32.mxu1 %v5469_v36 }
 0x3d8   : > { %1739 = vrot.lane.b32.xlu1 %v4562_v11, %s3637_s18  ;;  %1737 = vrot.lane.b32.xlu0 %v4552_v47, %s3637_s18 }
 0x3d9   : > { %3329 = vmatmul.mubr.f32.gmra.mrb[2].mxu0 %v5470_v60  ;;  %3341 = vmatmul.mubr.f32.gmra.mrb[2].mxu1 %v5471_v6 }
 0x3da   : > { %3331 = vmatprep.mubr.f32.mxu0 %v5472_v61  ;;  %3343 = vmatprep.mubr.f32.mxu1 %v5473_v2 }
 0x3dc   : > { %1743 = vrot.lane.b32.xlu1 %v4568_v54, %s3637_s18  ;;  %1741 = vrot.lane.b32.xlu0 %v4570_v56, %s3637_s18 }
 0x3dd   : > { %3332 = vmatmul.mubr.f32.gmra.mrb[4].mxu0 %v5474_v35  ;;  %3344 = vmatmul.mubr.f32.gmra.mrb[4].mxu1 %v5475_v44 }
 0x3de   : > { %3334 = vmatprep.mubr.f32.mxu0 %v5476_v31  ;;  %3346 = vmatprep.mubr.f32.mxu1 %v5477_v5 }
 0x3e0   : > { %1747 = vrot.lane.b32.xlu1 %v4576_v50, %s3637_s18  ;;  %1745 = vrot.lane.b32.xlu0 %v4578_v53, %s3637_s18 }
 0x3e1   : > { %3335 = vmatmul.mubr.f32.gmra.mrb[6].mxu0 %v5478_v22  ;;  %3347 = vmatmul.mubr.f32.gmra.mrb[6].mxu1 %v5479_v52 }
 0x3e4   : > { %1751 = vrot.lane.b32.xlu1 %v4584_v4, %s3637_s18  ;;  %1749 = vrot.lane.b32.xlu0 %v4586_v1, %s3637_s18 }
 0x3e8   : > { %1755 = vrot.lane.b32.xlu1 %v4592_v41, %s3637_s18  ;;  %1753 = vrot.lane.b32.xlu0 %v4594_v7, %s3637_s18 }
 0x3ec   : > { %1759 = vrot.lane.b32.xlu1 %v4600_v12, %s3637_s18  ;;  %1757 = vrot.lane.b32.xlu0 %v4602_v3, %s3637_s18 }
 0x3f0   : > { %1763 = vrot.lane.b32.xlu1 %v4608_v46, %s3637_s18  ;;  %1761 = vrot.lane.b32.xlu0 %v4610_v27, %s3637_s18 }
 0x3f4   : > { %2039 = vrot.lane.b32.xlu1 %v4556_v51, %s3638_s17  ;;  %2037 = vrot.lane.b32.xlu0 %v4554_v63, %s3638_s17 }
 0x3f8   : > { %2043 = vrot.lane.b32.xlu1 %v4562_v11, %s3638_s17  ;;  %2041 = vrot.lane.b32.xlu0 %v4552_v47, %s3638_s17 }
 0x3fc   : > { %2047 = vrot.lane.b32.xlu1 %v4568_v54, %s3638_s17  ;;  %2045 = vrot.lane.b32.xlu0 %v4570_v56, %s3638_s17 }
 0x400   : > { %2051 = vrot.lane.b32.xlu1 %v4576_v50, %s3638_s17  ;;  %2049 = vrot.lane.b32.xlu0 %v4578_v53, %s3638_s17 }
 0x404   : > { %2055 = vrot.lane.b32.xlu1 %v4584_v4, %s3638_s17  ;;  %2053 = vrot.lane.b32.xlu0 %v4586_v1, %s3638_s17 }
 0x408   : > { %2059 = vrot.lane.b32.xlu1 %v4592_v41, %s3638_s17  ;;  %2057 = vrot.lane.b32.xlu0 %v4594_v7, %s3638_s17 }
 0x432   : > { %v4672_v17 = vpop.permute.xlu1 %1633 }
 0x433   : > { %5480 = vst [vmem:[#allocation28_spill] sm:$0xff] %v4672_v17  ;;  %v4674_v8 = vpop.permute.xlu0 %1623 }
 0x434   : > { %5481 = vst [vmem:[#allocation29_spill] sm:$0xff] %v4674_v8 }
 0x437   : > { %v4676_v40 = vpop.permute.xlu1 %1638  ;;  %v4678_v9 = vpop.permute.xlu0 %1628 }
 0x438   : > { %5482 = vst [vmem:[#allocation30_spill] sm:$0xff] %v4676_v40  ;;  %5483 = vst [vmem:[#allocation31_spill] sm:$0xff] %v4678_v9 }
 0x43b   : > { %v4680_v23 = vpop.permute.xlu1 %1648  ;;  %v4682_v10 = vpop.permute.xlu0 %1643 }
 0x43c   : > { %5484 = vst [vmem:[#allocation32_spill] sm:$0xff] %v4680_v23  ;;  %5485 = vst [vmem:[#allocation33_spill] sm:$0xff] %v4682_v10 }
 0x43f   : > { %v4684_v18 = vpop.permute.xlu1 %1658  ;;  %v4686_v59 = vpop.permute.xlu0 %1653 }
 0x440   : > { %5486 = vst [vmem:[#allocation34_spill] sm:$0xff] %v4684_v18  ;;  %5487 = vst [vmem:[#allocation35_spill] sm:$0xff] %v4686_v59 }
 0x443   : > { %v4688_v14 = vpop.permute.xlu1 %1668  ;;  %v4690_v43 = vpop.permute.xlu0 %1663 }
 0x444   : > { %5488 = vst [vmem:[#allocation36_spill] sm:$0xff] %v4688_v14  ;;  %5489 = vst [vmem:[#allocation37_spill] sm:$0xff] %v4690_v43 }
 0x447   : > { %v4692_v55 = vpop.permute.xlu1 %1678  ;;  %v4694_v62 = vpop.permute.xlu0 %1673 }
 0x448   : > { %5490 = vst [vmem:[#allocation38_spill] sm:$0xff] %v4692_v55  ;;  %5491 = vst [vmem:[#allocation39_spill] sm:$0xff] %v4694_v62 }
 0x44b   : > { %v4696_v0 = vpop.permute.xlu1 %1688  ;;  %v4698_v13 = vpop.permute.xlu0 %1683 }
 0x44c   : > { %5492 = vst [vmem:[#allocation40_spill] sm:$0xff] %v4696_v0  ;;  %5493 = vst [vmem:[#allocation41_spill] sm:$0xff] %v4698_v13 }
 0x44f   : > { %v4700_v49 = vpop.permute.xlu1 %1698  ;;  %v4702_v45 = vpop.permute.xlu0 %1693 }
 0x450   : > { %5494 = vst [vmem:[#allocation42_spill] sm:$0xff] %v4700_v49  ;;  %5495 = vst [vmem:[#allocation43_spill] sm:$0xff] %v4702_v45 }
 0x453   : > { %v1736_v58 = vpop.permute.xlu1 %1735  ;;  %v1734_v48 = vpop.permute.xlu0 %1733 }
 0x454   : > { %v1782_v39 = vmul.f32 %v1736_v58, %v4556_v51  ;;  %v1781_v42 = vmul.f32 %v1734_v48, %v4554_v63 }
 0x456   : > { %1815 = vrot.lane.b32.xlu1 %v1782_v39, %s3639_s23  ;;  %1813 = vrot.lane.b32.xlu0 %v1781_v42, %s3639_s23 }
 0x457   : > { %v1740_v57 = vpop.permute.xlu1 %1739  ;;  %v1738_v36 = vpop.permute.xlu0 %1737 }
 0x458   : > { %v1784_v60 = vmul.f32 %v1740_v57, %v4562_v11  ;;  %v1783_v6 = vmul.f32 %v1738_v36, %v4552_v47 }
 0x45a   : > { %1819 = vrot.lane.b32.xlu1 %v1784_v60, %s3639_s23  ;;  %1817 = vrot.lane.b32.xlu0 %v1783_v6, %s3639_s23 }
 0x45b   : > { %v1744_v61 = vpop.permute.xlu1 %1743  ;;  %v1742_v2 = vpop.permute.xlu0 %1741 }
 0x45c   : > { %v1786_v35 = vmul.f32 %v1744_v61, %v4568_v54  ;;  %v1785_v44 = vmul.f32 %v1742_v2, %v4570_v56 }
 0x45e   : > { %1823 = vrot.lane.b32.xlu1 %v1786_v35, %s3639_s23  ;;  %1821 = vrot.lane.b32.xlu0 %v1785_v44, %s3639_s23 }
 0x45f   : > { %v1748_v31 = vpop.permute.xlu1 %1747  ;;  %v1746_v5 = vpop.permute.xlu0 %1745 }
 0x460   : > { %v1788_v22 = vmul.f32 %v1748_v31, %v4576_v50  ;;  %v1787_v52 = vmul.f32 %v1746_v5, %v4578_v53 }
 0x462   : > { %1827 = vrot.lane.b32.xlu1 %v1788_v22, %s3639_s23  ;;  %1825 = vrot.lane.b32.xlu0 %v1787_v52, %s3639_s23 }
 0x463   : > { %v1752_v58 = vpop.permute.xlu1 %1751  ;;  %v1750_v48 = vpop.permute.xlu0 %1749 }
 0x464   : > { %v1790_v39 = vmul.f32 %v1752_v58, %v4584_v4  ;;  %v1789_v42 = vmul.f32 %v1750_v48, %v4586_v1 }
 0x466   : > { %1831 = vrot.lane.b32.xlu1 %v1790_v39, %s3639_s23  ;;  %1829 = vrot.lane.b32.xlu0 %v1789_v42, %s3639_s23  ;;  %v5412_v39 = vmov 0   ;;  %v5414_v42 = vmov 1  }
 0x467   : > { %v1756_v57 = vpop.permute.xlu1 %1755  ;;  %v1754_v36 = vpop.permute.xlu0 %1753  ;;  %3530 = vset.pattern.permute.xlu1 %v5412_v39  ;;  %3531 = vset.pattern.permute.xlu0 %v5414_v42 }
 0x468   : > { %v1792_v60 = vmul.f32 %v1756_v57, %v4592_v41  ;;  %v1791_v6 = vmul.f32 %v1754_v36, %v4594_v7 }
 0x46a   : > { %1835 = vrot.lane.b32.xlu1 %v1792_v60, %s3639_s23  ;;  %1833 = vrot.lane.b32.xlu0 %v1791_v6, %s3639_s23 }
 0x46b   : > { %v1760_v61 = vpop.permute.xlu1 %1759  ;;  %v1758_v2 = vpop.permute.xlu0 %1757 }
 0x46c   : > { %v1794_v35 = vmul.f32 %v1760_v61, %v4600_v12  ;;  %v1793_v44 = vmul.f32 %v1758_v2, %v4602_v3 }
 0x46e   : > { %1839 = vrot.lane.b32.xlu1 %v1794_v35, %s3639_s23  ;;  %1837 = vrot.lane.b32.xlu0 %v1793_v44, %s3639_s23 }
 0x46f   : > { %v1764_v31 = vpop.permute.xlu1 %1763  ;;  %v1762_v5 = vpop.permute.xlu0 %1761 }
 0x470   : > { %v1796_v22 = vmul.f32 %v1764_v31, %v4608_v46  ;;  %v1795_v52 = vmul.f32 %v1762_v5, %v4610_v27 }
 0x472   : > { %1843 = vrot.lane.b32.xlu1 %v1796_v22, %s3639_s23  ;;  %1841 = vrot.lane.b32.xlu0 %v1795_v52, %s3639_s23 }
 0x473   : > { %v2040_v58 = vpop.permute.xlu1 %2039  ;;  %v2038_v48 = vpop.permute.xlu0 %2037 }
 0x474   : > { %v2086_v57 = vmul.f32 %v2040_v58, %v3736_v16  ;;  %v2085_v36 = vmul.f32 %v2038_v48, %v3731_v15 }
 0x476   : > { %2063 = vrot.lane.b32.xlu1 %v4600_v12, %s3638_s17  ;;  %2061 = vrot.lane.b32.xlu0 %v4602_v3, %s3638_s17  ;;  %v2102_v61 = vmul.f32 %v2086_v57, %v4678_v9  ;;  %v2101_v2 = vmul.f32 %v2085_v36, %v4674_v8 }
 0x477   : > { %v2044_v60 = vpop.permute.xlu1 %2043  ;;  %v2042_v6 = vpop.permute.xlu0 %2041 }
 0x478   : > { %v2088_v31 = vmul.f32 %v2044_v60, %v3749_v20  ;;  %v2087_v5 = vmul.f32 %v2042_v6, %v3744_v19 }
 0x47a   : > { %2067 = vrot.lane.b32.xlu1 %v4608_v46, %s3638_s17  ;;  %2065 = vrot.lane.b32.xlu0 %v4610_v27, %s3638_s17  ;;  %v2104_v58 = vmul.f32 %v2088_v31, %v4676_v40  ;;  %v2103_v48 = vmul.f32 %v2087_v5, %v4672_v17 }
 0x47b   : > { %v2048_v35 = vpop.permute.xlu1 %2047  ;;  %v2046_v44 = vpop.permute.xlu0 %2045 }
 0x47c   : > { %v2090_v57 = vmul.f32 %v2048_v35, %v3762_v24  ;;  %v2089_v36 = vmul.f32 %v2046_v44, %v3754_v21 }
 0x47e   : > { %2135 = vrot.lane.b32.xlu1 %v2102_v61, %s3642_s24  ;;  %2133 = vrot.lane.b32.xlu0 %v2101_v2, %s3642_s24  ;;  %v2106_v61 = vmul.f32 %v2090_v57, %v4680_v23  ;;  %v2105_v2 = vmul.f32 %v2089_v36, %v4682_v10 }
 0x47f   : > { %v2052_v22 = vpop.permute.xlu1 %2051  ;;  %v2050_v52 = vpop.permute.xlu0 %2049 }
 0x480   : > { %v2092_v39 = vmul.f32 %v2052_v22, %v3772_v26  ;;  %v2091_v31 = vmul.f32 %v2050_v52, %v3767_v25 }
 0x482   : > { %2139 = vrot.lane.b32.xlu1 %v2104_v58, %s3642_s24  ;;  %2137 = vrot.lane.b32.xlu0 %v2103_v48, %s3642_s24  ;;  %v2108_v35 = vmul.f32 %v2092_v39, %v4684_v18  ;;  %v2107_v44 = vmul.f32 %v2091_v31, %v4686_v59 }
 0x483   : > { %v2056_v60 = vpop.permute.xlu1 %2055  ;;  %v2054_v6 = vpop.permute.xlu0 %2053 }
 0x484   : > { %v2094_v5 = vmul.f32 %v2056_v60, %v3782_v29  ;;  %v2093_v58 = vmul.f32 %v2054_v6, %v3777_v28 }
 0x486   : > { %2143 = vrot.lane.b32.xlu1 %v2106_v61, %s3642_s24  ;;  %2141 = vrot.lane.b32.xlu0 %v2105_v2, %s3642_s24  ;;  %v2110_v22 = vmul.f32 %v2094_v5, %v4688_v14  ;;  %v2109_v52 = vmul.f32 %v2093_v58, %v4690_v43 }
 0x487   : > { %v2060_v48 = vpop.permute.xlu1 %2059  ;;  %v2058_v57 = vpop.permute.xlu0 %2057 }
 0x488   : > { %v2096_v36 = vmul.f32 %v2060_v48, %v3792_v32  ;;  %v2095_v39 = vmul.f32 %v2058_v57, %v3787_v30 }
 0x48a   : > { %2147 = vrot.lane.b32.xlu1 %v2108_v35, %s3642_s24  ;;  %2145 = vrot.lane.b32.xlu0 %v2107_v44, %s3642_s24  ;;  %v2112_v60 = vmul.f32 %v2096_v36, %v4692_v55  ;;  %v2111_v6 = vmul.f32 %v2095_v39, %v4694_v62 }
 0x48e   : > { %2151 = vrot.lane.b32.xlu1 %v2110_v22, %s3642_s24  ;;  %2149 = vrot.lane.b32.xlu0 %v2109_v52, %s3642_s24 }
 0x492   : > { %2155 = vrot.lane.b32.xlu1 %v2112_v60, %s3642_s24  ;;  %2153 = vrot.lane.b32.xlu0 %v2111_v6, %s3642_s24 }
 0x4a8   : > { %v4782_v61 = vpop.f32.mrb[0].mxu0  ;;  %v4784_v2 = vpop.f32.mrb[0].mxu1 }
 0x4a9   : > { %v4786_v31 = vpop.f32.mrb[1].mxu0  ;;  %v4788_v35 = vpop.f32.mrb[1].mxu1 }
 0x4ac   : > { %v4790_v44 = vpop.f32.mrb[2].mxu0  ;;  %v4792_v5 = vpop.f32.mrb[2].mxu1 }
 0x4ad   : > { %v4794_v58 = vpop.f32.mrb[3].mxu0  ;;  %v4796_v48 = vpop.f32.mrb[3].mxu1 }
 0x4b0   : > { %v4798_v57 = vpop.f32.mrb[4].mxu0  ;;  %v4800_v22 = vpop.f32.mrb[4].mxu1 }
 0x4b1   : > { %v4802_v52 = vpop.f32.mrb[5].mxu0  ;;  %v4804_v36 = vpop.f32.mrb[5].mxu1 }
 0x4b4   : > { %v4806_v39 = vpop.f32.mrb[6].mxu0  ;;  %v4808_v60 = vpop.f32.mrb[6].mxu1 }
 0x4b5   : > { %5496 = vst [vmem:[#allocation44_spill] sm:$0xff] %v4808_v60  ;;  %v4810_v6 = vpop.f32.mrb[7].mxu0  ;;  %v4812_v42 = vpop.f32.mrb[7].mxu1 }
 0x4c8   : > { %v4814_v18 = vpop.permute.xlu1 %1815  ;;  %v4816_v59 = vpop.permute.xlu0 %1813 }
 0x4c9   : > { %5497 = vst [vmem:[#allocation45_spill] sm:$0xff] %v4814_v18  ;;  %5498 = vst [vmem:[#allocation46_spill] sm:$0xff] %v4816_v59 }
 0x4cc   : > { %v4818_v23 = vpop.permute.xlu1 %1819  ;;  %v4820_v10 = vpop.permute.xlu0 %1817 }
 0x4cd   : > { %5499 = vst [vmem:[#allocation47_spill] sm:$0xff] %v4818_v23  ;;  %5500 = vst [vmem:[#allocation48_spill] sm:$0xff] %v4820_v10 }
 0x4d0   : > { %v4822_v62 = vpop.permute.xlu1 %1823  ;;  %v4824_v55 = vpop.permute.xlu0 %1821 }
 0x4d1   : > { %5501 = vst [vmem:[#allocation49_spill] sm:$0xff] %v4822_v62  ;;  %5502 = vst [vmem:[#allocation50_spill] sm:$0xff] %v4824_v55 }
 0x4d4   : > { %v4826_v17 = vpop.permute.xlu1 %1827  ;;  %v4828_v40 = vpop.permute.xlu0 %1825 }
 0x4d5   : > { %5503 = vst [vmem:[#allocation51_spill] sm:$0xff] %v4826_v17  ;;  %5504 = vst [vmem:[#allocation52_spill] sm:$0xff] %v4828_v40 }
 0x4d8   : > { %v4830_v43 = vpop.permute.xlu1 %1831  ;;  %v4832_v8 = vpop.permute.xlu0 %1829 }
 0x4d9   : > { %5505 = vst [vmem:[#allocation53_spill] sm:$0xff] %v4830_v43  ;;  %5506 = vst [vmem:[#allocation54_spill] sm:$0xff] %v4832_v8 }
 0x4dc   : > { %v4834_v14 = vpop.permute.xlu1 %1835  ;;  %v4836_v9 = vpop.permute.xlu0 %1833 }
 0x4dd   : > { %5507 = vst [vmem:[#allocation55_spill] sm:$0xff] %v4834_v14  ;;  %5508 = vst [vmem:[#allocation56_spill] sm:$0xff] %v4836_v9 }
 0x4e0   : > { %v4838_v18 = vpop.permute.xlu1 %1839  ;;  %v4840_v23 = vpop.permute.xlu0 %1837 }
 0x4e1   : > { %5509 = vst [vmem:[#allocation57_spill] sm:$0xff] %v4838_v18  ;;  %5510 = vst [vmem:[#allocation58_spill] sm:$0xff] %v4840_v23 }
 0x4e4   : > { %v4842_v10 = vpop.permute.xlu1 %1843  ;;  %v4844_v62 = vpop.permute.xlu0 %1841 }
 0x4e5   : > { %5511 = vst [vmem:[#allocation59_spill] sm:$0xff] %v4842_v10 }
 0x4e8   : > { %v2064_v55 = vpop.permute.xlu1 %2063  ;;  %v2062_v17 = vpop.permute.xlu0 %2061 }
 0x4e9   : > { %v2098_v40 = vmul.f32 %v2064_v55, %v3802_v34  ;;  %v2097_v43 = vmul.f32 %v2062_v17, %v3797_v33  ;;  %v5512_v17 = vmov 1  }
 0x4eb   : > { %v2114_v8 = vmul.f32 %v2098_v40, %v4696_v0  ;;  %v2113_v14 = vmul.f32 %v2097_v43, %v4698_v13  ;;  %v5513_v40 = vmov 0  }
 0x4ec   : > { %v2068_v59 = vpop.permute.xlu1 %2067  ;;  %v2066_v9 = vpop.permute.xlu0 %2065 }
 0x4ed   : > { %v2100_v18 = vmul.f32 %v2068_v59, %v3815_v38  ;;  %v2099_v23 = vmul.f32 %v2066_v9, %v3810_v37  ;;  %2159 = vrot.lane.b32.xlu1 %v2114_v8, %s3642_s24  ;;  %2157 = vrot.lane.b32.xlu0 %v2113_v14, %s3642_s24  ;;  %v5428_v8 = vmov 2  }
 0x4ef   : > { %v2116_v10 = vmul.f32 %v2100_v18, %v4700_v49  ;;  %v2115_v55 = vmul.f32 %v2099_v23, %v4702_v45  ;;  %v5515_v45 = vmov 2  }
 0x4f0   : > { %v4920_v9 = vpop.permute.xlu0 %2133 }
 0x4f1   : > { %2163 = vrot.lane.b32.xlu1 %v2116_v10, %s3642_s24  ;;  %2161 = vrot.lane.b32.xlu0 %v2115_v55, %s3642_s24 }
 0x4f4   : > { %v4927_v10 = vpop.permute.xlu0 %2137 }
 0x4f5   : > { %2315 = vperm.xlu1 %3530, %v4556_v51   ;;  %2557 = vperm.xlu0 %3531, %v4554_v63  }
 0x4f8   : > { %v4933_v59 = vpop.permute.xlu0 %2141 }
 0x4f9   : > { %2319 = vperm.xlu1 %3530, %v4552_v47   ;;  %1893 = vrot.lane.b32.xlu0 %v4786_v31, %s3638_s17 }
 0x4fc   : > { %v4938_v43 = vpop.permute.xlu0 %2145 }
 0x4fd   : > { %2327 = vperm.xlu1 %3530, %v4570_v56   ;;  %1909 = vrot.lane.b32.xlu0 %v4788_v35, %s3638_s17 }
 0x501   : > { %2335 = vperm.xlu1 %3530, %v4578_v53   ;;  %1897 = vrot.lane.b32.xlu0 %v4794_v58, %s3638_s17 }
 0x505   : > { %2343 = vperm.xlu1 %3530, %v4586_v1   ;;  %1913 = vrot.lane.b32.xlu0 %v4796_v48, %s3638_s17 }
 0x509   : > { %2351 = vperm.xlu1 %3530, %v4594_v7   ;;  %1901 = vrot.lane.b32.xlu0 %v4802_v52, %s3638_s17 }
 0x50d   : > { %2359 = vperm.xlu1 %3530, %v4602_v3   ;;  %1917 = vrot.lane.b32.xlu0 %v4804_v36, %s3638_s17 }
 0x511   : > { %2367 = vperm.xlu1 %3530, %v4610_v27   ;;  %2593 = vperm.xlu0 %3531, %v4584_v4  }
 0x515   : > { %3532 = vset.pattern.permute.xlu1 %v5512_v17  ;;  %2601 = vperm.xlu0 %3531, %v4592_v41  }
 0x516   : > { %2561 = vperm.xlu1 %3532, %v4556_v51  }
 0x519   : > { %2609 = vperm.xlu0 %3531, %v4600_v12  }
 0x51a   : > { %2565 = vperm.xlu1 %3532, %v4552_v47  }
 0x51d   : > { %2617 = vperm.xlu0 %3531, %v4608_v46  }
 0x51e   : > { %2569 = vperm.xlu1 %3532, %v4562_v11  }
 0x521   : > { %1905 = vrot.lane.b32.xlu0 %v4810_v6, %s3638_s17 }
 0x522   : > { %2573 = vperm.xlu1 %3532, %v4570_v56   ;;  %3533 = vset.pattern.permute.xlu0 %v5428_v8  ;;  %v4944_v8 = vpop.permute.xlu0 %2149 }
 0x525   : > { %1921 = vrot.lane.b32.xlu0 %v4812_v42, %s3638_s17 }
 0x526   : > { %2577 = vperm.xlu1 %3532, %v4568_v54   ;;  %v4950_v0 = vpop.permute.xlu0 %2153 }
 0x529   : > { %2781 = vperm.xlu0 %3533, %v4554_v63  }
 0x52a   : > { %2581 = vperm.xlu1 %3532, %v4578_v53  }
 0x52d   : > { %3534 = vset.pattern.permute.xlu0 %v5513_v40 }
 0x52e   : > { %1895 = vrot.lane.b32.xlu1 %v4782_v61, %s3638_s17  ;;  %2311 = vperm.xlu0 %3534, %v4554_v63   ;;  %v4918_v63 = vpop.permute.xlu1 %2135 }
 0x532   : > { %1911 = vrot.lane.b32.xlu1 %v4784_v2, %s3638_s17  ;;  %2323 = vperm.xlu0 %3534, %v4562_v11   ;;  %v4925_v23 = vpop.permute.xlu1 %2139 }
 0x536   : > { %1899 = vrot.lane.b32.xlu1 %v4790_v44, %s3638_s17  ;;  %2331 = vperm.xlu0 %3534, %v4568_v54   ;;  %v4931_v18 = vpop.permute.xlu1 %2143 }
 0x53a   : > { %1915 = vrot.lane.b32.xlu1 %v4792_v5, %s3638_s17  ;;  %2339 = vperm.xlu0 %3534, %v4576_v50   ;;  %v4936_v14 = vpop.permute.xlu1 %2147 }
 0x53b   : > { %5514 = vst [vmem:[#allocation60_spill] sm:$0xff] %v4936_v14 }
 0x53e   : > { %1903 = vrot.lane.b32.xlu1 %v4798_v57, %s3638_s17  ;;  %2347 = vperm.xlu0 %3534, %v4584_v4   ;;  %v4942_v55 = vpop.permute.xlu1 %2151 }
 0x542   : > { %1919 = vrot.lane.b32.xlu1 %v4800_v22, %s3638_s17  ;;  %2355 = vperm.xlu0 %3534, %v4592_v41   ;;  %v4948_v49 = vpop.permute.xlu1 %2155 }
 0x546   : > { %1907 = vrot.lane.b32.xlu1 %v4806_v39, %s3638_s17  ;;  %2363 = vperm.xlu0 %3534, %v4600_v12  }
 0x54a   : > { %1923 = vrot.lane.b32.xlu1 %v4808_v60, %s3638_s17  ;;  %2371 = vperm.xlu0 %3534, %v4608_v46  }
 0x54e   : > { %2585 = vperm.xlu1 %3532, %v4576_v50  }
 0x552   : > { %2589 = vperm.xlu1 %3532, %v4586_v1  }
 0x556   : > { %2597 = vperm.xlu1 %3532, %v4594_v7  }
 0x55a   : > { %2605 = vperm.xlu1 %3532, %v4602_v3  }
 0x55e   : > { %2613 = vperm.xlu1 %3532, %v4610_v27  }
 0x55f   : > { %v4953_v13 = vpop.permute.xlu1 %2159  ;;  %v4955_v17 = vpop.permute.xlu0 %2157 }
 0x560   : > { %5516 = vst [vmem:[#allocation61_spill] sm:$0xff] %v4953_v13 }
 0x562   : > { %3535 = vset.pattern.permute.xlu1 %v5515_v45 }
 0x563   : > { %2785 = vperm.xlu1 %3535, %v4556_v51   ;;  %v4959_v40 = vpop.permute.xlu1 %2163  ;;  %v4961_v14 = vpop.permute.xlu0 %2161 }
 0x567   : > { %2789 = vperm.xlu1 %3535, %v4552_v47  }
 0x56b   : > { %2793 = vperm.xlu1 %3535, %v4562_v11  }
 0x56f   : > { %2797 = vperm.xlu1 %3535, %v4570_v56  }
 0x573   : > { %2801 = vperm.xlu1 %3535, %v4568_v54  }
 0x574   : > { %v4964_v51 = vpop.permute.xlu1 %2315  ;;  %v4966_v45 = vpop.permute.xlu0 %2557 }
 0x575   : > { %5517 = vst [vmem:[#allocation62_spill] sm:$0xff] %v4966_v45 }
 0x577   : > { %2805 = vperm.xlu1 %3535, %v4578_v53  }
 0x578   : > { %v4969_v47 = vpop.permute.xlu1 %2319  ;;  %v1894_v60 = vpop.permute.xlu0 %1893 }
 0x579   : > { %5518 = vst [vmem:[#allocation63_spill] sm:$0xff] %v4969_v47  ;;  %v1941_v13 = vmul.f32 %v1894_v60, %v3731_v15 }
 0x57b   : > { %2809 = vperm.xlu1 %3535, %v4576_v50   ;;  %1973 = vrot.lane.b32.xlu0 %v1941_v13, %s3642_s24 }
 0x57c   : > { %v4974_v11 = vpop.permute.xlu1 %2327  ;;  %v1910_v56 = vpop.permute.xlu0 %1909 }
 0x57d   : > { %5519 = vst [vmem:[#allocation64_spill] sm:$0xff] %v4974_v11  ;;  %v1949_v54 = vmul.f32 %v1910_v56, %v3777_v28 }
 0x57f   : > { %2813 = vperm.xlu1 %3535, %v4586_v1   ;;  %1989 = vrot.lane.b32.xlu0 %v1949_v54, %s3642_s24 }
 0x580   : > { %v4979_v45 = vpop.permute.xlu1 %2335  ;;  %v1898_v53 = vpop.permute.xlu0 %1897 }
 0x581   : > { %5520 = vst [vmem:[#allocation65_spill] sm:$0xff] %v4979_v45  ;;  %v1943_v47 = vmul.f32 %v1898_v53, %v3744_v19 }
 0x583   : > { %2817 = vperm.xlu1 %3535, %v4584_v4   ;;  %1977 = vrot.lane.b32.xlu0 %v1943_v47, %s3642_s24 }
 0x584   : > { %v4984_v15 = vpop.permute.xlu1 %2343  ;;  %v1914_v50 = vpop.permute.xlu0 %1913 }
 0x585   : > { %v1951_v13 = vmul.f32 %v1914_v50, %v3787_v30 }
 0x587   : > { %2821 = vperm.xlu1 %3535, %v4594_v7   ;;  %1993 = vrot.lane.b32.xlu0 %v1951_v13, %s3642_s24 }
 0x588   : > { %v4989_v28 = vpop.permute.xlu1 %2351  ;;  %v1902_v1 = vpop.permute.xlu0 %1901 }
 0x589   : > { %v1945_v60 = vmul.f32 %v1902_v1, %v3754_v21 }
 0x58b   : > { %2825 = vperm.xlu1 %3535, %v4592_v41   ;;  %1981 = vrot.lane.b32.xlu0 %v1945_v60, %s3642_s24 }
 0x58c   : > { %v4994_v19 = vpop.permute.xlu1 %2359  ;;  %v1918_v4 = vpop.permute.xlu0 %1917 }
 0x58d   : > { %5521 = vst [vmem:[#allocation66_spill] sm:$0xff] %v4994_v19  ;;  %v1953_v47 = vmul.f32 %v1918_v4, %v3797_v33 }
 0x58f   : > { %2829 = vperm.xlu1 %3535, %v4602_v3   ;;  %1997 = vrot.lane.b32.xlu0 %v1953_v47, %s3642_s24 }
 0x590   : > { %v4999_v30 = vpop.permute.xlu1 %2367  ;;  %v5001_v7 = vpop.permute.xlu0 %2593 }
 0x591   : > { %5522 = vst [vmem:[#allocation67_spill] sm:$0xff] %v4999_v30 }
 0x593   : > { %2833 = vperm.xlu1 %3535, %v4600_v12  }
 0x594   : > { %v5004_v21 = vpop.permute.xlu0 %2601 }
 0x595   : > { %v5006_v41 = vpop.permute.xlu1 %2561 }
 0x598   : > { %v5008_v56 = vpop.permute.xlu0 %2609 }
 0x599   : > { %5523 = vst [vmem:[#allocation68_spill] sm:$0xff] %v5008_v56  ;;  %v5010_v54 = vpop.permute.xlu1 %2565 }
 0x59c   : > { %v5012_v53 = vpop.permute.xlu0 %2617 }
 0x59d   : > { %5524 = vst [vmem:[#allocation69_spill] sm:$0xff] %v5012_v53  ;;  %v5014_v33 = vpop.permute.xlu1 %2569 }
 0x5a0   : > { %v1906_v3 = vpop.permute.xlu0 %1905 }
 0x5a1   : > { %v1947_v50 = vmul.f32 %v1906_v3, %v3767_v25  ;;  %v5017_v13 = vpop.permute.xlu1 %2573 }
 0x5a2   : > { %5525 = vst [vmem:[#allocation70_spill] sm:$0xff] %v5017_v13 }
 0x5a3   : > { %1985 = vrot.lane.b32.xlu0 %v1947_v50, %s3642_s24 }
 0x5a4   : > { %v1922_v12 = vpop.permute.xlu0 %1921 }
 0x5a5   : > { %v1955_v1 = vmul.f32 %v1922_v12, %v3810_v37  ;;  %v5021_v60 = vpop.permute.xlu1 %2577 }
 0x5a6   : > { %5526 = vst [vmem:[#allocation71_spill] sm:$0xff] %v5021_v60 }
 0x5a7   : > { %2001 = vrot.lane.b32.xlu0 %v1955_v1, %s3642_s24 }
 0x5a8   : > { %v5031_v37 = vpop.permute.xlu0 %2781 }
 0x5a9   : > { %v5024_v4 = vpop.permute.xlu1 %2581 }
 0x5aa   : > { %5527 = vst [vmem:[#allocation72_spill] sm:$0xff] %v5024_v4 }
 0x5ad   : > { %v1896_v47 = vpop.permute.xlu1 %1895 }
 0x5ae   : > { %v1942_v30 = vmul.f32 %v1896_v47, %v3736_v16  ;;  %v5036_v47 = vpop.permute.xlu0 %2311 }
 0x5b0   : > { %1975 = vrot.lane.b32.xlu1 %v1942_v30, %s3642_s24 }
 0x5b1   : > { %v1912_v45 = vpop.permute.xlu1 %1911 }
 0x5b2   : > { %v1950_v25 = vmul.f32 %v1912_v45, %v3782_v29 }
 0x5b4   : > { %1991 = vrot.lane.b32.xlu1 %v1950_v25, %s3642_s24 }
 0x5b5   : > { %v1900_v3 = vpop.permute.xlu1 %1899 }
 0x5b6   : > { %v1944_v50 = vmul.f32 %v1900_v3, %v3749_v20  ;;  %v5041_v20 = vpop.permute.xlu0 %2323 }
 0x5b8   : > { %1979 = vrot.lane.b32.xlu1 %v1944_v50, %s3642_s24 }
 0x5b9   : > { %v1916_v12 = vpop.permute.xlu1 %1915 }
 0x5ba   : > { %v1952_v1 = vmul.f32 %v1916_v12, %v3792_v32  ;;  %v5046_v50 = vpop.permute.xlu0 %2331 }
 0x5bc   : > { %1995 = vrot.lane.b32.xlu1 %v1952_v1, %s3642_s24 }
 0x5bd   : > { %v1904_v16 = vpop.permute.xlu1 %1903 }
 0x5be   : > { %v1946_v30 = vmul.f32 %v1904_v16, %v3762_v24  ;;  %v5052_v1 = vpop.permute.xlu0 %2339 }
 0x5bf   : > { %5529 = vst [vmem:[#allocation74_spill] sm:$0xff] %v5052_v1  ;;  %v5536_v1 = vld [vmem:[#allocation54_spill] sm:$0xff] }
 0x5c0   : > { %1983 = vrot.lane.b32.xlu1 %v1946_v30, %s3642_s24 }
 0x5c1   : > { %v1920_v29 = vpop.permute.xlu1 %1919 }
 0x5c2   : > { %v1954_v45 = vmul.f32 %v1920_v29, %v3802_v34  ;;  %v5060_v16 = vpop.permute.xlu0 %2347 }
 0x5c4   : > { %1999 = vrot.lane.b32.xlu1 %v1954_v45, %s3642_s24 }
 0x5c5   : > { %v1908_v25 = vpop.permute.xlu1 %1907 }
 0x5c6   : > { %v1948_v3 = vmul.f32 %v1908_v25, %v3772_v26  ;;  %v5064_v29 = vpop.permute.xlu0 %2355 }
 0x5c8   : > { %1987 = vrot.lane.b32.xlu1 %v1948_v3, %s3642_s24 }
 0x5c9   : > { %v1924_v32 = vpop.permute.xlu1 %1923 }
 0x5ca   : > { %v1956_v12 = vmul.f32 %v1924_v32, %v3815_v38  ;;  %v5068_v45 = vpop.permute.xlu0 %2363 }
 0x5cc   : > { %2003 = vrot.lane.b32.xlu1 %v1956_v12, %s3642_s24 }
 0x5cd   : > { %v5050_v24 = vpop.permute.xlu1 %2585 }
 0x5ce   : > { %5528 = vst [vmem:[#allocation73_spill] sm:$0xff] %v5050_v24 }
 0x5d0   : > { %2837 = vperm.xlu1 %3535, %v4610_v27   ;;  %v5074_v27 = vpop.permute.xlu0 %2371 }
 0x5d1   : > { %v5055_v34 = vpop.permute.xlu1 %2589  ;;  %5533 = vst [vmem:[#allocation78_spill] sm:$0xff] %v5074_v27  ;;  %v5537_v27 = vld [vmem:[#allocation48_spill] sm:$0xff] }
 0x5d2   : > { %v1863_v60 = vsub.f32 %v4794_v58, %v5537_v27 }
 0x5d4   : > { %2841 = vperm.xlu1 %3535, %v4608_v46   ;;  %v5534_v46 = vld [vmem:[#allocation46_spill] sm:$0xff] }
 0x5d5   : > { %v5058_v26 = vpop.permute.xlu1 %2597  ;;  %v1861_v12 = vsub.f32 %v4786_v31, %v5534_v46 }
 0x5d9   : > { %v5062_v30 = vpop.permute.xlu1 %2605 }
 0x5da   : > { %5530 = vst [vmem:[#allocation75_spill] sm:$0xff] %v5062_v30 }
 0x5dd   : > { %v5066_v38 = vpop.permute.xlu1 %2613 }
 0x5de   : > { %5531 = vst [vmem:[#allocation76_spill] sm:$0xff] %v5066_v38  ;;  %v1869_v38 = vsub.f32 %v4788_v35, %v5536_v1  ;;  %v5538_v1 = vld [vmem:[#allocation56_spill] sm:$0xff] }
 0x5e2   : > { %v5070_v25 = vpop.permute.xlu1 %2785 }
 0x5e6   : > { %v5072_v3 = vpop.permute.xlu1 %2789 }
 0x5e7   : > { %5532 = vst [vmem:[#allocation77_spill] sm:$0xff] %v5072_v3 }
 0x5ea   : > { %v5076_v32 = vpop.permute.xlu1 %2793 }
 0x5ed   : > { %v1974_v4 = vpop.permute.xlu0 %1973 }
 0x5ee   : > { %v2021_v53 = vsub.f32 %v1861_v12, %v1974_v4  ;;  %v5080_v24 = vpop.permute.xlu1 %2797 }
 0x5ef   : > { %5535 = vst [vmem:[#allocation46_spill] sm:$0xff] %v5080_v24 }
 0x5f0   : > { %v2181_v30 = vadd.f32 %v4920_v9, %v2021_v53  ;;  %v1871_v9 = vsub.f32 %v4796_v48, %v5538_v1  ;;  %v5540_v1 = vld [vmem:[#allocation58_spill] sm:$0xff] }
 0x5f1   : > { %v1990_v13 = vpop.permute.xlu0 %1989 }
 0x5f2   : > { %v2197_v19 = vmul.f32 0.5, %v2181_v30  ;;  %v2029_v11 = vsub.f32 %v1869_v38, %v1990_v13  ;;  %v5085_v56 = vpop.permute.xlu1 %2801 }
 0x5f4   : > { %v2189_v3 = vadd.f32 %v4944_v8, %v2029_v11  ;;  %2245 = vrot.lane.b32.xlu0 %v2197_v19, %s3644_s25  ;;  %v5539_v8 = vld [vmem:[#allocation50_spill] sm:$0xff] }
 0x5f5   : > { %v1978_v4 = vpop.permute.xlu0 %1977  ;;  %v1865_v11 = vsub.f32 %v4802_v52, %v5539_v8 }
 0x5f6   : > { %v2205_v46 = vmul.f32 0.5, %v2189_v3  ;;  %v2023_v12 = vsub.f32 %v1863_v60, %v1978_v4  ;;  %v5091_v24 = vpop.permute.xlu1 %2805 }
 0x5f8   : > { %v2183_v53 = vadd.f32 %v4927_v10, %v2023_v12  ;;  %2261 = vrot.lane.b32.xlu0 %v2205_v46, %s3644_s25  ;;  %v1873_v10 = vsub.f32 %v4804_v36, %v5540_v1 }
 0x5f9   : > { %v1994_v13 = vpop.permute.xlu0 %1993 }
 0x5fa   : > { %v2199_v30 = vmul.f32 0.5, %v2183_v53  ;;  %v2031_v38 = vsub.f32 %v1871_v9, %v1994_v13  ;;  %v5097_v27 = vpop.permute.xlu1 %2809 }
 0x5fc   : > { %v2191_v19 = vadd.f32 %v4950_v0, %v2031_v38  ;;  %2249 = vrot.lane.b32.xlu0 %v2199_v30, %s3644_s25 }
 0x5fd   : > { %v1982_v60 = vpop.permute.xlu0 %1981 }
 0x5fe   : > { %v2207_v3 = vmul.f32 0.5, %v2191_v19  ;;  %v2025_v4 = vsub.f32 %v1865_v11, %v1982_v60  ;;  %v5106_v12 = vpop.permute.xlu1 %2813 }
 0x600   : > { %v2185_v46 = vadd.f32 %v4933_v59, %v2025_v4  ;;  %2265 = vrot.lane.b32.xlu0 %v2207_v3, %s3644_s25  ;;  %v5541_v59 = vld [vmem:[#allocation52_spill] sm:$0xff]  ;;  %v1875_v4 = vsub.f32 %v4812_v42, %v4844_v62 }
 0x601   : > { %v1998_v9 = vpop.permute.xlu0 %1997  ;;  %v1867_v19 = vsub.f32 %v4810_v6, %v5541_v59 }
 0x602   : > { %v2201_v53 = vmul.f32 0.5, %v2185_v46  ;;  %v2033_v13 = vsub.f32 %v1873_v10, %v1998_v9  ;;  %v5111_v30 = vpop.permute.xlu1 %2817 }
 0x604   : > { %v2193_v8 = vadd.f32 %v4955_v17, %v2033_v13  ;;  %2253 = vrot.lane.b32.xlu0 %v2201_v53, %s3644_s25 }
 0x606   : > { %v2209_v0 = vmul.f32 0.5, %v2193_v8  ;;  %v5114_v38 = vpop.permute.xlu1 %2821 }
 0x608   : > { %2269 = vrot.lane.b32.xlu0 %v2209_v0, %s3644_s25  ;;  %v5543_v0 = vld [vmem:[#allocation45_spill] sm:$0xff] }
 0x609   : > { %v1862_v59 = vsub.f32 %v4782_v61, %v5543_v0 }
 0x60a   : > { %v5116_v11 = vpop.permute.xlu1 %2825 }
 0x60e   : > { %v5122_v17 = vpop.permute.xlu1 %2829 }
 0x612   : > { %v5127_v13 = vpop.permute.xlu1 %2833 }
 0x613   : > { %5542 = vst [vmem:[#allocation54_spill] sm:$0xff] %v5127_v13  ;;  %v5546_v13 = vld [vmem:[#allocation55_spill] sm:$0xff] }
 0x615   : > { %v1986_v60 = vpop.permute.xlu0 %1985 }
 0x616   : > { %v2027_v3 = vsub.f32 %v1867_v19, %v1986_v60  ;;  %v5544_v60 = vld [vmem:[#allocation53_spill] sm:$0xff] }
 0x618   : > { %v2187_v1 = vadd.f32 %v4938_v43, %v2027_v3  ;;  %v1870_v43 = vsub.f32 %v4784_v2, %v5544_v60 }
 0x619   : > { %v2002_v10 = vpop.permute.xlu0 %2001 }
 0x61a   : > { %v2203_v46 = vmul.f32 0.5, %v2187_v1  ;;  %v2035_v9 = vsub.f32 %v1875_v4, %v2002_v10  ;;  %v5545_v10 = vld [vmem:[#allocation47_spill] sm:$0xff] }
 0x61c   : > { %v2195_v53 = vadd.f32 %v4961_v14, %v2035_v9  ;;  %2257 = vrot.lane.b32.xlu0 %v2203_v46, %s3644_s25  ;;  %v1864_v46 = vsub.f32 %v4790_v44, %v5545_v10  ;;  %v5548_v10 = vld [vmem:[#allocation57_spill] sm:$0xff] }
 0x61e   : > { %v2211_v8 = vmul.f32 0.5, %v2195_v53 }
 0x620   : > { %2273 = vrot.lane.b32.xlu0 %v2211_v8, %s3644_s25 }
 0x622   : > { %v1976_v62 = vpop.permute.xlu1 %1975 }
 0x623   : > { %v2022_v19 = vsub.f32 %v1862_v59, %v1976_v62  ;;  %v1872_v59 = vsub.f32 %v4792_v5, %v5546_v13  ;;  %v1874_v13 = vsub.f32 %v4800_v22, %v5548_v10 }
 0x625   : > { %v2182_v3 = vadd.f32 %v4918_v63, %v2022_v19 }
 0x626   : > { %v1992_v4 = vpop.permute.xlu1 %1991 }
 0x627   : > { %v2198_v1 = vmul.f32 0.5, %v2182_v3  ;;  %v2030_v14 = vsub.f32 %v1870_v43, %v1992_v4  ;;  %v5547_v43 = vld [vmem:[#allocation49_spill] sm:$0xff] }
 0x628   : > { %v1866_v3 = vsub.f32 %v4798_v57, %v5547_v43  ;;  %v5552_v43 = vld [vmem:[#allocation44_spill] sm:$0xff] }
 0x629   : > { %v2190_v9 = vadd.f32 %v4942_v55, %v2030_v14  ;;  %2247 = vrot.lane.b32.xlu1 %v2198_v1, %s3644_s25 }
 0x62a   : > { %v1980_v53 = vpop.permute.xlu1 %1979 }
 0x62b   : > { %v2206_v8 = vmul.f32 0.5, %v2190_v9  ;;  %v2024_v0 = vsub.f32 %v1864_v46, %v1980_v53 }
 0x62d   : > { %v2184_v62 = vadd.f32 %v4925_v23, %v2024_v0  ;;  %2263 = vrot.lane.b32.xlu1 %v2206_v8, %s3644_s25  ;;  %v5549_v8 = vld [vmem:[#allocation51_spill] sm:$0xff] }
 0x62e   : > { %v1996_v63 = vpop.permute.xlu1 %1995  ;;  %v1868_v0 = vsub.f32 %v4806_v39, %v5549_v8 }
 0x62f   : > { %v2200_v19 = vmul.f32 0.5, %v2184_v62  ;;  %v2032_v60 = vsub.f32 %v1872_v59, %v1996_v63  ;;  %v5550_v59 = vld [vmem:[#allocation61_spill] sm:$0xff] }
 0x631   : > { %v2192_v55 = vadd.f32 %v4948_v49, %v2032_v60  ;;  %2251 = vrot.lane.b32.xlu1 %v2200_v19, %s3644_s25  ;;  %v5551_v60 = vld [vmem:[#allocation59_spill] sm:$0xff] }
 0x632   : > { %v1984_v4 = vpop.permute.xlu1 %1983 }
 0x633   : > { %v2208_v1 = vmul.f32 0.5, %v2192_v55  ;;  %v2026_v14 = vsub.f32 %v1866_v3, %v1984_v4  ;;  %v1876_v3 = vsub.f32 %v5552_v43, %v5551_v60  ;;  %v5553_v55 = vld [vmem:[#allocation60_spill] sm:$0xff] }
 0x635   : > { %v2186_v23 = vadd.f32 %v4931_v18, %v2026_v14  ;;  %2267 = vrot.lane.b32.xlu1 %v2208_v1, %s3644_s25 }
 0x636   : > { %v2000_v46 = vpop.permute.xlu1 %1999 }
 0x637   : > { %v2202_v9 = vmul.f32 0.5, %v2186_v23  ;;  %v2034_v53 = vsub.f32 %v1874_v13, %v2000_v46  ;;  %v3558_v46 = vld [vmem:[#allocation2 + $0x8] sm:$0xff] }
 0x639   : > { %v2194_v49 = vadd.f32 %v5550_v59, %v2034_v53  ;;  %2255 = vrot.lane.b32.xlu1 %v2202_v9, %s3644_s25  ;;  %v5554_v9 = vld [vmem:[#allocation31_spill] sm:$0xff]  ;;  %v3559_v59 = vld [vmem:[#allocation2 + $0x48] sm:$0xff] }
 0x63a   : > { %v1988_v62 = vpop.permute.xlu1 %1987  ;;  %v1702_v53 = vmul.f32 %v3558_v46, %v5554_v9 }
 0x63b   : > { %v2210_v63 = vmul.f32 0.5, %v2194_v49  ;;  %v2028_v19 = vsub.f32 %v1868_v0, %v1988_v62  ;;  %v5555_v49 = vld [vmem:[#allocation36_spill] sm:$0xff] }
 0x63c   : > { %v1718_v8 = vsub.f32 %v4782_v61, %v1702_v53  ;;  %v1710_v62 = vmul.f32 %v3559_v59, %v5555_v49 }
 0x63d   : > { %v2188_v18 = vadd.f32 %v5553_v55, %v2028_v19  ;;  %2271 = vrot.lane.b32.xlu1 %v2210_v63, %s3644_s25  ;;  %v3560_v63 = vld [vmem:[#allocation2] sm:$0xff]  ;;  %v5556_v19 = vld [vmem:[#allocation29_spill] sm:$0xff] }
 0x63e   : > { %v2004_v4 = vpop.permute.xlu1 %2003  ;;  %v1726_v60 = vsub.f32 %v4784_v2, %v1710_v62  ;;  %v5558_v2 = vmov 0   ;;  %v5559_v62 = vmov 1  }
 0x63f   : > { %v2204_v1 = vmul.f32 0.5, %v2188_v18  ;;  %v2036_v14 = vsub.f32 %v1876_v3, %v2004_v4  ;;  %v2214_v3 = vmul.f32 0.5, %v1718_v8 }
 0x640   : > { %v2222_v61 = vmul.f32 0.5, %v1726_v60  ;;  %v5561_v60 = vmov 2  }
 0x641   : > { %v2196_v10 = vadd.f32 %v4959_v40, %v2036_v14  ;;  %2259 = vrot.lane.b32.xlu1 %v2204_v1, %s3644_s25  ;;  %v1701_v40 = vmul.f32 %v3560_v63, %v5556_v19  ;;  %v3561_v14 = vld [vmem:[#allocation2 + $0x40] sm:$0xff]  ;;  %v5560_v19 = vld [vmem:[#allocation30_spill] sm:$0xff] }
 0x643   : > { %v2212_v13 = vmul.f32 0.5, %v2196_v10  ;;  %v1717_v55 = vsub.f32 %v4786_v31, %v1701_v40  ;;  %v5557_v10 = vld [vmem:[#allocation37_spill] sm:$0xff] }
 0x645   : > { %2275 = vrot.lane.b32.xlu1 %v2212_v13, %s3644_s25  ;;  %v1709_v13 = vmul.f32 %v3561_v14, %v5557_v10  ;;  %v2213_v9 = vmul.f32 0.5, %v1717_v55  ;;  %v5562_v55 = vld [vmem:[#allocation28_spill] sm:$0xff] }
 0x647   : > { %v1725_v46 = vsub.f32 %v4788_v35, %v1709_v13  ;;  %v3562_v35 = vld [vmem:[#allocation2 + $0x18] sm:$0xff] }
 0x648   : > { %v1704_v40 = vmul.f32 %v3562_v35, %v5560_v19  ;;  %v5563_v13 = vld [vmem:[#allocation38_spill] sm:$0xff] }
 0x649   : > { %v2221_v31 = vmul.f32 0.5, %v1725_v46 }
 0x64f   : > { %v5162_v23 = vpop.permute.xlu1 %2837 }
 0x653   : > { %v5166_v0 = vpop.permute.xlu1 %2841 }
 0x666   : > { %v2246_v4 = vpop.permute.xlu0 %2245 }
 0x667   : > { %v2293_v49 = vsub.f32 %v2213_v9, %v2246_v4  ;;  %v1720_v4 = vsub.f32 %v4790_v44, %v1704_v40  ;;  %v3565_v9 = vld [vmem:[#allocation2 + $0x50] sm:$0xff] }
 0x66a   : > { %v2262_v63 = vpop.permute.xlu0 %2261 }
 0x66b   : > { %v2301_v8 = vsub.f32 %v2221_v31, %v2262_v63  ;;  %v2216_v31 = vmul.f32 0.5, %v1720_v4 }
 0x66e   : > { %v2250_v46 = vpop.permute.xlu0 %2249 }
 0x69b   : > { %v2248_v18 = vpop.permute.xlu1 %2247 }
 0x69c   : > { %v2294_v1 = vsub.f32 %v2214_v3, %v2248_v18  ;;  %v3563_v3 = vld [vmem:[#allocation2 + $0x10] sm:$0xff] }
 0x69d   : > { %v1703_v18 = vmul.f32 %v3563_v3, %v5562_v55  ;;  %v2266_v3 = vpop.permute.xlu0 %2265 }
 0x69e   : > { %2865 = vperm.xlu1 %3535, %v2294_v1   ;;  %2403 = vperm.xlu0 %3534, %v2294_v1  }
 0x69f   : > { %v2264_v53 = vpop.permute.xlu1 %2263  ;;  %v1719_v14 = vsub.f32 %v4794_v58, %v1703_v18 }
 0x6a0   : > { %v2302_v59 = vsub.f32 %v2222_v61, %v2264_v53  ;;  %v5564_v53 = vld [vmem:[#allocation39_spill] sm:$0xff] }
 0x6a1   : > { %v1711_v63 = vmul.f32 %v3565_v9, %v5564_v53  ;;  %v2215_v44 = vmul.f32 0.5, %v1719_v14 }
 0x6a2   : > { %3538 = vset.pattern.permute.xlu1 %v5558_v2  ;;  %2443 = vperm.xlu0 %3534, %v2302_v59  }
 0x6a3   : > { %2398 = vperm.xlu1 %3538, %v2293_v49   ;;  %v2252_v10 = vpop.permute.xlu1 %2251  ;;  %v2295_v58 = vsub.f32 %v2215_v44, %v2250_v46 }
 0x6a4   : > { %v2296_v19 = vsub.f32 %v2216_v31, %v2252_v10  ;;  %v2254_v10 = vpop.permute.xlu0 %2253  ;;  %v5567_v31 = vld [vmem:[#allocation32_spill] sm:$0xff] }
 0x6a6   : > { %3536 = vset.pattern.permute.xlu0 %v5559_v62 }
 0x6a7   : > { %2438 = vperm.xlu1 %3538, %v2301_v8   ;;  %2641 = vperm.xlu0 %3536, %v2294_v1   ;;  %v3564_v1 = vld [vmem:[#allocation2 + $0x58] sm:$0xff]  ;;  %v2268_v40 = vpop.permute.xlu1 %2267 }
 0x6a8   : > { %v1712_v61 = vmul.f32 %v3564_v1, %v5563_v13  ;;  %v3567_v1 = vld [vmem:[#allocation2 + $0x60] sm:$0xff]  ;;  %v5566_v13 = vld [vmem:[#allocation41_spill] sm:$0xff] }
 0x6aa   : > { %v1728_v35 = vsub.f32 %v4792_v5, %v1712_v61  ;;  %v3566_v5 = vld [vmem:[#allocation2 + $0x20] sm:$0xff]  ;;  %v1713_v61 = vmul.f32 %v3567_v1, %v5566_v13 }
 0x6ab   : > { %3539 = vset.pattern.permute.xlu1 %v5559_v62  ;;  %2673 = vperm.xlu0 %3536, %v2302_v59   ;;  %v2256_v46 = vpop.permute.xlu1 %2255 }
 0x6ac   : > { %2637 = vperm.xlu1 %3539, %v2293_v49   ;;  %v2224_v55 = vmul.f32 0.5, %v1728_v35  ;;  %v1729_v9 = vsub.f32 %v4804_v36, %v1713_v61  ;;  %v5570_v61 = vld [vmem:[#allocation35_spill] sm:$0xff] }
 0x6af   : > { %3537 = vset.pattern.permute.xlu0 %v5561_v60 }
 0x6b0   : > { %2669 = vperm.xlu1 %3539, %v2301_v8   ;;  %2897 = vperm.xlu0 %3537, %v2302_v59   ;;  %v1727_v59 = vsub.f32 %v4796_v48, %v1711_v63  ;;  %v5565_v48 = vld [vmem:[#allocation33_spill] sm:$0xff] }
 0x6b1   : > { %v3568_v63 = vld [vmem:[#allocation2 + $0x28] sm:$0xff] }
 0x6b2   : > { %v2223_v18 = vmul.f32 0.5, %v1727_v59  ;;  %v1706_v35 = vmul.f32 %v3568_v63, %v5567_v31 }
 0x6b4   : > { %3540 = vset.pattern.permute.xlu1 %v5561_v60  ;;  %2893 = vperm.xlu0 %3537, %v2301_v8   ;;  %v2304_v8 = vsub.f32 %v2224_v55, %v2268_v40  ;;  %v2303_v4 = vsub.f32 %v2223_v18, %v2266_v3  ;;  %v1722_v44 = vsub.f32 %v4798_v57, %v1706_v35  ;;  %v2225_v40 = vmul.f32 0.5, %v1729_v9  ;;  %v3569_v3 = vld [vmem:[#allocation2 + $0x68] sm:$0xff]  ;;  %v2272_v18 = vpop.permute.xlu1 %2271  ;;  %v3570_v57 = vld [vmem:[#allocation2 + $0x78] sm:$0xff]  ;;  %v3572_v35 = vld [vmem:[#allocation2 + $0x70] sm:$0xff] }
 0x6b5   : > { %2861 = vperm.xlu1 %3540, %v2293_v49   ;;  %v1705_v49 = vmul.f32 %v3566_v5, %v5565_v48  ;;  %v5568_v55 = vld [vmem:[#allocation40_spill] sm:$0xff] }
 0x6b6   : > { %v2218_v36 = vmul.f32 0.5, %v1722_v44 }
 0x6b7   : > { %v1721_v14 = vsub.f32 %v4802_v52, %v1705_v49  ;;  %v2270_v52 = vpop.permute.xlu0 %2269 }
 0x6b8   : > { %3541 = vset.pattern.permute.xlu0 %v5558_v2  ;;  %v2298_v48 = vsub.f32 %v2218_v36, %v2256_v46  ;;  %v2260_v49 = vpop.permute.xlu1 %2259  ;;  %v5572_v36 = vld [vmem:[#allocation34_spill] sm:$0xff] }
 0x6b9   : > { %3544 = vset.pattern.permute.xlu1 %v5558_v2  ;;  %2413 = vperm.xlu0 %3541, %v2296_v19   ;;  %v2217_v53 = vmul.f32 0.5, %v1721_v14  ;;  %v5569_v14 = vld [vmem:[#allocation42_spill] sm:$0xff] }
 0x6ba   : > { %2408 = vperm.xlu1 %3544, %v2295_v58  }
 0x6bb   : > { %v2297_v59 = vsub.f32 %v2217_v53, %v2254_v10  ;;  %v1716_v10 = vmul.f32 %v3570_v57, %v5569_v14  ;;  %v2258_v63 = vpop.permute.xlu0 %2257 }
 0x6bc   : > { %v2276_v9 = vpop.permute.xlu1 %2275 }
 0x6bd   : > { %2453 = vperm.xlu0 %3541, %v2304_v8   ;;  %v1732_v13 = vsub.f32 %v5552_v43, %v1716_v10 }
 0x6be   : > { %2448 = vperm.xlu1 %3544, %v2303_v4  }
 0x6bf   : > { %v2228_v46 = vmul.f32 0.5, %v1732_v13 }
 0x6c1   : > { %3542 = vset.pattern.permute.xlu0 %v5559_v62  ;;  %v2308_v31 = vsub.f32 %v2228_v46, %v2276_v9 }
 0x6c2   : > { %3545 = vset.pattern.permute.xlu1 %v5559_v62  ;;  %2649 = vperm.xlu0 %3542, %v2296_v19  }
 0x6c3   : > { %2645 = vperm.xlu1 %3545, %v2295_v58  }
 0x6c6   : > { %2681 = vperm.xlu0 %3542, %v2304_v8  }
 0x6c7   : > { %2677 = vperm.xlu1 %3545, %v2303_v4  }
 0x6ca   : > { %3543 = vset.pattern.permute.xlu0 %v5561_v60 }
 0x6cb   : > { %3546 = vset.pattern.permute.xlu1 %v5561_v60  ;;  %2873 = vperm.xlu0 %3543, %v2296_v19   ;;  %v1714_v19 = vmul.f32 %v3569_v3, %v5568_v55  ;;  %v2274_v55 = vpop.permute.xlu0 %2273 }
 0x6cc   : > { %2869 = vperm.xlu1 %3546, %v2295_v58   ;;  %v2305_v58 = vsub.f32 %v2225_v40, %v2270_v52  ;;  %v5571_v52 = vld [vmem:[#allocation43_spill] sm:$0xff] }
 0x6cd   : > { %v1730_v5 = vsub.f32 %v4800_v22, %v1714_v19  ;;  %v1715_v44 = vmul.f32 %v3572_v35, %v5571_v52 }
 0x6cf   : > { %2905 = vperm.xlu0 %3543, %v2304_v8   ;;  %v2226_v8 = vmul.f32 0.5, %v1730_v5  ;;  %v1731_v40 = vsub.f32 %v4812_v42, %v1715_v44 }
 0x6d0   : > { %3550 = vset.pattern.permute.xlu1 %v5558_v2 }
 0x6d1   : > { %2418 = vperm.xlu1 %3550, %v2297_v59   ;;  %v2306_v1 = vsub.f32 %v2226_v8, %v2272_v18  ;;  %v3573_v18 = vld [vmem:[#allocation2 + $0x38] sm:$0xff] }
 0x6d2   : > { %v1708_v5 = vmul.f32 %v3573_v18, %v5572_v36 }
 0x6d3   : > { %2901 = vperm.xlu0 %3543, %v2303_v4   ;;  %v3571_v4 = vld [vmem:[#allocation2 + $0x30] sm:$0xff] }
 0x6d4   : > { %v1707_v22 = vmul.f32 %v3571_v4, %v5570_v61  ;;  %v1724_v42 = vsub.f32 %v4806_v39, %v1708_v5  ;;  %v5223_v39 = vld [vmem:[%s5388_s4] ss:$0 sm:$0xff] }
 0x6d5   : > { %2458 = vperm.xlu1 %3550, %v2305_v58   ;;  %v2845_v4 = vmul.f32 %v5223_v39, %v5070_v25  ;;  %v2628_v36 = vmul.f32 %v5223_v39, %v5055_v34 }
 0x6d6   : > { %v1723_v53 = vsub.f32 %v4810_v6, %v1707_v22  ;;  %v2227_v6 = vmul.f32 0.5, %v1731_v40  ;;  %v2220_v8 = vmul.f32 0.5, %v1724_v42  ;;  %v2381_v22 = vmul.f32 %v5223_v39, %v4964_v51 }
 0x6d7   : > { %3547 = vset.pattern.permute.xlu0 %v5558_v2 }
 0x6d8   : > { %2423 = vperm.xlu0 %3547, %v2298_v48   ;;  %v2219_v43 = vmul.f32 0.5, %v1723_v53  ;;  %v2307_v19 = vsub.f32 %v2227_v6, %v2274_v55  ;;  %v2300_v57 = vsub.f32 %v2220_v8, %v2260_v49  ;;  %v2380_v53 = vmul.f32 %v5223_v39, %v5036_v47 }
 0x6d9   : > { %3551 = vset.pattern.permute.xlu1 %v5559_v62  ;;  %v2388_v47 = vmul.f32 %v5223_v39, %v4984_v15  ;;  %v2391_v15 = vmul.f32 %v5223_v39, %v5064_v29 }
 0x6da   : > { %2653 = vperm.xlu1 %3551, %v2297_v59   ;;  %v2299_v3 = vsub.f32 %v2219_v43, %v2258_v63  ;;  %v5573_v43 = vld [vmem:[#allocation62_spill] sm:$0xff] }
 0x6db   : > { %v2620_v51 = vmul.f32 %v5223_v39, %v5573_v43 }
 0x6dc   : > { %2463 = vperm.xlu0 %3547, %v2306_v1  }
 0x6de   : > { %2685 = vperm.xlu1 %3551, %v2305_v58  }
 0x6e0   : > { %3548 = vset.pattern.permute.xlu0 %v5559_v62 }
 0x6e1   : > { %2657 = vperm.xlu0 %3548, %v2298_v48  }
 0x6e2   : > { %3555 = vset.pattern.permute.xlu1 %v5561_v60 }
 0x6e3   : > { %2921 = vperm.xlu1 %3555, %v2308_v31  }
 0x6e5   : > { %2689 = vperm.xlu0 %3548, %v2306_v1  }
 0x6e7   : > { %3556 = vset.pattern.permute.xlu1 %v5558_v2 }
 0x6e8   : > { %2428 = vperm.xlu1 %3556, %v2299_v3  }
 0x6e9   : > { %3549 = vset.pattern.permute.xlu0 %v5561_v60 }
 0x6ea   : > { %2881 = vperm.xlu0 %3549, %v2298_v48  }
 0x6ec   : > { %2468 = vperm.xlu1 %3556, %v2307_v19  }
 0x6ee   : > { %2913 = vperm.xlu0 %3549, %v2306_v1  }
 0x6f0   : > { %3557 = vset.pattern.permute.xlu1 %v5559_v62 }
 0x6f1   : > { %2661 = vperm.xlu1 %3557, %v2299_v3  }
 0x6f2   : > { %2877 = vperm.xlu0 %3549, %v2297_v59  }
 0x6f5   : > { %2693 = vperm.xlu1 %3557, %v2307_v19  }
 0x6f6   : > { %2909 = vperm.xlu0 %3549, %v2305_v58  }
 0x6fa   : > { %3552 = vset.pattern.permute.xlu0 %v5558_v2  ;;  %v2389_v2 = vmul.f32 %v5223_v39, %v5060_v16 }
 0x6fb   : > { %2433 = vperm.xlu0 %3552, %v2300_v57  }
 0x6ff   : > { %2473 = vperm.xlu0 %3552, %v2308_v31  }
 0x703   : > { %3553 = vset.pattern.permute.xlu0 %v5559_v62 }
 0x704   : > { %2665 = vperm.xlu0 %3553, %v2300_v57  }
 0x708   : > { %2697 = vperm.xlu0 %3553, %v2308_v31  }
 0x70c   : > { %3554 = vset.pattern.permute.xlu0 %v5561_v60  ;;  %v2629_v60 = vmul.f32 %v5223_v39, %v5001_v7  ;;  %v2621_v7 = vmul.f32 %v5223_v39, %v5006_v41  ;;  %v2383_v41 = vmul.f32 %v5223_v39, %v5041_v20 }
 0x70d   : > { %2889 = vperm.xlu0 %3554, %v2300_v57  }
 0x711   : > { %2885 = vperm.xlu0 %3554, %v2299_v3  }
 0x715   : > { %2917 = vperm.xlu0 %3554, %v2307_v19  }
 0x71d   : > { %v2866_v59 = vpop.permute.xlu1 %2865  ;;  %v2404_v48 = vpop.permute.xlu0 %2403 }
 0x71e   : > { %v2925_v9 = vsub.f32 %v2845_v4, %v2866_v59  ;;  %v2477_v46 = vsub.f32 %v2381_v22, %v2404_v48 }
 0x720   : > { %v2941_v35 = vmax.f32 %v2925_v9, 0.0  ;;  %v2493_v25 = vmax.f32 %v2477_v46, 0.0 }
 0x721   : > { %v2444_v58 = vpop.permute.xlu0 %2443 }
 0x722   : > { %v2485_v49 = vsub.f32 %v2389_v2, %v2444_v58  ;;  %v2399_v62 = vpop.permute.xlu1 %2398  ;;  %v2844_v2 = vmul.f32 %v5223_v39, %v5031_v37  ;;  %v2631_v37 = vmul.f32 %v5223_v39, %v5004_v21 }
 0x723   : > { %v2476_v52 = vsub.f32 %v2380_v53, %v2399_v62  ;;  %v5574_v53 = vld [vmem:[#allocation63_spill] sm:$0xff] }
 0x724   : > { %v2501_v14 = vmax.f32 %v2485_v49, 0.0 }
 0x725   : > { %v2492_v3 = vmax.f32 %v2476_v52, 0.0 }
 0x726   : > { %v2642_v10 = vpop.permute.xlu0 %2641  ;;  %2526 = vadd.xlane.f32.xlu1 %v2501_v14  ;;  %v2439_v1 = vpop.permute.xlu1 %2438  ;;  %v2623_v14 = vmul.f32 %v5223_v39, %v5014_v33  ;;  %v2847_v33 = vmul.f32 %v5223_v39, %v5076_v32  ;;  %v2622_v32 = vmul.f32 %v5223_v39, %v5010_v54 }
 0x727   : > { %v2701_v44 = vsub.f32 %v2621_v7, %v2642_v10  ;;  %v2484_v19 = vsub.f32 %v2388_v47, %v2439_v1 }
 0x729   : > { %v2717_v18 = vmax.f32 %v2701_v44, 0.0  ;;  %v2500_v57 = vmax.f32 %v2484_v19, 0.0  ;;  %v2390_v44 = vmul.f32 %v5223_v39, %v4989_v28  ;;  %v2385_v19 = vmul.f32 %v5223_v39, %v5046_v50 }
 0x72a   : > { %v2674_v13 = vpop.permute.xlu0 %2673 }
 0x72b   : > { %v2709_v61 = vsub.f32 %v2629_v60, %v2674_v13  ;;  %v2638_v63 = vpop.permute.xlu1 %2637 }
 0x72c   : > { %v2700_v55 = vsub.f32 %v2620_v51, %v2638_v63  ;;  %v2382_v63 = vmul.f32 %v5223_v39, %v5574_v53 }
 0x72d   : > { %v2725_v16 = vmax.f32 %v2709_v61, 0.0 }
 0x72e   : > { %v2716_v42 = vmax.f32 %v2700_v55, 0.0 }
 0x72f   : > { %v5235_v31 = vpop.permute.xlu0 %2897  ;;  %2750 = vadd.xlane.f32.xlu1 %v2725_v16  ;;  %v2670_v6 = vpop.permute.xlu1 %2669 }
 0x730   : > { %v2708_v59 = vsub.f32 %v2628_v36, %v2670_v6 }
 0x732   : > { %v2724_v62 = vmax.f32 %v2708_v59, 0.0 }
 0x733   : > { %v5241_v40 = vpop.permute.xlu0 %2893  ;;  %2958 = vadd.xlane.f32.xlu1 %v2941_v35 }
 0x734   : > { %2510 = vadd.xlane.f32.xlu0 %v2493_v25  ;;  %v2862_v48 = vpop.permute.xlu1 %2861 }
 0x735   : > { %v2924_v34 = vsub.f32 %v2844_v2, %v2862_v48 }
 0x737   : > { %2508 = vadd.xlane.f32.xlu1 %v2492_v3  ;;  %v2940_v1 = vmax.f32 %v2924_v34, 0.0  ;;  %v5577_v34 = vld [vmem:[#allocation68_spill] sm:$0xff] }
 0x738   : > { %v2414_v5 = vpop.permute.xlu0 %2413  ;;  %2734 = vadd.xlane.f32.xlu0 %v2717_v18  ;;  %v2630_v18 = vmul.f32 %v5223_v39, %v5058_v26 }
 0x739   : > { %v2479_v8 = vsub.f32 %v2383_v41, %v2414_v5  ;;  %v2409_v29 = vpop.permute.xlu1 %2408 }
 0x73a   : > { %v2478_v35 = vsub.f32 %v2382_v63, %v2409_v29  ;;  %v5579_v63 = vld [vmem:[#allocation66_spill] sm:$0xff] }
 0x73b   : > { %2732 = vadd.xlane.f32.xlu1 %v2716_v42  ;;  %v2495_v20 = vmax.f32 %v2479_v8, 0.0  ;;  %v2393_v42 = vmul.f32 %v5223_v39, %v5068_v45 }
 0x73c   : > { %v2454_v58 = vpop.permute.xlu0 %2453  ;;  %2524 = vadd.xlane.f32.xlu0 %v2500_v57  ;;  %v2494_v43 = vmax.f32 %v2478_v35, 0.0  ;;  %v5575_v57 = vld [vmem:[#allocation77_spill] sm:$0xff] }
 0x73d   : > { %v2487_v49 = vsub.f32 %v2391_v15, %v2454_v58  ;;  %v2449_v9 = vpop.permute.xlu1 %2448  ;;  %v2846_v59 = vmul.f32 %v5223_v39, %v5575_v57  ;;  %v5576_v58 = vld [vmem:[#allocation71_spill] sm:$0xff] }
 0x73e   : > { %v2486_v51 = vsub.f32 %v2390_v44, %v2449_v9 }
 0x73f   : > { %2514 = vadd.xlane.f32.xlu1 %v2495_v20  ;;  %v2503_v10 = vmax.f32 %v2487_v49, 0.0  ;;  %v2625_v20 = vmul.f32 %v5223_v39, %v5576_v58 }
 0x740   : > { %2748 = vadd.xlane.f32.xlu0 %v2724_v62  ;;  %v2502_v55 = vmax.f32 %v2486_v51, 0.0  ;;  %v5581_v51 = vld [vmem:[#allocation70_spill] sm:$0xff] }
 0x741   : > { %v2650_v60 = vpop.permute.xlu0 %2649 }
 0x742   : > { %v2703_v13 = vsub.f32 %v2623_v14, %v2650_v60  ;;  %v2646_v25 = vpop.permute.xlu1 %2645  ;;  %v2633_v14 = vmul.f32 %v5223_v39, %v5577_v34 }
 0x743   : > { %2530 = vadd.xlane.f32.xlu1 %v2503_v10  ;;  %v2702_v6 = vsub.f32 %v2622_v32, %v2646_v25  ;;  %v2624_v32 = vmul.f32 %v5223_v39, %v5581_v51 }
 0x744   : > { %v2719_v4 = vmax.f32 %v2703_v13, 0.0  ;;  %2956 = vadd.xlane.f32.xlu0 %v2940_v1 }
 0x745   : > { %v2682_v61 = vpop.permute.xlu0 %2681  ;;  %v2718_v36 = vmax.f32 %v2702_v6, 0.0 }
 0x746   : > { %v2711_v22 = vsub.f32 %v2631_v37, %v2682_v61  ;;  %v2678_v3 = vpop.permute.xlu1 %2677  ;;  %v2849_v37 = vmul.f32 %v5223_v39, %v5085_v56 }
 0x747   : > { %2738 = vadd.xlane.f32.xlu1 %v2719_v4  ;;  %v2710_v5 = vsub.f32 %v2630_v18, %v2678_v3 }
 0x748   : > { %v2727_v16 = vmax.f32 %v2711_v22, 0.0  ;;  %v5578_v22 = vld [vmem:[#allocation64_spill] sm:$0xff] }
 0x749   : > { %v2726_v50 = vmax.f32 %v2710_v5, 0.0  ;;  %v2384_v9 = vmul.f32 %v5223_v39, %v5578_v22 }
 0x74a   : > { %v2874_v46 = vpop.permute.xlu0 %2873 }
 0x74b   : > { %v2927_v7 = vsub.f32 %v2847_v33, %v2874_v46  ;;  %2754 = vadd.xlane.f32.xlu1 %v2727_v16  ;;  %v2870_v8 = vpop.permute.xlu1 %2869 }
 0x74c   : > { %v2926_v2 = vsub.f32 %v2846_v59, %v2870_v8  ;;  %v5583_v8 = vld [vmem:[#allocation74_spill] sm:$0xff] }
 0x74d   : > { %v2943_v52 = vmax.f32 %v2927_v7, 0.0  ;;  %v2392_v7 = vmul.f32 %v5223_v39, %v5579_v63  ;;  %v2850_v63 = vmul.f32 %v5223_v39, %v5091_v24 }
 0x74e   : > { %v5261_v21 = vpop.permute.xlu0 %2905  ;;  %v2942_v62 = vmax.f32 %v2926_v2, 0.0 }
 0x74f   : > { %2962 = vadd.xlane.f32.xlu0 %v2943_v52  ;;  %v5580_v52 = vld [vmem:[#allocation46_spill] sm:$0xff] }
 0x750   : > { %v2419_v10 = vpop.permute.xlu1 %2418  ;;  %v2848_v25 = vmul.f32 %v5223_v39, %v5580_v52 }
 0x751   : > { %v2480_v33 = vsub.f32 %v2384_v9, %v2419_v10  ;;  %v5586_v10 = vld [vmem:[#allocation69_spill] sm:$0xff] }
 0x752   : > { %v5265_v47 = vpop.permute.xlu0 %2901 }
 0x753   : > { %2512 = vadd.xlane.f32.xlu0 %v2494_v43  ;;  %v2496_v56 = vmax.f32 %v2480_v33, 0.0 }
 0x754   : > { %v2459_v4 = vpop.permute.xlu1 %2458 }
 0x755   : > { %v2488_v44 = vsub.f32 %v2392_v7, %v2459_v4 }
 0x757   : > { %v2424_v41 = vpop.permute.xlu0 %2423  ;;  %2528 = vadd.xlane.f32.xlu0 %v2502_v55  ;;  %v2504_v55 = vmax.f32 %v2488_v44, 0.0  ;;  %v2852_v44 = vmul.f32 %v5223_v39, %v5106_v12 }
 0x758   : > { %v2481_v28 = vsub.f32 %v2385_v19, %v2424_v41 }
 0x759   : > { %v2654_v35 = vpop.permute.xlu1 %2653  ;;  %v2932_v51 = vsub.f32 %v2852_v44, %v5241_v40 }
 0x75a   : > { %v2497_v54 = vmax.f32 %v2481_v28, 0.0  ;;  %v2704_v6 = vsub.f32 %v2624_v32, %v2654_v35  ;;  %v5582_v28 = vld [vmem:[#allocation75_spill] sm:$0xff] }
 0x75b   : > { %v2464_v15 = vpop.permute.xlu0 %2463  ;;  %2736 = vadd.xlane.f32.xlu0 %v2718_v36  ;;  %v2632_v36 = vmul.f32 %v5223_v39, %v5582_v28 }
 0x75c   : > { %v2489_v48 = vsub.f32 %v2393_v42, %v2464_v15  ;;  %2518 = vadd.xlane.f32.xlu1 %v2497_v54  ;;  %v2720_v5 = vmax.f32 %v2704_v6, 0.0  ;;  %v2387_v54 = vmul.f32 %v5223_v39, %v5583_v8  ;;  %v5589_v6 = vld [vmem:[#allocation72_spill] sm:$0xff]  ;;  %v2856_v8 = vmul.f32 %v5223_v39, %v5122_v17 }
 0x75d   : > { %v2686_v18 = vpop.permute.xlu1 %2685  ;;  %v2626_v24 = vmul.f32 %v5223_v39, %v5589_v6 }
 0x75e   : > { %v2505_v26 = vmax.f32 %v2489_v48, 0.0  ;;  %v2712_v42 = vsub.f32 %v2632_v36, %v2686_v18  ;;  %v5584_v48 = vld [vmem:[#allocation78_spill] sm:$0xff]  ;;  %v2948_v18 = vmax.f32 %v2932_v51, 0.0 }
 0x75f   : > { %2752 = vadd.xlane.f32.xlu0 %v2726_v50  ;;  %v2395_v50 = vmul.f32 %v5223_v39, %v5584_v48  ;;  %v2858_v48 = vmul.f32 %v5223_v39, %v5162_v23 }
 0x760   : > { %v2658_v49 = vpop.permute.xlu0 %2657  ;;  %2534 = vadd.xlane.f32.xlu1 %v2505_v26  ;;  %v2728_v15 = vmax.f32 %v2712_v42, 0.0  ;;  %v5590_v42 = vld [vmem:[#allocation76_spill] sm:$0xff] }
 0x761   : > { %v2705_v45 = vsub.f32 %v2625_v20, %v2658_v49  ;;  %v2634_v40 = vmul.f32 %v5223_v39, %v5590_v42 }
 0x762   : > { %v5301_v20 = vpop.permute.xlu1 %2921 }
 0x763   : > { %v2721_v60 = vmax.f32 %v2705_v45, 0.0  ;;  %2960 = vadd.xlane.f32.xlu0 %v2942_v62  ;;  %v5585_v62 = vld [vmem:[#allocation73_spill] sm:$0xff] }
 0x764   : > { %v2690_v1 = vpop.permute.xlu0 %2689  ;;  %v2627_v45 = vmul.f32 %v5223_v39, %v5585_v62 }
 0x765   : > { %v2713_v29 = vsub.f32 %v2633_v14, %v2690_v1  ;;  %2742 = vadd.xlane.f32.xlu1 %v2721_v60  ;;  %v2635_v60 = vmul.f32 %v5223_v39, %v5586_v10 }
 0x767   : > { %v2729_v13 = vmax.f32 %v2713_v29, 0.0  ;;  %v2429_v1 = vpop.permute.xlu1 %2428 }
 0x769   : > { %v2882_v61 = vpop.permute.xlu0 %2881  ;;  %2758 = vadd.xlane.f32.xlu1 %v2729_v13 }
 0x76a   : > { %v2929_v16 = vsub.f32 %v2849_v37, %v2882_v61  ;;  %v2851_v61 = vmul.f32 %v5223_v39, %v5097_v27 }
 0x76b   : > { %v2469_v22 = vpop.permute.xlu1 %2468 }
 0x76c   : > { %v2945_v46 = vmax.f32 %v2929_v16, 0.0  ;;  %v5587_v16 = vld [vmem:[#allocation65_spill] sm:$0xff] }
 0x76d   : > { %v5285_v53 = vpop.permute.xlu0 %2913  ;;  %v2386_v33 = vmul.f32 %v5223_v39, %v5587_v16 }
 0x76e   : > { %2966 = vadd.xlane.f32.xlu0 %v2945_v46 }
 0x76f   : > { %v2482_v7 = vsub.f32 %v2386_v33, %v2429_v1 }
 0x771   : > { %v2878_v43 = vpop.permute.xlu0 %2877  ;;  %v2498_v32 = vmax.f32 %v2482_v7, 0.0 }
 0x772   : > { %v2928_v3 = vsub.f32 %v2848_v25, %v2878_v43  ;;  %2516 = vadd.xlane.f32.xlu0 %v2496_v56  ;;  %v5588_v25 = vld [vmem:[#allocation67_spill] sm:$0xff]  ;;  %v2662_v43 = vpop.permute.xlu1 %2661 }
 0x773   : > { %v2394_v56 = vmul.f32 %v5223_v39, %v5588_v25  ;;  %v2706_v36 = vsub.f32 %v2626_v24, %v2662_v43 }
 0x774   : > { %v2944_v19 = vmax.f32 %v2928_v3, 0.0 }
 0x775   : > { %v5293_v41 = vpop.permute.xlu0 %2909  ;;  %v2490_v3 = vsub.f32 %v2394_v56, %v2469_v22 }
 0x776   : > { %2532 = vadd.xlane.f32.xlu0 %v2504_v55  ;;  %2964 = vadd.xlane.f32.xlu1 %v2944_v19  ;;  %v2854_v19 = vmul.f32 %v5223_v39, %v5114_v38  ;;  %v2936_v38 = vsub.f32 %v2856_v8, %v5293_v41 }
 0x777   : > { %v2506_v12 = vmax.f32 %v2490_v3, 0.0 }
 0x778   : > { %v2934_v28 = vsub.f32 %v2854_v19, %v5265_v47  ;;  %v2853_v47 = vmul.f32 %v5223_v39, %v5111_v30  ;;  %v2952_v17 = vmax.f32 %v2936_v38, 0.0  ;;  %v5591_v30 = vld [vmem:[#allocation54_spill] sm:$0xff] }
 0x77a   : > { %v2434_v57 = vpop.permute.xlu0 %2433  ;;  %2740 = vadd.xlane.f32.xlu0 %v2720_v5  ;;  %v2694_v5 = vpop.permute.xlu1 %2693 }
 0x77b   : > { %v2483_v59 = vsub.f32 %v2387_v54, %v2434_v57  ;;  %v2950_v54 = vmax.f32 %v2934_v28, 0.0  ;;  %v2722_v57 = vmax.f32 %v2706_v36, 0.0 }
 0x77d   : > { %v2499_v2 = vmax.f32 %v2483_v59, 0.0  ;;  %v2714_v59 = vsub.f32 %v2634_v40, %v2694_v5 }
 0x77e   : > { %v2474_v26 = vpop.permute.xlu0 %2473  ;;  %2756 = vadd.xlane.f32.xlu0 %v2728_v15 }
 0x77f   : > { %v2491_v58 = vsub.f32 %v2395_v50, %v2474_v26  ;;  %2522 = vadd.xlane.f32.xlu1 %v2499_v2  ;;  %v2933_v50 = vsub.f32 %v2853_v47, %v5235_v31  ;;  %v2730_v2 = vmax.f32 %v2714_v59, 0.0 }
 0x781   : > { %v2507_v49 = vmax.f32 %v2491_v58, 0.0  ;;  %v2855_v58 = vmul.f32 %v5223_v39, %v5116_v11  ;;  %v2949_v41 = vmax.f32 %v2933_v50, 0.0 }
 0x783   : > { %v2666_v34 = vpop.permute.xlu0 %2665  ;;  %2538 = vadd.xlane.f32.xlu1 %v2507_v49  ;;  %v2935_v49 = vsub.f32 %v2855_v58, %v5261_v21 }
 0x784   : > { %v2707_v14 = vsub.f32 %v2627_v45, %v2666_v34  ;;  %v2857_v45 = vmul.f32 %v5223_v39, %v5591_v30  ;;  %v2859_v34 = vmul.f32 %v5223_v39, %v5166_v0 }
 0x785   : > { %v2951_v23 = vmax.f32 %v2935_v49, 0.0 }
 0x786   : > { %v2723_v29 = vmax.f32 %v2707_v14, 0.0  ;;  %v2937_v31 = vsub.f32 %v2857_v45, %v5285_v53  ;;  %v2939_v11 = vsub.f32 %v2859_v34, %v5301_v20 }
 0x787   : > { %v2698_v13 = vpop.permute.xlu0 %2697 }
 0x788   : > { %v2715_v37 = vsub.f32 %v2635_v60, %v2698_v13  ;;  %2746 = vadd.xlane.f32.xlu1 %v2723_v29  ;;  %v2953_v14 = vmax.f32 %v2937_v31, 0.0  ;;  %v2955_v10 = vmax.f32 %v2939_v11, 0.0  ;;  %v3645_v29 = vmov 0.0  }
 0x789   : > { %1442 = vst.msk [vmem:[#allocation3] sm:$0x1] %vm1441_vm5, %v3645_v29 }
 0x78a   : > { %v2731_v4 = vmax.f32 %v2715_v37, 0.0 }
 0x78c   : > { %v2890_v9 = vpop.permute.xlu0 %2889  ;;  %2762 = vadd.xlane.f32.xlu1 %v2731_v4 }
 0x78d   : > { %v2931_v46 = vsub.f32 %v2851_v61, %v2890_v9 }
 0x78f   : > { %v2947_v35 = vmax.f32 %v2931_v46, 0.0 }
 0x790   : > { %v2886_v52 = vpop.permute.xlu0 %2885 }
 0x791   : > { %v2930_v27 = vsub.f32 %v2850_v63, %v2886_v52  ;;  %2970 = vadd.xlane.f32.xlu0 %v2947_v35 }
 0x793   : > { %v2946_v55 = vmax.f32 %v2930_v27, 0.0 }
 0x794   : > { %v2918_v15 = vpop.permute.xlu0 %2917 }
 0x795   : > { %2968 = vadd.xlane.f32.xlu1 %v2946_v55  ;;  %2520 = vadd.xlane.f32.xlu0 %v2498_v32  ;;  %v2938_v26 = vsub.f32 %v2858_v48, %v2918_v15 }
 0x797   : > { %v2954_v62 = vmax.f32 %v2938_v26, 0.0 }
 0x799   : > { %2972 = vadd.xlane.f32.xlu1 %v2948_v18  ;;  %2536 = vadd.xlane.f32.xlu0 %v2506_v12 }
 0x79d   : > { %2976 = vadd.xlane.f32.xlu1 %v2950_v54  ;;  %2744 = vadd.xlane.f32.xlu0 %v2722_v57 }
 0x7a1   : > { %2980 = vadd.xlane.f32.xlu1 %v2952_v17  ;;  %2760 = vadd.xlane.f32.xlu0 %v2730_v2 }
 0x7a5   : > { %2984 = vadd.xlane.f32.xlu1 %v2954_v62  ;;  %2974 = vadd.xlane.f32.xlu0 %v2949_v41 }
 0x7a9   : > { %2978 = vadd.xlane.f32.xlu0 %v2951_v23 }
 0x7ad   : > { %2982 = vadd.xlane.f32.xlu0 %v2953_v14 }
 0x7b1   : > { %2986 = vadd.xlane.f32.xlu0 %v2955_v10 }
 0x7b3   : > { %v2527_v21 = vpop.xlane.xlu1 %2526 }
 0x7bc   : > { %v2751_v60 = vpop.xlane.xlu1 %2750 }
 0x7bd   : > { %v5342_v1 = vadd.f32 %v2751_v60, %v2527_v21 }
 0x7c0   : > { %v2959_v4 = vpop.xlane.xlu1 %2958 }
 0x7c1   : > { %v2511_v13 = vpop.xlane.xlu0 %2510 }
 0x7c4   : > { %v2509_v61 = vpop.xlane.xlu1 %2508 }
 0x7c5   : > { %v2735_v53 = vpop.xlane.xlu0 %2734 }
 0x7c6   : > { %v2765_v36 = vadd.f32 %v2735_v53, %v2511_v13 }
 0x7c8   : > { %v2733_v20 = vpop.xlane.xlu1 %2732  ;;  %v2989_v57 = vadd.f32 %v2959_v4, %v2765_v36 }
 0x7c9   : > { %v2525_v37 = vpop.xlane.xlu0 %2524  ;;  %v2764_v5 = vadd.f32 %v2733_v20, %v2509_v61 }
 0x7cc   : > { %v2515_v22 = vpop.xlane.xlu1 %2514 }
 0x7cd   : > { %v2749_v0 = vpop.xlane.xlu0 %2748 }
 0x7ce   : > { %v2772_v39 = vadd.f32 %v2749_v0, %v2525_v37 }
 0x7d0   : > { %v2531_v33 = vpop.xlane.xlu1 %2530 }
 0x7d1   : > { %v2957_v9 = vpop.xlane.xlu0 %2956 }
 0x7d2   : > { %v2988_v42 = vadd.f32 %v2957_v9, %v2764_v5 }
 0x7d4   : > { %v2739_v63 = vpop.xlane.xlu1 %2738  ;;  %v3005_v38 = vadd.f32 %v2989_v57, %v2988_v42 }
 0x7d5   : > { %v2767_v50 = vadd.f32 %v2739_v63, %v2515_v22 }
 0x7d8   : > { %v2755_v35 = vpop.xlane.xlu1 %2754 }
 0x7d9   : > { %v2775_v22 = vadd.f32 %v2755_v35, %v2531_v33 }
 0x7dc   : > { %v2963_v16 = vpop.xlane.xlu0 %2962 }
 0x7dd   : > { %v2991_v17 = vadd.f32 %v2963_v16, %v2767_v50 }
 0x7e0   : > { %v2513_v46 = vpop.xlane.xlu0 %2512 }
 0x7e4   : > { %v2529_v7 = vpop.xlane.xlu0 %2528 }
 0x7e8   : > { %v2737_v52 = vpop.xlane.xlu0 %2736 }
 0x7e9   : > { %v2519_v25 = vpop.xlane.xlu1 %2518  ;;  %v2766_v40 = vadd.f32 %v2737_v52, %v2513_v46 }
 0x7ec   : > { %v2753_v56 = vpop.xlane.xlu0 %2752 }
 0x7ed   : > { %v2535_v44 = vpop.xlane.xlu1 %2534  ;;  %v2774_v4 = vadd.f32 %v2753_v56, %v2529_v7 }
 0x7f0   : > { %v2961_v27 = vpop.xlane.xlu0 %2960 }
 0x7f1   : > { %v2990_v59 = vadd.f32 %v2961_v27, %v2766_v40 }
 0x7f2   : > { %v2743_v43 = vpop.xlane.xlu1 %2742 }
 0x7f3   : > { %v3006_v2 = vadd.f32 %v3005_v38, %v2990_v59  ;;  %v2769_v62 = vadd.f32 %v2743_v43, %v2519_v25 }
 0x7f5   : > { %v3007_v41 = vadd.f32 %v3006_v2, %v2991_v17 }
 0x7f6   : > { %v2759_v32 = vpop.xlane.xlu1 %2758 }
 0x7f7   : > { %v2777_v27 = vadd.f32 %v2759_v32, %v2535_v44  ;;  %v3004_v44 = vld [vmem:[#allocation3] sm:$0x1] }
 0x7fb   : > { %v2967_v51 = vpop.xlane.xlu0 %2966 }
 0x7fc   : > { %v2993_v23 = vadd.f32 %v2967_v51, %v2769_v62 }
 0x7ff   : > { %v2517_v3 = vpop.xlane.xlu0 %2516 }
 0x803   : > { %v2965_v55 = vpop.xlane.xlu1 %2964  ;;  %v2533_v24 = vpop.xlane.xlu0 %2532 }
 0x807   : > { %v2741_v18 = vpop.xlane.xlu0 %2740 }
 0x808   : > { %v2768_v15 = vadd.f32 %v2741_v18, %v2517_v3 }
 0x80a   : > { %v2992_v26 = vadd.f32 %v2965_v55, %v2768_v15 }
 0x80b   : > { %v2757_v12 = vpop.xlane.xlu0 %2756 }
 0x80c   : > { %v2523_v6 = vpop.xlane.xlu1 %2522  ;;  %v3008_v30 = vadd.f32 %v3007_v41, %v2992_v26  ;;  %v2776_v63 = vadd.f32 %v2757_v12, %v2533_v24 }
 0x80e   : > { %v3009_v14 = vadd.f32 %v3008_v30, %v2993_v23 }
 0x810   : > { %v2539_v19 = vpop.xlane.xlu1 %2538 }
 0x815   : > { %v2747_v28 = vpop.xlane.xlu1 %2746 }
 0x816   : > { %v2771_v34 = vadd.f32 %v2747_v28, %v2523_v6 }
 0x819   : > { %v2763_v8 = vpop.xlane.xlu1 %2762 }
 0x81a   : > { %v2779_v7 = vadd.f32 %v2763_v8, %v2539_v19 }
 0x81e   : > { %v2971_v54 = vpop.xlane.xlu0 %2970 }
 0x81f   : > { %v2995_v60 = vadd.f32 %v2971_v54, %v2771_v34 }
 0x822   : > { %v2521_v47 = vpop.xlane.xlu0 %2520  ;;  %v2969_v48 = vpop.xlane.xlu1 %2968 }
 0x826   : > { %v2537_v58 = vpop.xlane.xlu0 %2536  ;;  %v2973_v49 = vpop.xlane.xlu1 %2972 }
 0x827   : > { %v2996_v13 = vadd.f32 %v2973_v49, %v2772_v39 }
 0x82a   : > { %v2745_v45 = vpop.xlane.xlu0 %2744  ;;  %v2977_v10 = vpop.xlane.xlu1 %2976 }
 0x82b   : > { %v2770_v31 = vadd.f32 %v2745_v45, %v2521_v47  ;;  %v2998_v9 = vadd.f32 %v2977_v10, %v2774_v4 }
 0x82d   : > { %v2994_v11 = vadd.f32 %v2969_v48, %v2770_v31 }
 0x82e   : > { %v2761_v21 = vpop.xlane.xlu0 %2760  ;;  %v2981_v20 = vpop.xlane.xlu1 %2980 }
 0x82f   : > { %v3010_v29 = vadd.f32 %v3009_v14, %v2994_v11  ;;  %v3000_v43 = vadd.f32 %v2981_v20, %v2776_v63  ;;  %v2778_v39 = vadd.f32 %v2761_v21, %v2537_v58 }
 0x831   : > { %v3011_v53 = vadd.f32 %v3010_v29, %v2995_v60 }
 0x832   : > { %v2975_v37 = vpop.xlane.xlu0 %2974  ;;  %v2985_v3 = vpop.xlane.xlu1 %2984 }
 0x833   : > { %v2997_v0 = vadd.f32 %v2975_v37, %v5342_v1  ;;  %v3012_v61 = vadd.f32 %v3011_v53, %v2996_v13  ;;  %v3002_v56 = vadd.f32 %v2985_v3, %v2778_v39 }
 0x835   : > { %v3013_v16 = vadd.f32 %v3012_v61, %v2997_v0 }
 0x836   : > { %v2979_v46 = vpop.xlane.xlu0 %2978 }
 0x837   : > { %v2999_v52 = vadd.f32 %v2979_v46, %v2775_v22  ;;  %v3014_v25 = vadd.f32 %v3013_v16, %v2998_v9 }
 0x839   : > { %v3015_v51 = vadd.f32 %v3014_v25, %v2999_v52 }
 0x83a   : > { %v2983_v55 = vpop.xlane.xlu0 %2982 }
 0x83b   : > { %v3001_v6 = vadd.f32 %v2983_v55, %v2777_v27  ;;  %v3016_v18 = vadd.f32 %v3015_v51, %v3000_v43 }
 0x83d   : > { %v3017_v1 = vadd.f32 %v3016_v18, %v3001_v6 }
 0x83e   : > { %v2987_v28 = vpop.xlane.xlu0 %2986 }
 0x83f   : > { %v3003_v36 = vadd.f32 %v2987_v28, %v2779_v7  ;;  %v3018_v33 = vadd.f32 %v3017_v1, %v3002_v56 }
 0x841   : > { %v3019_v35 = vadd.f32 %v3018_v33, %v3003_v36 }
 0x843   : > { %v3020_v5 = vrot.slane %v3019_v35, 4 }
 0x845   : > { %v3021_v42 = vadd.f32 %v3020_v5, %v3019_v35 }
 0x847   : > { %v3022_v24 = vrot.slane %v3021_v42, 2 }
 0x849   : > { %v3023_v12 = vadd.f32 %v3022_v24, %v3021_v42 }
 0x84b   : > { %v3024_v40 = vrot.slane %v3023_v12, 1 }
 0x84d   : > { %v3025_v32 = vadd.f32 %v3024_v40, %v3023_v12 }
 0x84f   : > { %v3026_v54 = vadd.f32 %v3025_v32, %v3004_v44 }
 0x851   : > { %3028 = vst.msk [vmem:[#allocation3] sm:$0x1] %vm1441_vm5, %v3026_v54 }
 0x852 PF: > { %p5349_p6 = scmp.eq.s32.totalorder %s3121_s21, 1  ;;  %s3646_s29 = smov [#allocation3]  }
 0x853   : > { %s3036_s30 = sshll.u32 %s3646_s29, 4  ;;  %s3037_s30 = int_to_ptr.vmem [resolvable:$true] %s3036_s30 }
 0x854   : > { %s3574_s6 = scalar_lea.vmem %s3037_s30, 16  ;;  %s3580_s7 = scalar_lea.vmem %s3037_s30, 32 }
 0x855   : > { %p3575_p7 = scmp.ne.s32.totalorder %s3037_s30, %s3574_s6  ;;  %p3581_p10 = scmp.lt.s32.totalorder %s3037_s30, %s3037_s30 }
 0x856   : > { %p3582_p11 = scmp.lt.s32.totalorder %s3580_s7, %s3574_s6 }
 0x857   : > { %p3576_p8 = pnand %p3575_p7, %p5349_p6 }
 0x858   : > { %p3583_p12 = por %p3582_p11, %p3581_p10 }
 0x859   : > { %p3577_p9 = pneg %p3576_p8 }
 0x85b   : > { %p3584_p13 = pnand %p3583_p12, %p3577_p9 }
 0x85d   : > { %3587 = shalt.err (!%p3584_p13)
}
 0x85e   : > { %s3588_s9 = scalar_lea.hbm %s5389_s5, 16 }
 0x85f   : > { %p3589_p0 = scmp.ne.s32.totalorder %s5389_s5, %s3588_s9  ;;  %p3594_p3 = scmp.lt.u32.totalorder %s3588_s9, %s5389_s5 }
 0x861   : > { %p3590_p1 = pnand %p3589_p0, %p5349_p6 }
 0x863   : > { %p3591_p2 = pneg %p3590_p1 }
 0x865   : > { %p3596_p4 = pnand %p3594_p3, %p3591_p2 }
 0x867   : > { %3599 = shalt.err (!%p3596_p4)
}
 0x868   : > { %3446 = dma.vmem_to_hbm [thread:$0]  (%p5349_p6), %s3037_s30, 16, %s5389_s5, [#allocation4]  }
 0x869   : > { %3613 = dma.done.wait (%p5349_p6), [#allocation4], 16  }
 0x86a   : > { %3615 = vsyncadd (%p5349_p6), [#allocation4], 4294967280 }
 0x86b PF: > { %s16_s20 = sadd.s32 1, %s3626_s20   ;;  %s5593_s18 = smov %s3622_s19 }
 0x86c   : > { %p13_p5 = scmp.ge.s32.totalorder %s16_s20, 4   ;;  %s5594_s19 = smov %s5596_s22 }
 0x86e   :  { %15 = sbr.rel (!%p13_p5) target bundleno = 2 (0x2), region = 87 }
 0x875   :  { %3049 = vsyncpa [#allocation4], 1 }
 0x876   :  { %3051 = vsyncpa [#allocation4 + $0x1], 1 }

// kernel: dc_mixhop_forward.5
= control target key start
LH: loop header
LB: loop body
LE: loop exit
PB: predicated region body
PF: predicated region fallthrough
CT: control target
= control target key end

     0   :  { %v3079_v0 = vmov 0   ;;  %vm495_vm0 = vcmask 261120   ;;  %vm2068_vm1 = vcmask 64512   ;;  %s4287_s2 = inlined_call_operand.vmem [shape: f32[128,2], index: 2, kind: input, shape index: {}]   ;;  %s4288_s0 = inlined_call_operand.vmem [shape: bf16[128,128], index: 0, kind: input, shape index: {}]   ;;  %s4289_s1 = inlined_call_operand.vmem [shape: f32[128,32], index: 1, kind: input, shape index: {}]   ;;  %s4290_s4 = inlined_call_operand.vmem [shape: f32[32,32], index: 4, kind: input, shape index: {}]   ;;  %s4291_s3 = inlined_call_operand.vmem [shape: f32[32,32], index: 3, kind: input, shape index: {}]   ;;  %s4292_s5 = inlined_call_operand.vmem [shape: f32[32,32], index: 5, kind: input, shape index: {}]   ;;  %s4293_s7 = inlined_call_operand.vmem [shape: f32[32,8], index: 7, kind: input, shape index: {}]   ;;  %s4294_s6 = inlined_call_operand.vmem [shape: f32[32,8], index: 6, kind: input, shape index: {}]   ;;  %s4295_s8 = inlined_call_operand.vmem [shape: f32[32,8], index: 8, kind: input, shape index: {}]   ;;  %s4296_s9 = inlined_call_operand.vmem [shape: f32[128,8], index: 9, kind: output, shape index: {}]  }
   0x1   :  { %3004 = vset.pattern.permute.xlu1 %v3079_v0  ;;  %3003 = vset.pattern.permute.xlu0 %v3079_v0  ;;  %v3134_v1 = vld [vmem:[%s4287_s2 + $0x10] sm:$0xff]  ;;  %v3139_v2 = vld [vmem:[%s4287_s2] sm:$0xff]  ;;  %v3146_v3 = vld [vmem:[%s4287_s2 + $0x18] sm:$0xff] }
   0x2   :  { %105 = vperm.xlu1 %3004, %v3134_v1   ;;  %95 = vperm.xlu0 %3003, %v3139_v2   ;;  %v3151_v4 = vld [vmem:[%s4287_s2 + $0x8] sm:$0xff]  ;;  %v3163_v6 = vld [vmem:[%s4287_s2 + $0x20] sm:$0xff]  ;;  %v3170_v7 = vld [vmem:[%s4287_s2 + $0x38] sm:$0xff] }
   0x3   :  { %v3158_v5 = vld [vmem:[%s4287_s2 + $0x28] sm:$0xff]  ;;  %v3175_v8 = vld [vmem:[%s4287_s2 + $0x30] sm:$0xff]  ;;  %v3187_v10 = vld [vmem:[%s4287_s2 + $0x40] sm:$0xff] }
   0x4   :  { %v3182_v9 = vld [vmem:[%s4287_s2 + $0x48] sm:$0xff]  ;;  %v3194_v11 = vld [vmem:[%s4287_s2 + $0x58] sm:$0xff]  ;;  %v3199_v12 = vld [vmem:[%s4287_s2 + $0x50] sm:$0xff] }
   0x5   :  { %4334 = vst [vmem:[#allocation2_spill] sm:$0xff] %v3194_v11  ;;  %4335 = vst [vmem:[#allocation3_spill] sm:$0xff] %v3199_v12  ;;  %v3206_v13 = vld [vmem:[%s4287_s2 + $0x68] sm:$0xff]  ;;  %v3211_v14 = vld [vmem:[%s4287_s2 + $0x60] sm:$0xff] }
   0x6   :  { %110 = vperm.xlu1 %3004, %v3146_v3   ;;  %100 = vperm.xlu0 %3003, %v3151_v4   ;;  %4336 = vst [vmem:[#allocation4_spill] sm:$0xff] %v3206_v13  ;;  %4337 = vst [vmem:[#allocation5_spill] sm:$0xff] %v3211_v14  ;;  %v3218_v15 = vld [vmem:[%s4287_s2 + $0x78] sm:$0xff]  ;;  %v3223_v16 = vld [vmem:[%s4287_s2 + $0x70] sm:$0xff] }
   0x7   :  { %4338 = vst [vmem:[#allocation6_spill] sm:$0xff] %v3218_v15  ;;  %4339 = vst [vmem:[#allocation7_spill] sm:$0xff] %v3223_v16  ;;  %v3230_v17 = vld [vmem:[%s4288_s0] sm:$0xff]   ;;  %v3241_v20 = vld [vmem:[%s4289_s1 + $0x10] sm:$0xff] }
   0x8   :  { %4340 = vst [vmem:[#allocation8_spill] sm:$0xff] %v3230_v17  ;;  %2585 = vmatprep.mubr.bf16.mxu0 %v3230_v17  ;;  %2745 = vmatprep.mubr.bf16.mxu1 %v3230_v17  ;;  %v3246_v21 = vld [vmem:[%s4289_s1 + $0x18] sm:$0xff]  ;;  %v3251_v22 = vld [vmem:[%s4289_s1] sm:$0xff]  ;;  %v3256_v23 = vld [vmem:[%s4289_s1 + $0x8] sm:$0xff] }
   0x9   :  { %v3273_v30 = vld [vmem:[%s4289_s1 + $0x28] sm:$0xff]  ;;  %v3278_v31 = vld [vmem:[%s4289_s1 + $0x20] sm:$0xff]  ;;  %v3291_v38 = vld [vmem:[%s4289_s1 + $0x38] sm:$0xff] }
   0xa   :  { %120 = vperm.xlu1 %3004, %v3158_v5   ;;  %115 = vperm.xlu0 %3003, %v3163_v6   ;;  %v3296_v39 = vld [vmem:[%s4289_s1 + $0x30] sm:$0xff]  ;;  %v3309_v45 = vld [vmem:[%s4289_s1 + $0x48] sm:$0xff]  ;;  %v3314_v46 = vld [vmem:[%s4289_s1 + $0x40] sm:$0xff] }
   0xb   :  { %v3327_v52 = vld [vmem:[%s4289_s1 + $0x58] sm:$0xff]  ;;  %v3332_v53 = vld [vmem:[%s4289_s1 + $0x50] sm:$0xff]  ;;  %v3345_v59 = vld [vmem:[%s4289_s1 + $0x68] sm:$0xff] }
   0xc   :  { %v3350_v60 = vld [vmem:[%s4289_s1 + $0x60] sm:$0xff] }
   0xe   :  { %130 = vperm.xlu1 %3004, %v3170_v7   ;;  %125 = vperm.xlu0 %3003, %v3175_v8  }
  0x12   :  { %140 = vperm.xlu1 %3004, %v3182_v9   ;;  %135 = vperm.xlu0 %3003, %v3187_v10  }
  0x16   :  { %150 = vperm.xlu1 %3004, %v3194_v11   ;;  %145 = vperm.xlu0 %3003, %v3199_v12  }
  0x1a   :  { %160 = vperm.xlu1 %3004, %v3206_v13   ;;  %155 = vperm.xlu0 %3003, %v3211_v14  }
  0x1e   :  { %170 = vperm.xlu1 %3004, %v3218_v15   ;;  %165 = vperm.xlu0 %3003, %v3223_v16  }
  0x81   :  { %v3234_v18 = vpop.permute.xlu1 %105  ;;  %v3236_v19 = vpop.permute.xlu0 %95 }
  0x82   :  { %4341 = vst [vmem:[#allocation9_spill] sm:$0xff] %v3234_v18  ;;  %4342 = vst [vmem:[#allocation10_spill] sm:$0xff] %v3236_v19  ;;  %v175_v26 = vmul.f32 %v3234_v18, %v3241_v20  ;;  %v173_v28 = vmul.f32 %v3236_v19, %v3251_v22 }
  0x85   :  { %v3258_v24 = vpop.permute.xlu1 %110  ;;  %v3260_v25 = vpop.permute.xlu0 %100 }
  0x86   :  { %4343 = vst [vmem:[#allocation11_spill] sm:$0xff] %v3258_v24  ;;  %4344 = vst [vmem:[#allocation12_spill] sm:$0xff] %v3260_v25  ;;  %v176_v27 = vmul.f32 %v3258_v24, %v3246_v21  ;;  %v174_v29 = vmul.f32 %v3260_v25, %v3256_v23 }
  0x88   :  { %v189_v32 = vpack.c.bf16 %v174_v29, %v173_v28  ;;  %v190_v37 = vpack.c.bf16 %v176_v27, %v175_v26  ;;  %v3363_v27 = vld [vmem:[%s4289_s1 + $0x78] sm:$0xff]  ;;  %v3368_v28 = vld [vmem:[%s4289_s1 + $0x70] sm:$0xff] }
  0x89   :  { %v3280_v33 = vpop.permute.xlu1 %120  ;;  %v3282_v34 = vpop.permute.xlu0 %115 }
  0x8a   :  { %4345 = vst [vmem:[#allocation13_spill] sm:$0xff] %v3280_v33  ;;  %4346 = vst [vmem:[#allocation14_spill] sm:$0xff] %v3282_v34  ;;  %v178_v35 = vmul.f32 %v3280_v33, %v3273_v30  ;;  %v177_v36 = vmul.f32 %v3282_v34, %v3278_v31  ;;  %2569 = vmatprep.subr.bf16.mxu0 %v189_v32 }
  0x8b   :  { %2570 = vmatpush3.bf16.msra.mxu0 %v189_v32 }
  0x8c   :  { %2571 = vmatprep.subr.bf16.mxu0 %v190_v37  ;;  %v191_v44 = vpack.c.bf16 %v178_v35, %v177_v36 }
  0x8d   :  { %v3298_v40 = vpop.permute.xlu1 %130  ;;  %v3300_v41 = vpop.permute.xlu0 %125 }
  0x8e   :  { %4347 = vst [vmem:[#allocation15_spill] sm:$0xff] %v3298_v40  ;;  %4348 = vst [vmem:[#allocation16_spill] sm:$0xff] %v3300_v41  ;;  %v180_v42 = vmul.f32 %v3298_v40, %v3291_v38  ;;  %v179_v43 = vmul.f32 %v3300_v41, %v3296_v39 }
  0x8f   :  { %2572 = vmatpush3.bf16.msra.mxu0 %v190_v37 }
  0x90   :  { %2573 = vmatprep.subr.bf16.mxu0 %v191_v44  ;;  %v192_v51 = vpack.c.bf16 %v180_v42, %v179_v43  ;;  %v3381_v43 = vld [vmem:[%s4288_s0 + $0x8] sm:$0xff]  }
  0x91   :  { %v3316_v47 = vpop.permute.xlu1 %140  ;;  %v3318_v48 = vpop.permute.xlu0 %135 }
  0x92   :  { %4349 = vst [vmem:[#allocation17_spill] sm:$0xff] %v3316_v47  ;;  %4350 = vst [vmem:[#allocation18_spill] sm:$0xff] %v3318_v48  ;;  %v182_v49 = vmul.f32 %v3316_v47, %v3309_v45  ;;  %v181_v50 = vmul.f32 %v3318_v48, %v3314_v46 }
  0x93   :  { %2574 = vmatpush3.bf16.msra.mxu0 %v191_v44  ;;  %v3386_v44 = vld [vmem:[%s4288_s0 + $0x10] sm:$0xff]  }
  0x94   :  { %2575 = vmatprep.subr.bf16.mxu0 %v192_v51  ;;  %v193_v58 = vpack.c.bf16 %v182_v49, %v181_v50  ;;  %v3393_v49 = vld [vmem:[%s4288_s0 + $0x18] sm:$0xff]   ;;  %v3398_v50 = vld [vmem:[%s4288_s0 + $0x20] sm:$0xff]  }
  0x95   :  { %v3334_v54 = vpop.permute.xlu1 %150  ;;  %v3336_v55 = vpop.permute.xlu0 %145 }
  0x96   :  { %4351 = vst [vmem:[#allocation19_spill] sm:$0xff] %v3334_v54  ;;  %v184_v56 = vmul.f32 %v3334_v54, %v3327_v52  ;;  %v183_v57 = vmul.f32 %v3336_v55, %v3332_v53 }
  0x97   :  { %2576 = vmatpush3.bf16.msra.mxu0 %v192_v51  ;;  %v3405_v51 = vld [vmem:[%s4288_s0 + $0x28] sm:$0xff]  }
  0x98   :  { %2577 = vmatprep.subr.bf16.mxu0 %v193_v58  ;;  %v194_v26 = vpack.c.bf16 %v184_v56, %v183_v57  ;;  %v3410_v56 = vld [vmem:[%s4288_s0 + $0x30] sm:$0xff]   ;;  %v3417_v57 = vld [vmem:[%s4288_s0 + $0x38] sm:$0xff]  }
  0x99   :  { %v3352_v61 = vpop.permute.xlu1 %160  ;;  %v3354_v62 = vpop.permute.xlu0 %155 }
  0x9a   :  { %v186_v63 = vmul.f32 %v3352_v61, %v3345_v59  ;;  %v185_v0 = vmul.f32 %v3354_v62, %v3350_v60 }
  0x9b   :  { %2578 = vmatpush3.bf16.msra.mxu0 %v193_v58 }
  0x9c   :  { %2579 = vmatprep.subr.bf16.mxu0 %v194_v26  ;;  %v195_v37 = vpack.c.bf16 %v186_v63, %v185_v0 }
  0x9d   :  { %v3370_v29 = vpop.permute.xlu1 %170  ;;  %v3372_v32 = vpop.permute.xlu0 %165 }
  0x9e   :  { %4352 = vst [vmem:[#allocation20_spill] sm:$0xff] %v3370_v29  ;;  %v188_v35 = vmul.f32 %v3370_v29, %v3363_v27  ;;  %v187_v36 = vmul.f32 %v3372_v32, %v3368_v28 }
  0x9f   :  { %2580 = vmatpush3.bf16.msra.mxu0 %v194_v26 }
  0xa0   :  { %2581 = vmatprep.subr.bf16.mxu0 %v195_v37  ;;  %v196_v42 = vpack.c.bf16 %v188_v35, %v187_v36 }
  0xa3   :  { %2582 = vmatpush3.bf16.msra.mxu0 %v195_v37 }
  0xa4   :  { %2583 = vmatprep.subr.bf16.mxu0 %v196_v42 }
  0xa7   :  { %2584 = vmatpush3.bf16.msra.mxu0 %v196_v42 }
  0xaa   :  { %2586 = vmatmul.mubr.bf16.vlgmr.msra.gmra.mrb[0].mxu0 %v3381_v43 }
  0xab   :  { %2589 = vmatprep.mubr.bf16.mxu0 %v3386_v44 }
  0xb2   :  { %2590 = vmatmul.mubr.bf16.gmra.mrb[4].mxu0 %v3393_v49 }
  0xb3   :  { %2593 = vmatprep.mubr.bf16.mxu0 %v3398_v50 }
  0xba   :  { %2594 = vmatmul.mubr.bf16.gmra.mrb[8].mxu0 %v3405_v51 }
  0xbb   :  { %2597 = vmatprep.mubr.bf16.mxu0 %v3410_v56 }
  0xc2   :  { %2598 = vmatmul.mubr.bf16.gmra.mrb[12].mxu0 %v3417_v57 }
  0xc3   :  { %2617 = vmatprep.mubr.bf16.mxu0 %v3230_v17 }
 0x17d   :  { %v2587_v58 = vpop.f32.mrb[0].mxu0 }
 0x17e   :  { %v279_v63 = vpop.f32.mrb[1].mxu0  ;;  %v3428_v37 = vmul.f32 %v2587_v58, %v3234_v18 }
 0x17f   :  { %v3422_v0 = vmul.f32 %v279_v63, %v3236_v19  ;;  %v2588_v26 = vpop.f32.mrb[2].mxu0 }
 0x180   :  { %v3425_v35 = vmul.f32 %v2588_v26, %v3258_v24  ;;  %v282_v36 = vpop.f32.mrb[3].mxu0  ;;  %v360_v26 = vmul.f32 %v3428_v37, %v3234_v18 }
 0x181   :  { %v3431_v42 = vmul.f32 %v282_v36, %v3260_v25  ;;  %v358_v15 = vmul.f32 %v3422_v0, %v3236_v19 }
 0x182   :  { %v361_v17 = vmul.f32 %v3425_v35, %v3258_v24 }
 0x183   :  { %v359_v63 = vmul.f32 %v3431_v42, %v3260_v25 }
 0x184   :  { %v375_v11 = vpack.c.bf16 %v361_v17, %v360_v26 }
 0x185   :  { %v2591_v16 = vpop.f32.mrb[4].mxu0  ;;  %v374_v13 = vpack.c.bf16 %v359_v63, %v358_v15 }
 0x186   :  { %v295_v14 = vpop.f32.mrb[5].mxu0  ;;  %v3448_v24 = vmul.f32 %v2591_v16, %v3300_v41 }
 0x187   :  { %v3442_v58 = vmul.f32 %v295_v14, %v3282_v34  ;;  %v2592_v36 = vpop.f32.mrb[6].mxu0  ;;  %2601 = vmatprep.subr.bf16.mxu0 %v374_v13 }
 0x188   :  { %v3445_v19 = vmul.f32 %v2592_v36, %v3298_v40  ;;  %v298_v12 = vpop.f32.mrb[7].mxu0  ;;  %2602 = vmatpush3.bf16.msra.mxu0 %v374_v13  ;;  %v364_v13 = vmul.f32 %v3448_v24, %v3300_v41 }
 0x189   :  { %v3451_v25 = vmul.f32 %v298_v12, %v3280_v33  ;;  %2603 = vmatprep.subr.bf16.mxu0 %v375_v11  ;;  %v362_v15 = vmul.f32 %v3442_v58, %v3282_v34 }
 0x18a   :  { %v365_v14 = vmul.f32 %v3445_v19, %v3298_v40 }
 0x18b   :  { %v363_v17 = vmul.f32 %v3451_v25, %v3280_v33 }
 0x18c   :  { %2604 = vmatpush3.bf16.msra.mxu0 %v375_v11  ;;  %v377_v18 = vpack.c.bf16 %v365_v14, %v364_v13 }
 0x18d   :  { %v2595_v63 = vpop.f32.mrb[8].mxu0  ;;  %v376_v16 = vpack.c.bf16 %v363_v17, %v362_v15 }
 0x18e   :  { %v311_v26 = vpop.f32.mrb[9].mxu0  ;;  %v3468_v33 = vmul.f32 %v2595_v63, %v3336_v55 }
 0x18f   :  { %v3462_v12 = vmul.f32 %v311_v26, %v3318_v48  ;;  %v2596_v36 = vpop.f32.mrb[10].mxu0  ;;  %2605 = vmatprep.subr.bf16.mxu0 %v376_v16 }
 0x190   :  { %v3465_v34 = vmul.f32 %v2596_v36, %v3334_v54  ;;  %v314_v40 = vpop.f32.mrb[11].mxu0  ;;  %2606 = vmatpush3.bf16.msra.mxu0 %v376_v16  ;;  %v368_v13 = vmul.f32 %v3468_v33, %v3336_v55 }
 0x191   :  { %v3471_v11 = vmul.f32 %v314_v40, %v3316_v47  ;;  %2607 = vmatprep.subr.bf16.mxu0 %v377_v18  ;;  %v366_v15 = vmul.f32 %v3462_v12, %v3318_v48 }
 0x192   :  { %v369_v17 = vmul.f32 %v3465_v34, %v3334_v54 }
 0x193   :  { %v367_v14 = vmul.f32 %v3471_v11, %v3316_v47 }
 0x194   :  { %2608 = vmatpush3.bf16.msra.mxu0 %v377_v18  ;;  %v379_v41 = vpack.c.bf16 %v369_v17, %v368_v13 }
 0x195   :  { %v2599_v16 = vpop.f32.mrb[12].mxu0  ;;  %v378_v63 = vpack.c.bf16 %v367_v14, %v366_v15 }
 0x196   :  { %v327_v26 = vpop.f32.mrb[13].mxu0  ;;  %v3488_v47 = vmul.f32 %v2599_v16, %v3372_v32  ;;  %v85_v16 = vld [vmem:[%s4290_s4] sm:$0xff] }
 0x197   :  { %v3482_v40 = vmul.f32 %v327_v26, %v3354_v62  ;;  %v2600_v36 = vpop.f32.mrb[14].mxu0  ;;  %2609 = vmatprep.subr.bf16.mxu0 %v378_v63 }
 0x198   :  { %v3485_v48 = vmul.f32 %v2600_v36, %v3370_v29  ;;  %v330_v54 = vpop.f32.mrb[15].mxu0  ;;  %2610 = vmatpush3.bf16.msra.mxu0 %v378_v63  ;;  %v372_v17 = vmul.f32 %v3488_v47, %v3372_v32 }
 0x199   :  { %v355_v18 = vmul.f32 %v330_v54, %v3352_v61  ;;  %2611 = vmatprep.subr.bf16.mxu0 %v379_v41  ;;  %v370_v15 = vmul.f32 %v3482_v40, %v3354_v62  ;;  %v86_v54 = vld [vmem:[%s4290_s4 + $0x8] sm:$0xff] }
 0x19a   :  { %v373_v14 = vmul.f32 %v3485_v48, %v3370_v29  ;;  %v2889_v36 = vpack.c.bf16 %v86_v54, %v85_v16  ;;  %v81_v29 = vld [vmem:[%s4291_s3] sm:$0xff] }
 0x19b   :  { %v371_v26 = vmul.f32 %v355_v18, %v3352_v61  ;;  %v89_v54 = vld [vmem:[%s4292_s5] sm:$0xff] }
 0x19c   :  { %2612 = vmatpush3.bf16.msra.mxu0 %v379_v41  ;;  %v381_v63 = vpack.c.bf16 %v373_v14, %v372_v17  ;;  %v87_v41 = vld [vmem:[%s4290_s4 + $0x10] sm:$0xff]  ;;  %v82_v14 = vld [vmem:[%s4291_s3 + $0x8] sm:$0xff] }
 0x19d   :  { %v380_v13 = vpack.c.bf16 %v371_v26, %v370_v15  ;;  %v88_v15 = vld [vmem:[%s4290_s4 + $0x18] sm:$0xff]  ;;  %v2897_v17 = vpack.c.bf16 %v82_v14, %v81_v29  ;;  %v83_v29 = vld [vmem:[%s4291_s3 + $0x10] sm:$0xff] }
 0x19e   :  { %v2893_v26 = vpack.c.bf16 %v88_v15, %v87_v41  ;;  %v4369_v15 = vld [vmem:[#allocation19_spill] sm:$0xff] }
 0x19f   :  { %2613 = vmatprep.subr.bf16.mxu0 %v380_v13 }
 0x1a0   :  { %2614 = vmatpush3.bf16.msra.mxu0 %v380_v13  ;;  %v84_v13 = vld [vmem:[%s4291_s3 + $0x18] sm:$0xff] }
 0x1a1   :  { %2615 = vmatprep.subr.bf16.mxu0 %v381_v63  ;;  %v2901_v16 = vpack.c.bf16 %v84_v13, %v83_v29 }
 0x1a4   :  { %2616 = vmatpush3.bf16.msra.mxu0 %v381_v63  ;;  %v90_v63 = vld [vmem:[%s4292_s5 + $0x8] sm:$0xff] }
 0x1a5   :  { %2890 = vmatprep.subr.bf16.mxu0 %v2889_v36 }
 0x1a7   :  { %2618 = vmatmul.mubr.bf16.vlgmr.msra.gmra.mrb[16].mxu0 %v3381_v43 }
 0x1a8   :  { %2621 = vmatprep.mubr.bf16.mxu0 %v3386_v44  ;;  %2892 = vmatpush3.bf16.msra.mxu0 %v2889_v36 }
 0x1a9   :  { %2894 = vmatprep.subr.bf16.mxu0 %v2893_v26 }
 0x1ac   :  { %2896 = vmatpush3.bf16.msra.mxu0 %v2893_v26 }
 0x1ad   :  { %2898 = vmatprep.subr.bf16.mxu0 %v2897_v17 }
 0x1af   :  { %2622 = vmatmul.mubr.bf16.gmra.mrb[20].mxu0 %v3393_v49 }
 0x1b0   :  { %2625 = vmatprep.mubr.bf16.mxu0 %v3398_v50 }
 0x1b7   :  { %2626 = vmatmul.mubr.bf16.gmra.mrb[24].mxu0 %v3405_v51 }
 0x1b8   :  { %2629 = vmatprep.mubr.bf16.mxu0 %v3410_v56 }
 0x1bf   :  { %2630 = vmatmul.mubr.bf16.gmra.mrb[28].mxu0 %v3417_v57 }
 0x1c0   :  { %2641 = vmatprep.mubr.msk.f32.mxu0 %vm495_vm0, %v3422_v0  ;;  %v2905_v0 = vpack.c.bf16 %v90_v63, %v89_v54  ;;  %v4370_v63 = vld [vmem:[#allocation20_spill] sm:$0xff] }
 0x1c7   :  { %2642 = vmatmul.mubr.msk.f32.vlgmr.msra.gmra.mrb[32].mxu0 %vm495_vm0, %v3431_v42 }
 0x1c8   :  { %2644 = vmatprep.mubr.msk.f32.mxu0 %vm495_vm0, %v3428_v37  ;;  %2900 = vmatpush3.bf16.msra.mxu0 %v2897_v17 }
 0x1c9   :  { %2902 = vmatprep.subr.bf16.mxu0 %v2901_v16 }
 0x1cb   :  { %2645 = vmatmul.mubr.msk.f32.gmra.mrb[34].mxu0 %vm495_vm0, %v3425_v35 }
 0x1cc   :  { %2647 = vmatprep.mubr.msk.f32.mxu0 %vm495_vm0, %v3442_v58  ;;  %2904 = vmatpush3.bf16.msra.mxu0 %v2901_v16  ;;  %v4367_v58 = vld [vmem:[#allocation18_spill] sm:$0xff] }
 0x1cd   :  { %2906 = vmatprep.subr.bf16.mxu0 %v2905_v0 }
 0x1cf   :  { %2648 = vmatmul.mubr.msk.f32.gmra.mrb[36].mxu0 %vm495_vm0, %v3451_v25 }
 0x1d0   :  { %2650 = vmatprep.mubr.msk.f32.mxu0 %vm495_vm0, %v3448_v24  ;;  %v92_v24 = vld [vmem:[%s4292_s5 + $0x18] sm:$0xff] }
 0x1d3   :  { %2651 = vmatmul.mubr.msk.f32.gmra.mrb[38].mxu0 %vm495_vm0, %v3445_v19  ;;  %v91_v19 = vld [vmem:[%s4292_s5 + $0x10] sm:$0xff] }
 0x1d4   :  { %2653 = vmatprep.mubr.msk.f32.mxu0 %vm495_vm0, %v3462_v12  ;;  %v2909_v25 = vpack.c.bf16 %v92_v24, %v91_v19 }
 0x1d7   :  { %2654 = vmatmul.mubr.msk.f32.gmra.mrb[40].mxu0 %vm495_vm0, %v3471_v11 }
 0x1d8   :  { %2656 = vmatprep.mubr.msk.f32.mxu0 %vm495_vm0, %v3468_v33 }
 0x1db   :  { %2657 = vmatmul.mubr.msk.f32.gmra.mrb[42].mxu0 %vm495_vm0, %v3465_v34  ;;  %v4362_v34 = vld [vmem:[#allocation11_spill] sm:$0xff] }
 0x1dc   :  { %2659 = vmatprep.mubr.msk.f32.mxu0 %vm495_vm0, %v3482_v40 }
 0x1df   :  { %2660 = vmatmul.mubr.msk.f32.gmra.mrb[44].mxu0 %vm495_vm0, %v355_v18  ;;  %v4368_v18 = vld [vmem:[#allocation17_spill] sm:$0xff] }
 0x1e0   :  { %2662 = vmatprep.mubr.msk.f32.mxu0 %vm495_vm0, %v3488_v47 }
 0x1e3   :  { %2663 = vmatmul.mubr.msk.f32.gmra.mrb[46].mxu0 %vm495_vm0, %v3485_v48 }
 0x1e4   :  { %2673 = vmatprep.mubr.msk.f32.mxu0 %vm495_vm0, %v3251_v22  ;;  %v4359_v22 = vld [vmem:[#allocation10_spill] sm:$0xff] }
 0x1e7   :  { %2674 = vmatmul.mubr.msk.f32.vlgmr.msra.gmra.mrb[32].mxu0 %vm495_vm0, %v3256_v23 }
 0x1e8   :  { %2908 = vmatpush3.bf16.msra.mxu0 %v2905_v0  ;;  %2676 = vmatprep.mubr.msk.f32.mxu0 %vm495_vm0, %v3241_v20  ;;  %v3080_v20 = vmov 1  }
 0x1e9   :  { %2910 = vmatprep.subr.bf16.mxu0 %v2909_v25  ;;  %3006 = vset.pattern.permute.xlu1 %v3080_v20 }
 0x1ea   :  { %3005 = vset.pattern.permute.xlu0 %v3080_v20  ;;  %1124 = vperm.xlu1 %3006, %v3151_v4   ;;  %v4354_v4 = vld [vmem:[#allocation2_spill] sm:$0xff] }
 0x1eb   :  { %2677 = vmatmul.mubr.msk.f32.gmra.mrb[34].mxu0 %vm495_vm0, %v3246_v21  ;;  %1120 = vperm.xlu0 %3005, %v3139_v2   ;;  %v4353_v21 = vld [vmem:[#allocation3_spill] sm:$0xff]  ;;  %v4355_v2 = vld [vmem:[#allocation5_spill] sm:$0xff] }
 0x1ec   :  { %2679 = vmatprep.mubr.msk.f32.mxu0 %vm495_vm0, %v3278_v31  ;;  %2912 = vmatpush3.bf16.msra.mxu0 %v2909_v25  ;;  %v4361_v31 = vld [vmem:[#allocation9_spill] sm:$0xff] }
 0x1ee   :  { %1128 = vperm.xlu1 %3006, %v3134_v1   ;;  %v4356_v1 = vld [vmem:[#allocation4_spill] sm:$0xff] }
 0x1ef   :  { %2680 = vmatmul.mubr.msk.f32.gmra.mrb[36].mxu0 %vm495_vm0, %v3273_v30  ;;  %1132 = vperm.xlu0 %3005, %v3146_v3   ;;  %v4357_v3 = vld [vmem:[#allocation7_spill] sm:$0xff]  ;;  %v4360_v30 = vld [vmem:[#allocation12_spill] sm:$0xff] }
 0x1f0   :  { %2682 = vmatprep.mubr.msk.f32.mxu0 %vm495_vm0, %v3296_v39 }
 0x1f2   :  { %1136 = vperm.xlu1 %3006, %v3163_v6   ;;  %v4358_v6 = vld [vmem:[#allocation6_spill] sm:$0xff] }
 0x1f3   :  { %2683 = vmatmul.mubr.msk.f32.gmra.mrb[38].mxu0 %vm495_vm0, %v3291_v38  ;;  %1140 = vperm.xlu0 %3005, %v3158_v5  }
 0x1f4   :  { %2685 = vmatprep.mubr.msk.f32.mxu0 %vm495_vm0, %v3314_v46  ;;  %v4363_v46 = vld [vmem:[#allocation14_spill] sm:$0xff] }
 0x1f6   :  { %1144 = vperm.xlu1 %3006, %v3175_v8  }
 0x1f7   :  { %2686 = vmatmul.mubr.msk.f32.gmra.mrb[40].mxu0 %vm495_vm0, %v3309_v45  ;;  %1148 = vperm.xlu0 %3005, %v3170_v7  }
 0x1f8   :  { %2688 = vmatprep.mubr.msk.f32.mxu0 %vm495_vm0, %v3332_v53  ;;  %v4364_v53 = vld [vmem:[#allocation13_spill] sm:$0xff] }
 0x1fa   :  { %1152 = vperm.xlu1 %3006, %v3187_v10  }
 0x1fb   :  { %2689 = vmatmul.mubr.msk.f32.gmra.mrb[42].mxu0 %vm495_vm0, %v3327_v52  ;;  %1156 = vperm.xlu0 %3005, %v3182_v9  }
 0x1fc   :  { %2691 = vmatprep.mubr.msk.f32.mxu0 %vm495_vm0, %v3350_v60  ;;  %v4365_v60 = vld [vmem:[#allocation16_spill] sm:$0xff] }
 0x1fe   :  { %1160 = vperm.xlu1 %3006, %v4353_v21  }
 0x1ff   :  { %2692 = vmatmul.mubr.msk.f32.gmra.mrb[44].mxu0 %vm495_vm0, %v3345_v59  ;;  %1164 = vperm.xlu0 %3005, %v4354_v4  }
 0x200   :  { %2694 = vmatprep.mubr.msk.f32.mxu0 %vm495_vm0, %v3368_v28  ;;  %v4366_v28 = vld [vmem:[#allocation15_spill] sm:$0xff] }
 0x202   :  { %1168 = vperm.xlu1 %3006, %v4355_v2  }
 0x203   :  { %2695 = vmatmul.mubr.msk.f32.gmra.mrb[46].mxu0 %vm495_vm0, %v3363_v27  ;;  %1172 = vperm.xlu0 %3005, %v4356_v1  }
 0x206   :  { %1176 = vperm.xlu1 %3006, %v4357_v3  }
 0x207   :  { %1180 = vperm.xlu0 %3005, %v4358_v6  }
 0x26a   :  { %v3652_v19 = vpop.permute.xlu0 %1120 }
 0x26e   :  { %v3656_v24 = vpop.permute.xlu0 %1132 }
 0x27a   :  { %v2619_v5 = vpop.f32.mrb[16].mxu0 }
 0x27b   :  { %v416_v8 = vpop.f32.mrb[17].mxu0  ;;  %v481_v33 = vmul.f32 %v2619_v5, %v4361_v31 }
 0x27c   :  { %v479_v7 = vmul.f32 %v416_v8, %v4359_v22  ;;  %v2620_v23 = vpop.f32.mrb[18].mxu0 }
 0x27d   :  { %v419_v10 = vpop.f32.mrb[19].mxu0  ;;  %v482_v38 = vmul.f32 %v2620_v23, %v4362_v34 }
 0x27e   :  { %v480_v9 = vmul.f32 %v419_v10, %v4360_v30  ;;  %2705 = vmatprep.mubr.msk.f32.mxu0 %vm495_vm0, %v479_v7 }
 0x280   :  { %2706 = vmatmul.mubr.msk.f32.vlgmr.msra.gmra.mrb[32].mxu0 %vm495_vm0, %v480_v9 }
 0x281   :  { %2708 = vmatprep.mubr.msk.f32.mxu0 %vm495_vm0, %v481_v33 }
 0x282   :  { %v2623_v39 = vpop.f32.mrb[20].mxu0 }
 0x283   :  { %v432_v45 = vpop.f32.mrb[21].mxu0  ;;  %v485_v27 = vmul.f32 %v2623_v39, %v4365_v60 }
 0x284   :  { %v483_v47 = vmul.f32 %v432_v45, %v4363_v46  ;;  %v2624_v48 = vpop.f32.mrb[22].mxu0  ;;  %2709 = vmatmul.mubr.msk.f32.gmra.mrb[34].mxu0 %vm495_vm0, %v482_v38 }
 0x285   :  { %v435_v52 = vpop.f32.mrb[23].mxu0  ;;  %v486_v35 = vmul.f32 %v2624_v48, %v4366_v28 }
 0x286   :  { %v484_v59 = vmul.f32 %v435_v52, %v4364_v53  ;;  %2711 = vmatprep.mubr.msk.f32.mxu0 %vm495_vm0, %v483_v47 }
 0x288   :  { %2712 = vmatmul.mubr.msk.f32.gmra.mrb[36].mxu0 %vm495_vm0, %v484_v59 }
 0x289   :  { %2714 = vmatprep.mubr.msk.f32.mxu0 %vm495_vm0, %v485_v27 }
 0x28a   :  { %v2627_v37 = vpop.f32.mrb[24].mxu0 }
 0x28b   :  { %v448_v42 = vpop.f32.mrb[25].mxu0  ;;  %v489_v41 = vmul.f32 %v2627_v37, %v3336_v55 }
 0x28c   :  { %v487_v12 = vmul.f32 %v448_v42, %v4367_v58  ;;  %v2628_v11 = vpop.f32.mrb[26].mxu0  ;;  %2715 = vmatmul.mubr.msk.f32.gmra.mrb[38].mxu0 %vm495_vm0, %v486_v35 }
 0x28d   :  { %v451_v40 = vpop.f32.mrb[27].mxu0  ;;  %v490_v26 = vmul.f32 %v2628_v11, %v4369_v15 }
 0x28e   :  { %v488_v36 = vmul.f32 %v451_v40, %v4368_v18  ;;  %2717 = vmatprep.mubr.msk.f32.mxu0 %vm495_vm0, %v487_v12 }
 0x290   :  { %2718 = vmatmul.mubr.msk.f32.gmra.mrb[40].mxu0 %vm495_vm0, %v488_v36 }
 0x291   :  { %2720 = vmatprep.mubr.msk.f32.mxu0 %vm495_vm0, %v489_v41 }
 0x292   :  { %v2631_v14 = vpop.f32.mrb[28].mxu0 }
 0x293   :  { %v464_v17 = vpop.f32.mrb[29].mxu0  ;;  %v493_v55 = vmul.f32 %v2631_v14, %v3372_v32 }
 0x294   :  { %v491_v29 = vmul.f32 %v464_v17, %v3354_v62  ;;  %v2632_v13 = vpop.f32.mrb[30].mxu0  ;;  %2721 = vmatmul.mubr.msk.f32.gmra.mrb[42].mxu0 %vm495_vm0, %v490_v26  ;;  %v3654_v62 = vpop.permute.xlu1 %1124 }
 0x295   :  { %v467_v16 = vpop.f32.mrb[31].mxu0  ;;  %v494_v0 = vmul.f32 %v2632_v13, %v4370_v63 }
 0x296   :  { %v492_v54 = vmul.f32 %v467_v16, %v3352_v61  ;;  %2723 = vmatprep.mubr.msk.f32.mxu0 %vm495_vm0, %v491_v29  ;;  %v3660_v61 = vpop.permute.xlu0 %1140 }
 0x298   :  { %2724 = vmatmul.mubr.msk.f32.gmra.mrb[44].mxu0 %vm495_vm0, %v492_v54  ;;  %v3658_v25 = vpop.permute.xlu1 %1128 }
 0x299   :  { %2726 = vmatprep.mubr.msk.f32.mxu0 %vm495_vm0, %v493_v55 }
 0x29a   :  { %v3681_v22 = vpop.permute.xlu0 %1148 }
 0x29c   :  { %2727 = vmatmul.mubr.msk.f32.gmra.mrb[46].mxu0 %vm495_vm0, %v494_v0  ;;  %v3664_v32 = vpop.permute.xlu1 %1136 }
 0x29e   :  { %v3701_v46 = vpop.permute.xlu0 %1156 }
 0x2a0   :  { %v3684_v10 = vpop.permute.xlu1 %1144 }
 0x2a2   :  { %v3725_v12 = vpop.permute.xlu0 %1164 }
 0x2a3   :  { %4371 = vst [vmem:[#allocation3_spill] sm:$0xff] %v3725_v12 }
 0x2a4   :  { %v3708_v52 = vpop.permute.xlu1 %1152 }
 0x2a6   :  { %v3745_v16 = vpop.permute.xlu0 %1172 }
 0x2a8   :  { %v3728_v18 = vpop.permute.xlu1 %1160 }
 0x2ac   :  { %v3752_v63 = vpop.permute.xlu1 %1168 }
 0x353   :  { %v3662_v20 = vpop.f32.mrb[32].mxu0 }
 0x354   :  { %v4330_v21 = vmax.f32 %v3662_v20, 0.0  ;;  %v3667_v4 = vpop.f32.mrb[33].mxu0 }
 0x355   :  { %v4331_v2 = vmax.f32 %v3667_v4, 0.0 }
 0x356   :  { %v1184_v1 = vmul.f32 %v3654_v62, %v4330_v21 }
 0x357   :  { %v1183_v3 = vmul.f32 %v3652_v19, %v4331_v2  ;;  %v3676_v6 = vpop.f32.mrb[34].mxu0 }
 0x358   :  { %v4328_v5 = vmax.f32 %v3676_v6, 0.0  ;;  %v3679_v8 = vpop.f32.mrb[35].mxu0 }
 0x359   :  { %v4329_v7 = vmax.f32 %v3679_v8, 0.0  ;;  %v1199_v23 = vpack.c.bf16 %v1184_v1, %v1183_v3 }
 0x35a   :  { %v1186_v30 = vmul.f32 %v3656_v24, %v4328_v5 }
 0x35b   :  { %v1185_v9 = vmul.f32 %v3658_v25, %v4329_v7  ;;  %v3692_v31 = vpop.f32.mrb[36].mxu0  ;;  %2729 = vmatprep.subr.bf16.mxu1 %v1199_v23 }
 0x35c   :  { %v4326_v33 = vmax.f32 %v3692_v31, 0.0  ;;  %v3695_v34 = vpop.f32.mrb[37].mxu0  ;;  %2730 = vmatpush3.bf16.msra.mxu1 %v1199_v23 }
 0x35d   :  { %v4327_v38 = vmax.f32 %v3695_v34, 0.0  ;;  %v1200_v39 = vpack.c.bf16 %v1186_v30, %v1185_v9 }
 0x35e   :  { %v1188_v45 = vmul.f32 %v3660_v61, %v4326_v33 }
 0x35f   :  { %v1187_v47 = vmul.f32 %v3664_v32, %v4327_v38  ;;  %v3706_v48 = vpop.f32.mrb[38].mxu0  ;;  %2731 = vmatprep.subr.bf16.mxu1 %v1200_v39 }
 0x360   :  { %v4324_v53 = vmax.f32 %v3706_v48, 0.0  ;;  %v3711_v59 = vpop.f32.mrb[39].mxu0  ;;  %2732 = vmatpush3.bf16.msra.mxu1 %v1200_v39 }
 0x361   :  { %v4325_v60 = vmax.f32 %v3711_v59, 0.0  ;;  %v1201_v27 = vpack.c.bf16 %v1188_v45, %v1187_v47 }
 0x362   :  { %v1190_v28 = vmul.f32 %v3681_v22, %v4324_v53 }
 0x363   :  { %v1189_v35 = vmul.f32 %v3684_v10, %v4325_v60  ;;  %v3720_v37 = vpop.f32.mrb[40].mxu0  ;;  %2733 = vmatprep.subr.bf16.mxu1 %v1201_v27 }
 0x364   :  { %v4322_v42 = vmax.f32 %v3720_v37, 0.0  ;;  %v3723_v58 = vpop.f32.mrb[41].mxu0  ;;  %2734 = vmatpush3.bf16.msra.mxu1 %v1201_v27  ;;  %v3769_v27 = vpop.permute.xlu0 %1180 }
 0x365   :  { %v4323_v11 = vmax.f32 %v3723_v58, 0.0  ;;  %v1202_v40 = vpack.c.bf16 %v1190_v28, %v1189_v35  ;;  %4372 = vst [vmem:[#allocation2_spill] sm:$0xff] %v3769_v27 }
 0x366   :  { %v1192_v36 = vmul.f32 %v3701_v46, %v4322_v42 }
 0x367   :  { %v1191_v41 = vmul.f32 %v3708_v52, %v4323_v11  ;;  %v3736_v15 = vpop.f32.mrb[42].mxu0  ;;  %2735 = vmatprep.subr.bf16.mxu1 %v1202_v40 }
 0x368   :  { %v4320_v26 = vmax.f32 %v3736_v15, 0.0  ;;  %v3739_v14 = vpop.f32.mrb[43].mxu0  ;;  %2736 = vmatpush3.bf16.msra.mxu1 %v1202_v40  ;;  %v3772_v40 = vpop.permute.xlu1 %1176 }
 0x369   :  { %v4321_v17 = vmax.f32 %v3739_v14, 0.0  ;;  %v1203_v29 = vpack.c.bf16 %v1192_v36, %v1191_v41 }
 0x36a   :  { %v1194_v13 = vmul.f32 %v3725_v12, %v4320_v26 }
 0x36b   :  { %v1193_v54 = vmul.f32 %v3728_v18, %v4321_v17  ;;  %v3750_v55 = vpop.f32.mrb[44].mxu0  ;;  %2737 = vmatprep.subr.bf16.mxu1 %v1203_v29 }
 0x36c   :  { %v4318_v0 = vmax.f32 %v3750_v55, 0.0  ;;  %v3755_v1 = vpop.f32.mrb[45].mxu0  ;;  %2738 = vmatpush3.bf16.msra.mxu1 %v1203_v29 }
 0x36d   :  { %v4319_v3 = vmax.f32 %v3755_v1, 0.0  ;;  %v1204_v23 = vpack.c.bf16 %v1194_v13, %v1193_v54  ;;  %v4373_v13 = vld [vmem:[#allocation8_spill] sm:$0xff] }
 0x36e   :  { %v1196_v30 = vmul.f32 %v3745_v16, %v4318_v0 }
 0x36f   :  { %v1195_v9 = vmul.f32 %v3752_v63, %v4319_v3  ;;  %v3764_v39 = vpop.f32.mrb[46].mxu0  ;;  %2739 = vmatprep.subr.bf16.mxu1 %v1204_v23 }
 0x370   :  { %v4316_v45 = vmax.f32 %v3764_v39, 0.0  ;;  %v3767_v47 = vpop.f32.mrb[47].mxu0  ;;  %2740 = vmatpush3.bf16.msra.mxu1 %v1204_v23 }
 0x371   :  { %v4317_v28 = vmax.f32 %v3767_v47, 0.0  ;;  %v1205_v35 = vpack.c.bf16 %v1196_v30, %v1195_v9 }
 0x372   :  { %v1198_v36 = vmul.f32 %v3769_v27, %v4316_v45 }
 0x373   :  { %v1197_v41 = vmul.f32 %v3772_v40, %v4317_v28  ;;  %2741 = vmatprep.subr.bf16.mxu1 %v1205_v35 }
 0x374   :  { %2742 = vmatpush3.bf16.msra.mxu1 %v1205_v35 }
 0x375   :  { %v1206_v29 = vpack.c.bf16 %v1198_v36, %v1197_v41 }
 0x377   :  { %2743 = vmatprep.subr.bf16.mxu1 %v1206_v29 }
 0x378   :  { %2744 = vmatpush3.bf16.msra.mxu1 %v1206_v29 }
 0x37b   :  { %2746 = vmatmul.mubr.bf16.vlgmr.msra.gmra.mrb[0].mxu1 %v3381_v43 }
 0x37c   :  { %2749 = vmatprep.mubr.bf16.mxu1 %v3386_v44 }
 0x383   :  { %2750 = vmatmul.mubr.bf16.gmra.mrb[4].mxu1 %v3393_v49 }
 0x384   :  { %2753 = vmatprep.mubr.bf16.mxu1 %v3398_v50 }
 0x38b   :  { %2754 = vmatmul.mubr.bf16.gmra.mrb[8].mxu1 %v3405_v51 }
 0x38c   :  { %2757 = vmatprep.mubr.bf16.mxu1 %v3410_v56 }
 0x393   :  { %2758 = vmatmul.mubr.bf16.gmra.mrb[12].mxu1 %v3417_v57 }
 0x394   :  { %2777 = vmatprep.mubr.bf16.mxu1 %v4373_v13 }
 0x44e   :  { %v2747_v54 = vpop.f32.mrb[0].mxu1 }
 0x44f   :  { %v1241_v23 = vpop.f32.mrb[1].mxu1  ;;  %v3795_v41 = vmul.f32 %v2747_v54, %v3658_v25 }
 0x450   :  { %v3789_v30 = vmul.f32 %v1241_v23, %v3652_v19  ;;  %v2748_v9 = vpop.f32.mrb[2].mxu1 }
 0x451   :  { %v3792_v35 = vmul.f32 %v2748_v9, %v3656_v24  ;;  %v1244_v36 = vpop.f32.mrb[3].mxu1  ;;  %v1322_v9 = vmul.f32 %v3795_v41, %v3658_v25 }
 0x452   :  { %v3798_v29 = vmul.f32 %v1244_v36, %v3654_v62  ;;  %v1320_v45 = vmul.f32 %v3789_v30, %v3652_v19 }
 0x453   :  { %v1323_v13 = vmul.f32 %v3792_v35, %v3656_v24 }
 0x454   :  { %v1321_v23 = vmul.f32 %v3798_v29, %v3654_v62 }
 0x455   :  { %v1337_v26 = vpack.c.bf16 %v1323_v13, %v1322_v9 }
 0x456   :  { %v2751_v28 = vpop.f32.mrb[4].mxu1  ;;  %v1336_v0 = vpack.c.bf16 %v1321_v23, %v1320_v45 }
 0x457   :  { %v1257_v3 = vpop.f32.mrb[5].mxu1  ;;  %v3815_v11 = vmul.f32 %v2751_v28, %v3684_v10 }
 0x458   :  { %v3809_v54 = vmul.f32 %v1257_v3, %v3664_v32  ;;  %v2752_v36 = vpop.f32.mrb[6].mxu1  ;;  %2761 = vmatprep.subr.bf16.mxu1 %v1336_v0 }
 0x459   :  { %v3812_v17 = vmul.f32 %v2752_v36, %v3681_v22  ;;  %v1260_v42 = vpop.f32.mrb[7].mxu1  ;;  %2762 = vmatpush3.bf16.msra.mxu1 %v1336_v0  ;;  %v1326_v0 = vmul.f32 %v3815_v11, %v3684_v10 }
 0x45a   :  { %v3818_v53 = vmul.f32 %v1260_v42, %v3660_v61  ;;  %2763 = vmatprep.subr.bf16.mxu1 %v1337_v26  ;;  %v1324_v45 = vmul.f32 %v3809_v54, %v3664_v32 }
 0x45b   :  { %v1327_v3 = vmul.f32 %v3812_v17, %v3681_v22 }
 0x45c   :  { %v1325_v13 = vmul.f32 %v3818_v53, %v3660_v61 }
 0x45d   :  { %2764 = vmatpush3.bf16.msra.mxu1 %v1337_v26  ;;  %v1339_v60 = vpack.c.bf16 %v1327_v3, %v1326_v0 }
 0x45e   :  { %v2755_v23 = vpop.f32.mrb[8].mxu1  ;;  %v1338_v28 = vpack.c.bf16 %v1325_v13, %v1324_v45 }
 0x45f   :  { %v1273_v9 = vpop.f32.mrb[9].mxu1  ;;  %v3835_v5 = vmul.f32 %v2755_v23, %v3728_v18 }
 0x460   :  { %v3829_v42 = vmul.f32 %v1273_v9, %v3708_v52  ;;  %v2756_v36 = vpop.f32.mrb[10].mxu1  ;;  %2765 = vmatprep.subr.bf16.mxu1 %v1338_v28 }
 0x461   :  { %v3832_v33 = vmul.f32 %v2756_v36, %v3725_v12  ;;  %v1276_v38 = vpop.f32.mrb[11].mxu1  ;;  %2766 = vmatpush3.bf16.msra.mxu1 %v1338_v28  ;;  %v1330_v0 = vmul.f32 %v3835_v5, %v3728_v18 }
 0x462   :  { %v3838_v26 = vmul.f32 %v1276_v38, %v3701_v46  ;;  %2767 = vmatprep.subr.bf16.mxu1 %v1339_v60  ;;  %v1328_v45 = vmul.f32 %v3829_v42, %v3708_v52 }
 0x463   :  { %v1331_v13 = vmul.f32 %v3832_v33, %v3725_v12 }
 0x464   :  { %v1329_v3 = vmul.f32 %v3838_v26, %v3701_v46 }
 0x465   :  { %2768 = vmatpush3.bf16.msra.mxu1 %v1339_v60  ;;  %v1341_v7 = vpack.c.bf16 %v1331_v13, %v1330_v0 }
 0x466   :  { %v2759_v28 = vpop.f32.mrb[12].mxu1  ;;  %v1340_v23 = vpack.c.bf16 %v1329_v3, %v1328_v45 }
 0x467   :  { %v1289_v9 = vpop.f32.mrb[13].mxu1  ;;  %v1318_v12 = vmul.f32 %v2759_v28, %v3772_v40 }
 0x468   :  { %v3849_v38 = vmul.f32 %v1289_v9, %v3752_v63  ;;  %v2760_v36 = vpop.f32.mrb[14].mxu1  ;;  %2769 = vmatprep.subr.bf16.mxu1 %v1340_v23 }
 0x469   :  { %v3852_v21 = vmul.f32 %v2760_v36, %v3769_v27  ;;  %v1292_v2 = vpop.f32.mrb[15].mxu1  ;;  %2770 = vmatpush3.bf16.msra.mxu1 %v1340_v23  ;;  %v1334_v13 = vmul.f32 %v1318_v12, %v3772_v40  ;;  %v1111_v23 = vld [vmem:[%s4293_s7] sm:$0xff] }
 0x46a   :  { %v1317_v60 = vmul.f32 %v1292_v2, %v3745_v16  ;;  %2771 = vmatprep.subr.bf16.mxu1 %v1341_v7  ;;  %v1332_v45 = vmul.f32 %v3849_v38, %v3752_v63  ;;  %v1112_v2 = vld [vmem:[%s4293_s7 + $0x8] sm:$0xff] }
 0x46b   :  { %v1335_v3 = vmul.f32 %v3852_v21, %v3769_v27  ;;  %v2913_v36 = vpack.c.bf16 %v1112_v2, %v1111_v23  ;;  %v1107_v27 = vld [vmem:[%s4294_s6] sm:$0xff]  ;;  %v4390_v23 = vld [vmem:[#allocation3_spill] sm:$0xff] }
 0x46c   :  { %v1333_v9 = vmul.f32 %v1317_v60, %v3745_v16 }
 0x46d   :  { %2772 = vmatpush3.bf16.msra.mxu1 %v1341_v7  ;;  %v1343_v28 = vpack.c.bf16 %v1335_v3, %v1334_v13  ;;  %v1113_v7 = vld [vmem:[%s4293_s7 + $0x10] sm:$0xff]  ;;  %v1108_v3 = vld [vmem:[%s4294_s6 + $0x8] sm:$0xff] }
 0x46e   :  { %v1342_v0 = vpack.c.bf16 %v1333_v9, %v1332_v45  ;;  %v1114_v45 = vld [vmem:[%s4293_s7 + $0x18] sm:$0xff]  ;;  %v2921_v13 = vpack.c.bf16 %v1108_v3, %v1107_v27 }
 0x46f   :  { %v2917_v9 = vpack.c.bf16 %v1114_v45, %v1113_v7  ;;  %v4391_v45 = vld [vmem:[#allocation2_spill] sm:$0xff] }
 0x470   :  { %2773 = vmatprep.subr.bf16.mxu1 %v1342_v0 }
 0x471   :  { %2774 = vmatpush3.bf16.msra.mxu1 %v1342_v0 }
 0x472   :  { %2775 = vmatprep.subr.bf16.mxu1 %v1343_v28 }
 0x475   :  { %2776 = vmatpush3.bf16.msra.mxu1 %v1343_v28 }
 0x476   :  { %2914 = vmatprep.subr.bf16.mxu1 %v2913_v36 }
 0x478   :  { %2778 = vmatmul.mubr.bf16.vlgmr.msra.gmra.mrb[16].mxu1 %v3381_v43  ;;  %v1109_v43 = vld [vmem:[%s4294_s6 + $0x10] sm:$0xff] }
 0x479   :  { %2781 = vmatprep.mubr.bf16.mxu1 %v3386_v44  ;;  %2916 = vmatpush3.bf16.msra.mxu1 %v2913_v36  ;;  %v1110_v44 = vld [vmem:[%s4294_s6 + $0x18] sm:$0xff] }
 0x47a   :  { %2918 = vmatprep.subr.bf16.mxu1 %v2917_v9 }
 0x47d   :  { %2920 = vmatpush3.bf16.msra.mxu1 %v2917_v9 }
 0x47e   :  { %2922 = vmatprep.subr.bf16.mxu1 %v2921_v13 }
 0x480   :  { %2782 = vmatmul.mubr.bf16.gmra.mrb[20].mxu1 %v3393_v49  ;;  %v2925_v49 = vpack.c.bf16 %v1110_v44, %v1109_v43 }
 0x481   :  { %2785 = vmatprep.mubr.bf16.mxu1 %v3398_v50  ;;  %v1115_v50 = vld [vmem:[%s4295_s8] sm:$0xff] }
 0x488   :  { %2786 = vmatmul.mubr.bf16.gmra.mrb[24].mxu1 %v3405_v51  ;;  %v1116_v51 = vld [vmem:[%s4295_s8 + $0x8] sm:$0xff] }
 0x489   :  { %2789 = vmatprep.mubr.bf16.mxu1 %v3410_v56  ;;  %v2929_v56 = vpack.c.bf16 %v1116_v51, %v1115_v50 }
 0x490   :  { %2790 = vmatmul.mubr.bf16.gmra.mrb[28].mxu1 %v3417_v57  ;;  %v1117_v57 = vld [vmem:[%s4295_s8 + $0x10] sm:$0xff] }
 0x491   :  { %2801 = vmatprep.mubr.msk.f32.mxu1 %vm495_vm0, %v3789_v30 }
 0x498   :  { %2802 = vmatmul.mubr.msk.f32.vlgmr.msra.gmra.mrb[32].mxu1 %vm495_vm0, %v3798_v29 }
 0x499   :  { %2804 = vmatprep.mubr.msk.f32.mxu1 %vm495_vm0, %v3795_v41  ;;  %2924 = vmatpush3.bf16.msra.mxu1 %v2921_v13 }
 0x49a   :  { %2926 = vmatprep.subr.bf16.mxu1 %v2925_v49 }
 0x49c   :  { %2805 = vmatmul.mubr.msk.f32.gmra.mrb[34].mxu1 %vm495_vm0, %v3792_v35 }
 0x49d   :  { %2807 = vmatprep.mubr.msk.f32.mxu1 %vm495_vm0, %v3809_v54  ;;  %2928 = vmatpush3.bf16.msra.mxu1 %v2925_v49 }
 0x49e   :  { %2930 = vmatprep.subr.bf16.mxu1 %v2929_v56 }
 0x4a0   :  { %2808 = vmatmul.mubr.msk.f32.gmra.mrb[36].mxu1 %vm495_vm0, %v3818_v53  ;;  %v1118_v53 = vld [vmem:[%s4295_s8 + $0x18] sm:$0xff] }
 0x4a1   :  { %2810 = vmatprep.mubr.msk.f32.mxu1 %vm495_vm0, %v3815_v11  ;;  %v4375_v11 = vmax.f32 %v3662_v20, 0.0  ;;  %v4380_v20 = vmax.f32 %v3711_v59, 0.0  ;;  %v4385_v59 = vmax.f32 %v3736_v15, 0.0 }
 0x4a4   :  { %2811 = vmatmul.mubr.msk.f32.gmra.mrb[38].mxu1 %vm495_vm0, %v3812_v17  ;;  %v4377_v17 = vmax.f32 %v3676_v6, 0.0  ;;  %v4382_v6 = vmax.f32 %v3723_v58, 0.0  ;;  %v4387_v58 = vmax.f32 %v3750_v55, 0.0 }
 0x4a5   :  { %2813 = vmatprep.mubr.msk.f32.mxu1 %vm495_vm0, %v3829_v42 }
 0x4a8   :  { %2814 = vmatmul.mubr.msk.f32.gmra.mrb[40].mxu1 %vm495_vm0, %v3838_v26 }
 0x4a9   :  { %2816 = vmatprep.mubr.msk.f32.mxu1 %vm495_vm0, %v3835_v5  ;;  %v4374_v5 = vmax.f32 %v3667_v4, 0.0  ;;  %v4379_v4 = vmax.f32 %v3692_v31, 0.0  ;;  %v4384_v31 = vmax.f32 %v3739_v14, 0.0  ;;  %v4389_v14 = vmax.f32 %v3764_v39, 0.0 }
 0x4ac   :  { %2817 = vmatmul.mubr.msk.f32.gmra.mrb[42].mxu1 %vm495_vm0, %v3832_v33  ;;  %v2933_v33 = vpack.c.bf16 %v1118_v53, %v1117_v57 }
 0x4ad   :  { %2819 = vmatprep.mubr.msk.f32.mxu1 %vm495_vm0, %v3849_v38 }
 0x4b0   :  { %2820 = vmatmul.mubr.msk.f32.gmra.mrb[44].mxu1 %vm495_vm0, %v1317_v60 }
 0x4b1   :  { %2822 = vmatprep.mubr.msk.f32.mxu1 %vm495_vm0, %v1318_v12  ;;  %v4376_v12 = vmax.f32 %v3679_v8, 0.0  ;;  %v4381_v8 = vmax.f32 %v3706_v48, 0.0  ;;  %v4386_v48 = vmax.f32 %v3755_v1, 0.0 }
 0x4b4   :  { %2823 = vmatmul.mubr.msk.f32.gmra.mrb[46].mxu1 %vm495_vm0, %v3852_v21  ;;  %v4378_v21 = vmax.f32 %v3695_v34, 0.0  ;;  %v4383_v34 = vmax.f32 %v3720_v37, 0.0  ;;  %v4388_v37 = vmax.f32 %v3767_v47, 0.0 }
 0x4b5   :  { %2833 = vmatprep.mubr.msk.f32.mxu1 %vm495_vm0, %v4374_v5 }
 0x4b8   :  { %2834 = vmatmul.mubr.msk.f32.vlgmr.msra.gmra.mrb[32].mxu1 %vm495_vm0, %v4375_v11 }
 0x4b9   :  { %2836 = vmatprep.mubr.msk.f32.mxu1 %vm495_vm0, %v4376_v12  ;;  %2932 = vmatpush3.bf16.msra.mxu1 %v2929_v56 }
 0x4ba   :  { %2934 = vmatprep.subr.bf16.mxu1 %v2933_v33 }
 0x4bc   :  { %2837 = vmatmul.mubr.msk.f32.gmra.mrb[34].mxu1 %vm495_vm0, %v4377_v17 }
 0x4bd   :  { %2839 = vmatprep.mubr.msk.f32.mxu1 %vm495_vm0, %v4378_v21  ;;  %2936 = vmatpush3.bf16.msra.mxu1 %v2933_v33 }
 0x4c0   :  { %2840 = vmatmul.mubr.msk.f32.gmra.mrb[36].mxu1 %vm495_vm0, %v4379_v4 }
 0x4c1   :  { %2842 = vmatprep.mubr.msk.f32.mxu1 %vm495_vm0, %v4380_v20 }
 0x4c4   :  { %2843 = vmatmul.mubr.msk.f32.gmra.mrb[38].mxu1 %vm495_vm0, %v4381_v8 }
 0x4c5   :  { %2845 = vmatprep.mubr.msk.f32.mxu1 %vm495_vm0, %v4382_v6 }
 0x4c8   :  { %2846 = vmatmul.mubr.msk.f32.gmra.mrb[40].mxu1 %vm495_vm0, %v4383_v34 }
 0x4c9   :  { %2848 = vmatprep.mubr.msk.f32.mxu1 %vm495_vm0, %v4384_v31 }
 0x4cc   :  { %2849 = vmatmul.mubr.msk.f32.gmra.mrb[42].mxu1 %vm495_vm0, %v4385_v59 }
 0x4cd   :  { %2851 = vmatprep.mubr.msk.f32.mxu1 %vm495_vm0, %v4386_v48 }
 0x4d0   :  { %2852 = vmatmul.mubr.msk.f32.gmra.mrb[44].mxu1 %vm495_vm0, %v4387_v58 }
 0x4d1   :  { %2854 = vmatprep.mubr.msk.f32.mxu1 %vm495_vm0, %v4388_v37 }
 0x4d4   :  { %2855 = vmatmul.mubr.msk.f32.gmra.mrb[46].mxu1 %vm495_vm0, %v4389_v14 }
 0x54b   :  { %v2779_v27 = vpop.f32.mrb[16].mxu1 }
 0x54c   :  { %v1378_v15 = vpop.f32.mrb[17].mxu1  ;;  %v1443_v55 = vmul.f32 %v2779_v27, %v3658_v25 }
 0x54d   :  { %v1441_v30 = vmul.f32 %v1378_v15, %v3652_v19  ;;  %v2780_v35 = vpop.f32.mrb[18].mxu1 }
 0x54e   :  { %v1381_v1 = vpop.f32.mrb[19].mxu1  ;;  %v1444_v39 = vmul.f32 %v2780_v35, %v3656_v24 }
 0x54f   :  { %v1442_v41 = vmul.f32 %v1381_v1, %v3654_v62  ;;  %2865 = vmatprep.mubr.msk.f32.mxu1 %vm495_vm0, %v1441_v30 }
 0x551   :  { %2866 = vmatmul.mubr.msk.f32.vlgmr.msra.gmra.mrb[32].mxu1 %vm495_vm0, %v1442_v41 }
 0x552   :  { %2868 = vmatprep.mubr.msk.f32.mxu1 %vm495_vm0, %v1443_v55 }
 0x553   :  { %v2783_v47 = vpop.f32.mrb[20].mxu1 }
 0x554   :  { %v1394_v29 = vpop.f32.mrb[21].mxu1  ;;  %v1447_v25 = vmul.f32 %v2783_v47, %v3684_v10 }
 0x555   :  { %v1445_v54 = vmul.f32 %v1394_v29, %v3664_v32  ;;  %v2784_v42 = vpop.f32.mrb[22].mxu1  ;;  %2869 = vmatmul.mubr.msk.f32.gmra.mrb[34].mxu1 %vm495_vm0, %v1444_v39 }
 0x556   :  { %v1397_v19 = vpop.f32.mrb[23].mxu1  ;;  %v1448_v24 = vmul.f32 %v2784_v42, %v3681_v22 }
 0x557   :  { %v1446_v62 = vmul.f32 %v1397_v19, %v3660_v61  ;;  %2871 = vmatprep.mubr.msk.f32.mxu1 %vm495_vm0, %v1445_v54 }
 0x559   :  { %2872 = vmatmul.mubr.msk.f32.gmra.mrb[36].mxu1 %vm495_vm0, %v1446_v62 }
 0x55a   :  { %2874 = vmatprep.mubr.msk.f32.mxu1 %vm495_vm0, %v1447_v25 }
 0x55b   :  { %v2787_v26 = vpop.f32.mrb[24].mxu1 }
 0x55c   :  { %v1410_v38 = vpop.f32.mrb[25].mxu1  ;;  %v1451_v10 = vmul.f32 %v2787_v26, %v3728_v18 }
 0x55d   :  { %v1449_v32 = vmul.f32 %v1410_v38, %v3708_v52  ;;  %v2788_v60 = vpop.f32.mrb[26].mxu1  ;;  %2875 = vmatmul.mubr.msk.f32.gmra.mrb[38].mxu1 %vm495_vm0, %v1448_v24 }
 0x55e   :  { %v1413_v0 = vpop.f32.mrb[27].mxu1  ;;  %v1452_v22 = vmul.f32 %v2788_v60, %v4390_v23 }
 0x55f   :  { %v1450_v61 = vmul.f32 %v1413_v0, %v3701_v46  ;;  %2877 = vmatprep.mubr.msk.f32.mxu1 %vm495_vm0, %v1449_v32 }
 0x561   :  { %2878 = vmatmul.mubr.msk.f32.gmra.mrb[40].mxu1 %vm495_vm0, %v1450_v61 }
 0x562   :  { %2880 = vmatprep.mubr.msk.f32.mxu1 %vm495_vm0, %v1451_v10 }
 0x563   :  { %v2791_v2 = vpop.f32.mrb[28].mxu1 }
 0x564   :  { %v1426_v28 = vpop.f32.mrb[29].mxu1  ;;  %v1455_v18 = vmul.f32 %v2791_v2, %v3772_v40 }
 0x565   :  { %v1453_v52 = vmul.f32 %v1426_v28, %v3752_v63  ;;  %v2792_v36 = vpop.f32.mrb[30].mxu1  ;;  %2881 = vmatmul.mubr.msk.f32.gmra.mrb[42].mxu1 %vm495_vm0, %v1452_v22 }
 0x566   :  { %v1429_v7 = vpop.f32.mrb[31].mxu1  ;;  %v1456_v9 = vmul.f32 %v2792_v36, %v4391_v45 }
 0x567   :  { %v1454_v46 = vmul.f32 %v1429_v7, %v3745_v16  ;;  %2883 = vmatprep.mubr.msk.f32.mxu1 %vm495_vm0, %v1453_v52 }
 0x569   :  { %2884 = vmatmul.mubr.msk.f32.gmra.mrb[44].mxu1 %vm495_vm0, %v1454_v46 }
 0x56a   :  { %2886 = vmatprep.mubr.msk.f32.mxu1 %vm495_vm0, %v1455_v18 }
 0x56d   :  { %2887 = vmatmul.mubr.msk.f32.gmra.mrb[46].mxu1 %vm495_vm0, %v1456_v9 }
 0x624   :  { %v4015_v3 = vpop.f32.mrb[32].mxu1 }
 0x625   :  { %v2053_v63 = vmax.f32 %v4015_v3, 0.0  ;;  %v4018_v13 = vpop.f32.mrb[33].mxu1 }
 0x626   :  { %v2052_v16 = vmax.f32 %v4018_v13, 0.0 }
 0x627   :  { %v2072_v40 = vsel %vm2068_vm1, %v2053_v63, -inf }
 0x628   :  { %2073 = vmax.xlane.f32.xlu0 %v2072_v40  ;;  %v4024_v43 = vpop.f32.mrb[34].mxu1  ;;  %v2069_v44 = vsel %vm2068_vm1, %v2052_v16, -inf }
 0x629   :  { %v2055_v49 = vmax.f32 %v4024_v43, 0.0  ;;  %2070 = vmax.xlane.f32.xlu1 %v2069_v44  ;;  %v4030_v50 = vpop.f32.mrb[35].mxu1 }
 0x62a   :  { %v2054_v51 = vmax.f32 %v4030_v50, 0.0 }
 0x62b   :  { %v2078_v56 = vsel %vm2068_vm1, %v2055_v49, -inf }
 0x62c   :  { %v4036_v57 = vpop.f32.mrb[36].mxu1  ;;  %v2075_v53 = vsel %vm2068_vm1, %v2054_v51, -inf }
 0x62d   :  { %v2057_v5 = vmax.f32 %v4036_v57, 0.0  ;;  %2079 = vmax.xlane.f32.xlu1 %v2078_v56  ;;  %2076 = vmax.xlane.f32.xlu0 %v2075_v53  ;;  %v4042_v33 = vpop.f32.mrb[37].mxu1 }
 0x62e   :  { %v2056_v11 = vmax.f32 %v4042_v33, 0.0 }
 0x62f   :  { %v2084_v12 = vsel %vm2068_vm1, %v2057_v5, -inf }
 0x630   :  { %v4048_v17 = vpop.f32.mrb[38].mxu1  ;;  %v2081_v21 = vsel %vm2068_vm1, %v2056_v11, -inf }
 0x631   :  { %v2059_v4 = vmax.f32 %v4048_v17, 0.0  ;;  %2085 = vmax.xlane.f32.xlu1 %v2084_v12  ;;  %2082 = vmax.xlane.f32.xlu0 %v2081_v21  ;;  %v4054_v20 = vpop.f32.mrb[39].mxu1 }
 0x632   :  { %v2058_v8 = vmax.f32 %v4054_v20, 0.0 }
 0x633   :  { %v2090_v6 = vsel %vm2068_vm1, %v2059_v4, -inf }
 0x634   :  { %v4060_v34 = vpop.f32.mrb[40].mxu1  ;;  %v2087_v31 = vsel %vm2068_vm1, %v2058_v8, -inf }
 0x635   :  { %v2061_v59 = vmax.f32 %v4060_v34, 0.0  ;;  %2091 = vmax.xlane.f32.xlu1 %v2090_v6  ;;  %2088 = vmax.xlane.f32.xlu0 %v2087_v31  ;;  %v4066_v48 = vpop.f32.mrb[41].mxu1 }
 0x636   :  { %v2060_v58 = vmax.f32 %v4066_v48, 0.0 }
 0x637   :  { %v2096_v37 = vsel %vm2068_vm1, %v2061_v59, -inf }
 0x638   :  { %v4072_v14 = vpop.f32.mrb[42].mxu1  ;;  %v2093_v27 = vsel %vm2068_vm1, %v2060_v58, -inf }
 0x639   :  { %v2063_v15 = vmax.f32 %v4072_v14, 0.0  ;;  %2097 = vmax.xlane.f32.xlu1 %v2096_v37  ;;  %2094 = vmax.xlane.f32.xlu0 %v2093_v27  ;;  %v4078_v30 = vpop.f32.mrb[43].mxu1 }
 0x63a   :  { %v2062_v35 = vmax.f32 %v4078_v30, 0.0 }
 0x63b   :  { %v2102_v1 = vsel %vm2068_vm1, %v2063_v15, -inf }
 0x63c   :  { %v4084_v41 = vpop.f32.mrb[44].mxu1  ;;  %v2099_v55 = vsel %vm2068_vm1, %v2062_v35, -inf }
 0x63d   :  { %v2065_v39 = vmax.f32 %v4084_v41, 0.0  ;;  %2103 = vmax.xlane.f32.xlu1 %v2102_v1  ;;  %2100 = vmax.xlane.f32.xlu0 %v2099_v55  ;;  %v4090_v47 = vpop.f32.mrb[45].mxu1 }
 0x63e   :  { %v2064_v29 = vmax.f32 %v4090_v47, 0.0 }
 0x63f   :  { %v2108_v54 = vsel %vm2068_vm1, %v2065_v39, -inf }
 0x640   :  { %v4096_v42 = vpop.f32.mrb[46].mxu1  ;;  %v2105_v19 = vsel %vm2068_vm1, %v2064_v29, -inf }
 0x641   :  { %v2067_v62 = vmax.f32 %v4096_v42, 0.0  ;;  %2109 = vmax.xlane.f32.xlu1 %v2108_v54  ;;  %2106 = vmax.xlane.f32.xlu0 %v2105_v19  ;;  %v4102_v25 = vpop.f32.mrb[47].mxu1 }
 0x642   :  { %v2066_v24 = vmax.f32 %v4102_v25, 0.0 }
 0x643   :  { %v2114_v26 = vsel %vm2068_vm1, %v2067_v62, -inf }
 0x644   :  { %v2111_v38 = vsel %vm2068_vm1, %v2066_v24, -inf }
 0x645   :  { %2115 = vmax.xlane.f32.xlu1 %v2114_v26  ;;  %2112 = vmax.xlane.f32.xlu0 %v2111_v38 }
 0x6b5   :  { %v2074_v32 = vpop.xlane.xlu0 %2073 }
 0x6b6   :  { %v4113_v60 = vsub.f32 %v2053_v63, %v2074_v32  ;;  %v2071_v0 = vpop.xlane.xlu1 %2070 }
 0x6b7   :  { %v4117_v61 = vsub.f32 %v2052_v16, %v2071_v0 }
 0x6b8   :  { %v2135_v10 = vmul.f32 1.442695, %v4113_v60 }
 0x6b9   :  { %v2133_v23 = vmul.f32 1.442695, %v4117_v61 }
 0x6ba   :  { %3015 = vpow2.f32 %v2135_v10  ;;  %v2080_v22 = vpop.xlane.xlu1 %2079  ;;  %v2077_v2 = vpop.xlane.xlu0 %2076 }
 0x6bb   :  { %3017 = vpow2.f32 %v2133_v23  ;;  %v4123_v28 = vsub.f32 %v2055_v49, %v2080_v22  ;;  %v4127_v52 = vsub.f32 %v2054_v51, %v2077_v2 }
 0x6bd   :  { %v2139_v36 = vmul.f32 1.442695, %v4123_v28  ;;  %v2137_v7 = vmul.f32 1.442695, %v4127_v52 }
 0x6be   :  { %v2086_v46 = vpop.xlane.xlu1 %2085  ;;  %v2083_v18 = vpop.xlane.xlu0 %2082 }
 0x6bf   :  { %3019 = vpow2.f32 %v2139_v36  ;;  %v4133_v45 = vsub.f32 %v2057_v5, %v2086_v46  ;;  %v4137_v9 = vsub.f32 %v2056_v11, %v2083_v18 }
 0x6c0   :  { %3021 = vpow2.f32 %v2137_v7 }
 0x6c1   :  { %v2143_v3 = vmul.f32 1.442695, %v4133_v45  ;;  %v2141_v63 = vmul.f32 1.442695, %v4137_v9 }
 0x6c2   :  { %v2092_v13 = vpop.xlane.xlu1 %2091  ;;  %v2089_v16 = vpop.xlane.xlu0 %2088 }
 0x6c3   :  { %3023 = vpow2.f32 %v2143_v3  ;;  %v4143_v40 = vsub.f32 %v2059_v4, %v2092_v13  ;;  %v4147_v43 = vsub.f32 %v2058_v8, %v2089_v16 }
 0x6c4   :  { %v3016_v44 = vpop.eup %3015  ;;  %3025 = vpow2.f32 %v2141_v63 }
 0x6c5   :  { %v3018_v49 = vpop.eup %3017  ;;  %v2147_v50 = vmul.f32 1.442695, %v4143_v40  ;;  %v2145_v51 = vmul.f32 1.442695, %v4147_v43  ;;  %v2168_v56 = vsel %vm2068_vm1, %v3016_v44, 0.0 }
 0x6c6   :  { %v2098_v57 = vpop.xlane.xlu1 %2097  ;;  %v2095_v53 = vpop.xlane.xlu0 %2094  ;;  %2169 = vadd.xlane.f32.xlu1 %v2168_v56  ;;  %v2165_v5 = vsel %vm2068_vm1, %v3018_v49, 0.0 }
 0x6c7   :  { %3027 = vpow2.f32 %v2147_v50  ;;  %v4155_v33 = vsub.f32 %v2061_v59, %v2098_v57  ;;  %v4159_v11 = vsub.f32 %v2060_v58, %v2095_v53  ;;  %2166 = vadd.xlane.f32.xlu0 %v2165_v5 }
 0x6c8   :  { %3029 = vpow2.f32 %v2145_v51 }
 0x6c9   :  { %v3020_v12 = vpop.eup %3019  ;;  %v2151_v17 = vmul.f32 1.442695, %v4155_v33  ;;  %v2149_v21 = vmul.f32 1.442695, %v4159_v11 }
 0x6ca   :  { %v3022_v4 = vpop.eup %3021  ;;  %v2104_v20 = vpop.xlane.xlu1 %2103  ;;  %v2174_v6 = vsel %vm2068_vm1, %v3020_v12, 0.0 }
 0x6cb   :  { %v2101_v8 = vpop.xlane.xlu0 %2100  ;;  %3031 = vpow2.f32 %v2151_v17  ;;  %v4166_v34 = vsub.f32 %v2063_v15, %v2104_v20  ;;  %2175 = vadd.xlane.f32.xlu1 %v2174_v6  ;;  %v2171_v59 = vsel %vm2068_vm1, %v3022_v4, 0.0 }
 0x6cc   :  { %v4170_v31 = vsub.f32 %v2062_v35, %v2101_v8  ;;  %3033 = vpow2.f32 %v2149_v21  ;;  %2172 = vadd.xlane.f32.xlu0 %v2171_v59 }
 0x6cd   :  { %v3024_v48 = vpop.eup %3023  ;;  %v2155_v58 = vmul.f32 1.442695, %v4166_v34 }
 0x6ce   :  { %v2153_v37 = vmul.f32 1.442695, %v4170_v31  ;;  %v3026_v27 = vpop.eup %3025  ;;  %v2110_v1 = vpop.xlane.xlu1 %2109  ;;  %v2180_v14 = vsel %vm2068_vm1, %v3024_v48, 0.0 }
 0x6cf   :  { %v2107_v55 = vpop.xlane.xlu0 %2106  ;;  %3035 = vpow2.f32 %v2155_v58  ;;  %v4178_v15 = vsub.f32 %v2065_v39, %v2110_v1  ;;  %2181 = vadd.xlane.f32.xlu1 %v2180_v14  ;;  %v2177_v35 = vsel %vm2068_vm1, %v3026_v27, 0.0 }
 0x6d0   :  { %v4182_v30 = vsub.f32 %v2064_v29, %v2107_v55  ;;  %3037 = vpow2.f32 %v2153_v37  ;;  %2178 = vadd.xlane.f32.xlu0 %v2177_v35 }
 0x6d1   :  { %v3028_v54 = vpop.eup %3027  ;;  %v2159_v19 = vmul.f32 1.442695, %v4178_v15 }
 0x6d2   :  { %v2157_v26 = vmul.f32 1.442695, %v4182_v30  ;;  %v3030_v38 = vpop.eup %3029  ;;  %v2116_v32 = vpop.xlane.xlu1 %2115  ;;  %v2186_v41 = vsel %vm2068_vm1, %v3028_v54, 0.0 }
 0x6d3   :  { %v2113_v0 = vpop.xlane.xlu0 %2112  ;;  %3039 = vpow2.f32 %v2159_v19  ;;  %v4190_v39 = vsub.f32 %v2067_v62, %v2116_v32  ;;  %2187 = vadd.xlane.f32.xlu1 %v2186_v41  ;;  %v2183_v29 = vsel %vm2068_vm1, %v3030_v38, 0.0 }
 0x6d4   :  { %v4194_v47 = vsub.f32 %v2066_v24, %v2113_v0  ;;  %3041 = vpow2.f32 %v2157_v26  ;;  %2184 = vadd.xlane.f32.xlu0 %v2183_v29 }
 0x6d5   :  { %v3032_v10 = vpop.eup %3031  ;;  %v2163_v23 = vmul.f32 1.442695, %v4190_v39 }
 0x6d6   :  { %v2161_v22 = vmul.f32 1.442695, %v4194_v47  ;;  %v3034_v2 = vpop.eup %3033  ;;  %v2192_v36 = vsel %vm2068_vm1, %v3032_v10, 0.0 }
 0x6d7   :  { %3043 = vpow2.f32 %v2163_v23  ;;  %2193 = vadd.xlane.f32.xlu1 %v2192_v36  ;;  %v2189_v42 = vsel %vm2068_vm1, %v3034_v2, 0.0 }
 0x6d8   :  { %3045 = vpow2.f32 %v2161_v22  ;;  %2190 = vadd.xlane.f32.xlu0 %v2189_v42 }
 0x6d9   :  { %v3036_v62 = vpop.eup %3035 }
 0x6da   :  { %v3038_v25 = vpop.eup %3037  ;;  %v2198_v24 = vsel %vm2068_vm1, %v3036_v62, 0.0 }
 0x6db   :  { %2199 = vadd.xlane.f32.xlu1 %v2198_v24  ;;  %v2195_v7 = vsel %vm2068_vm1, %v3038_v25, 0.0 }
 0x6dc   :  { %2196 = vadd.xlane.f32.xlu0 %v2195_v7 }
 0x6dd   :  { %v3040_v46 = vpop.eup %3039 }
 0x6de   :  { %v3042_v18 = vpop.eup %3041  ;;  %v2204_v3 = vsel %vm2068_vm1, %v3040_v46, 0.0 }
 0x6df   :  { %2205 = vadd.xlane.f32.xlu1 %v2204_v3  ;;  %v2201_v63 = vsel %vm2068_vm1, %v3042_v18, 0.0 }
 0x6e0   :  { %2202 = vadd.xlane.f32.xlu0 %v2201_v63 }
 0x6e1   :  { %v3044_v13 = vpop.eup %3043 }
 0x6e2   :  { %v3046_v16 = vpop.eup %3045  ;;  %v2210_v44 = vsel %vm2068_vm1, %v3044_v13, 0.0 }
 0x6e3   :  { %2211 = vadd.xlane.f32.xlu1 %v2210_v44  ;;  %v2207_v49 = vsel %vm2068_vm1, %v3046_v16, 0.0 }
 0x6e4   :  { %2208 = vadd.xlane.f32.xlu0 %v2207_v49 }
 0x753   :  { %v2170_v50 = vpop.xlane.xlu1 %2169 }
 0x754   :  { %3047 = vlog2.f32 %v2170_v50  ;;  %v2167_v51 = vpop.xlane.xlu0 %2166 }
 0x755   :  { %3049 = vlog2.f32 %v2167_v51 }
 0x758   :  { %v2176_v56 = vpop.xlane.xlu1 %2175 }
 0x759   :  { %3051 = vlog2.f32 %v2176_v56  ;;  %v2173_v57 = vpop.xlane.xlu0 %2172 }
 0x75a   :  { %3053 = vlog2.f32 %v2173_v57 }
 0x75c   :  { %v2182_v53 = vpop.xlane.xlu1 %2181 }
 0x75d   :  { %3055 = vlog2.f32 %v2182_v53  ;;  %v2179_v5 = vpop.xlane.xlu0 %2178 }
 0x75e   :  { %v3048_v12 = vpop.eup %3047  ;;  %3057 = vlog2.f32 %v2179_v5 }
 0x75f   :  { %v3050_v17 = vpop.eup %3049  ;;  %v2216_v21 = vmul.f32 0.6931472, %v3048_v12 }
 0x760   :  { %v2214_v4 = vmul.f32 0.6931472, %v3050_v17  ;;  %v2188_v20 = vpop.xlane.xlu1 %2187 }
 0x761   :  { %v2246_v8 = vsub.f32 %v4113_v60, %v2216_v21  ;;  %3059 = vlog2.f32 %v2188_v20  ;;  %v2185_v6 = vpop.xlane.xlu0 %2184 }
 0x762   :  { %v2245_v59 = vsub.f32 %v4117_v61, %v2214_v4  ;;  %3061 = vlog2.f32 %v2185_v6 }
 0x763   :  { %v3052_v48 = vpop.eup %3051  ;;  %2262 = vst.msk [vmem:[%s4296_s9 + $0x8] sm:$0xff] %vm2068_vm1, %v2246_v8 }
 0x764   :  { %v3054_v58 = vpop.eup %3053  ;;  %2261 = vst.msk [vmem:[%s4296_s9] sm:$0xff] %vm2068_vm1, %v2245_v59  ;;  %v2220_v37 = vmul.f32 0.6931472, %v3052_v48  ;;  %v2194_v27 = vpop.xlane.xlu1 %2193 }
 0x765   :  { %v2218_v60 = vmul.f32 0.6931472, %v3054_v58  ;;  %3063 = vlog2.f32 %v2194_v27  ;;  %v2191_v1 = vpop.xlane.xlu0 %2190 }
 0x766   :  { %v2248_v61 = vsub.f32 %v4123_v28, %v2220_v37  ;;  %3065 = vlog2.f32 %v2191_v1 }
 0x767   :  { %v3056_v55 = vpop.eup %3055  ;;  %v2247_v14 = vsub.f32 %v4127_v52, %v2218_v60 }
 0x768   :  { %v3058_v35 = vpop.eup %3057  ;;  %2264 = vst.msk [vmem:[%s4296_s9 + $0x18] sm:$0xff] %vm2068_vm1, %v2248_v61  ;;  %v2224_v54 = vmul.f32 0.6931472, %v3056_v55  ;;  %v2200_v19 = vpop.xlane.xlu1 %2199 }
 0x769   :  { %2263 = vst.msk [vmem:[%s4296_s9 + $0x10] sm:$0xff] %vm2068_vm1, %v2247_v14  ;;  %v2222_v26 = vmul.f32 0.6931472, %v3058_v35  ;;  %3067 = vlog2.f32 %v2200_v19  ;;  %v2197_v28 = vpop.xlane.xlu0 %2196 }
 0x76a   :  { %v2250_v38 = vsub.f32 %v4133_v45, %v2224_v54  ;;  %3069 = vlog2.f32 %v2197_v28 }
 0x76b   :  { %v3060_v52 = vpop.eup %3059  ;;  %v2249_v32 = vsub.f32 %v4137_v9, %v2222_v26 }
 0x76c   :  { %v3062_v0 = vpop.eup %3061  ;;  %2266 = vst.msk [vmem:[%s4296_s9 + $0x28] sm:$0xff] %vm2068_vm1, %v2250_v38  ;;  %v2228_v41 = vmul.f32 0.6931472, %v3060_v52  ;;  %v2206_v29 = vpop.xlane.xlu1 %2205 }
 0x76d   :  { %2265 = vst.msk [vmem:[%s4296_s9 + $0x20] sm:$0xff] %vm2068_vm1, %v2249_v32  ;;  %v2226_v10 = vmul.f32 0.6931472, %v3062_v0  ;;  %3071 = vlog2.f32 %v2206_v29  ;;  %v2203_v45 = vpop.xlane.xlu0 %2202 }
 0x76e   :  { %v2252_v23 = vsub.f32 %v4143_v40, %v2228_v41  ;;  %3073 = vlog2.f32 %v2203_v45 }
 0x76f   :  { %v3064_v9 = vpop.eup %3063  ;;  %v2251_v22 = vsub.f32 %v4147_v43, %v2226_v10 }
 0x770   :  { %v3066_v2 = vpop.eup %3065  ;;  %2268 = vst.msk [vmem:[%s4296_s9 + $0x38] sm:$0xff] %vm2068_vm1, %v2252_v23  ;;  %v2232_v36 = vmul.f32 0.6931472, %v3064_v9  ;;  %v2212_v42 = vpop.xlane.xlu1 %2211 }
 0x771   :  { %2267 = vst.msk [vmem:[%s4296_s9 + $0x30] sm:$0xff] %vm2068_vm1, %v2251_v22  ;;  %v2230_v62 = vmul.f32 0.6931472, %v3066_v2  ;;  %3075 = vlog2.f32 %v2212_v42  ;;  %v2209_v40 = vpop.xlane.xlu0 %2208 }
 0x772   :  { %v2254_v25 = vsub.f32 %v4155_v33, %v2232_v36  ;;  %3077 = vlog2.f32 %v2209_v40 }
 0x773   :  { %v3068_v43 = vpop.eup %3067  ;;  %v2253_v24 = vsub.f32 %v4159_v11, %v2230_v62 }
 0x774   :  { %v3070_v7 = vpop.eup %3069  ;;  %2270 = vst.msk [vmem:[%s4296_s9 + $0x48] sm:$0xff] %vm2068_vm1, %v2254_v25  ;;  %v2236_v46 = vmul.f32 0.6931472, %v3068_v43 }
 0x775   :  { %2269 = vst.msk [vmem:[%s4296_s9 + $0x40] sm:$0xff] %vm2068_vm1, %v2253_v24  ;;  %v2234_v18 = vmul.f32 0.6931472, %v3070_v7 }
 0x776   :  { %v2256_v3 = vsub.f32 %v4166_v34, %v2236_v46 }
 0x777   :  { %v3072_v33 = vpop.eup %3071  ;;  %v2255_v63 = vsub.f32 %v4170_v31, %v2234_v18 }
 0x778   :  { %v3074_v13 = vpop.eup %3073  ;;  %2272 = vst.msk [vmem:[%s4296_s9 + $0x58] sm:$0xff] %vm2068_vm1, %v2256_v3  ;;  %v2240_v11 = vmul.f32 0.6931472, %v3072_v33 }
 0x779   :  { %2271 = vst.msk [vmem:[%s4296_s9 + $0x50] sm:$0xff] %vm2068_vm1, %v2255_v63  ;;  %v2238_v16 = vmul.f32 0.6931472, %v3074_v13 }
 0x77a   :  { %v2258_v44 = vsub.f32 %v4178_v15, %v2240_v11 }
 0x77b   :  { %v3076_v49 = vpop.eup %3075  ;;  %v2257_v34 = vsub.f32 %v4182_v30, %v2238_v16 }
 0x77c   :  { %v3078_v50 = vpop.eup %3077  ;;  %2274 = vst.msk [vmem:[%s4296_s9 + $0x68] sm:$0xff] %vm2068_vm1, %v2258_v44  ;;  %v2244_v31 = vmul.f32 0.6931472, %v3076_v49 }
 0x77d   :  { %2273 = vst.msk [vmem:[%s4296_s9 + $0x60] sm:$0xff] %vm2068_vm1, %v2257_v34  ;;  %v2242_v51 = vmul.f32 0.6931472, %v3078_v50 }
 0x77e   :  { %v2260_v56 = vsub.f32 %v4190_v39, %v2244_v31 }
 0x77f   :  { %v2259_v15 = vsub.f32 %v4194_v47, %v2242_v51 }
 0x780   :  { %2276 = vst.msk [vmem:[%s4296_s9 + $0x78] sm:$0xff] %vm2068_vm1, %v2260_v56 }
 0x781   :  { %2275 = vst.msk [vmem:[%s4296_s9 + $0x70] sm:$0xff] %vm2068_vm1, %v2259_v15 }

</bundles_post_ra>
